<compile_context>
chip_gen: v7x
topology: tpu7x:2x2x1
jax: 0.10.0
libtpu: 0.0.40
codegen_flags: <defaults>
</compile_context>

<pallas_src>
import functools

import jax
import jax.numpy as jnp
from jax import lax
from jax.experimental import pallas as pl
from jax.experimental.pallas import tpu as pltpu


# ----------------------------------------------------------------------------
# BlockSpec helper: full-array block on a grid of (1,)
# ----------------------------------------------------------------------------

def _fb(shape):
    return pl.BlockSpec(shape, lambda *_: (0,) * len(shape))


_ARB = pltpu.CompilerParams(dimension_semantics=("arbitrary",))


# ----------------------------------------------------------------------------
# Generic full-block linear (used only for patch embed and classifier head)
# ----------------------------------------------------------------------------

def _linear_kernel(x_ref, w_ref, b_ref, o_ref):
    x = x_ref[...].astype(jnp.bfloat16)
    o_ref[...] = (jnp.dot(x, w_ref[...], preferred_element_type=jnp.float32)
                  + b_ref[...]).astype(o_ref.dtype)


def linear(x, w, b):
    """x: (M, K) f32; w: (K, N) bf16 (pre-transposed); b: (1, N) f32."""
    M, K = x.shape
    N = w.shape[1]
    return pl.pallas_call(
        _linear_kernel,
        out_shape=jax.ShapeDtypeStruct((M, N), jnp.float32),
        grid=(1,),
        in_specs=[_fb((M, K)), _fb((K, N)), _fb((1, N))],
        out_specs=_fb((M, N)),
        compiler_params=_ARB,
    )(x, w, b)


# ----------------------------------------------------------------------------
# Fused attention half-block: LN1 -> Q/K/V proj -> attention -> out-proj -> +x
# ----------------------------------------------------------------------------

def _attn_block_kernel(x_ref, ln_g_ref, ln_b_ref,
                       wq_ref, bq_ref, wk_ref, bk_ref, wv_ref, bv_ref,
                       wo_ref, bo_ref, o_ref, *, num_heads, head_dim):
    S, B, D = x_ref.shape            # S = attention batch, B = attention seq
    T = S * B
    scale = 1.0 / (head_dim ** 0.5)

    xf = x_ref[...].astype(jnp.float32)      # (S, B, D)
    x2 = xf.reshape(T, D)

    # LayerNorm (norm1), f32, eps=1e-5 (PyTorch semantics)
    mean = jnp.mean(x2, axis=-1, keepdims=True)
    var = jnp.mean((x2 - mean) ** 2, axis=-1, keepdims=True)
    n1 = (x2 - mean) * lax.rsqrt(var + 1e-5) * ln_g_ref[...] + ln_b_ref[...]

    n1_b = n1.astype(jnp.bfloat16)           # query comes from norm1(x)
    x_b = x2.astype(jnp.bfloat16)            # key/value come from raw x

    o_acc = jnp.zeros((T, D), jnp.float32)
    for h in range(num_heads):               # static unroll; weights pre-split
        q = (jnp.dot(n1_b, wq_ref[h], preferred_element_type=jnp.float32)
             + bq_ref[h]).reshape(S, B, head_dim)
        k = (jnp.dot(x_b, wk_ref[h], preferred_element_type=jnp.float32)
             + bk_ref[h]).reshape(S, B, head_dim)
        v = (jnp.dot(x_b, wv_ref[h], preferred_element_type=jnp.float32)
             + bv_ref[h]).reshape(S, B, head_dim)

        s = jnp.einsum('nld,nmd->nlm',
                       q.astype(jnp.bfloat16), k.astype(jnp.bfloat16),
                       preferred_element_type=jnp.float32) * scale
        s = s - jnp.max(s, axis=-1, keepdims=True)
        p = jnp.exp(s)
        p = p * pl.reciprocal(jnp.sum(p, axis=-1, keepdims=True), approx=True)

        ctx = jnp.einsum('nlm,nmd->nld',
                         p.astype(jnp.bfloat16), v.astype(jnp.bfloat16),
                         preferred_element_type=jnp.float32)
        # out-proj decomposed into per-head row blocks: concat+matmul == sum_h
        o_acc = o_acc + jnp.dot(ctx.reshape(T, head_dim).astype(jnp.bfloat16),
                                wo_ref[h], preferred_element_type=jnp.float32)

    out = x2 + o_acc + bo_ref[...]           # residual + out-proj bias
    o_ref[...] = out.reshape(S, B, D).astype(o_ref.dtype)


def attn_block(x_sbd, blk, num_heads):
    S, B, D = x_sbd.shape
    hd = D // num_heads
    ops = (x_sbd, blk['ln1_g'], blk['ln1_b'],
           blk['wq'], blk['bq'], blk['wk'], blk['bk'], blk['wv'], blk['bv'],
           blk['wo'], blk['bo'])
    return pl.pallas_call(
        functools.partial(_attn_block_kernel, num_heads=num_heads, head_dim=hd),
        out_shape=jax.ShapeDtypeStruct((S, B, D), jnp.float32),
        grid=(1,),
        in_specs=[_fb(o.shape) for o in ops],
        out_specs=_fb((S, B, D)),
        compiler_params=_ARB,
    )(*ops)


# ----------------------------------------------------------------------------
# Fused MoE half-block: LN2 -> top-1 gate -> expert MLPs -> gated sum -> +x
# ----------------------------------------------------------------------------

def _moe_block_kernel(x_ref, ln_g_ref, ln_b_ref, gw_ref, gb_ref,
                      w1_ref, b1_ref, w2_ref, b2_ref, o_ref, *, num_experts):
    S, B, D = x_ref.shape
    T = S * B

    xf = x_ref[...].astype(jnp.float32)
    x2 = xf.reshape(T, D)

    # LayerNorm (norm2)
    mean = jnp.mean(x2, axis=-1, keepdims=True)
    var = jnp.mean((x2 - mean) ** 2, axis=-1, keepdims=True)
    n2 = (x2 - mean) * lax.rsqrt(var + 1e-5) * ln_g_ref[...] + ln_b_ref[...]
    n2_b = n2.astype(jnp.bfloat16)

    # Top-1 gate (GShard-style): softmax over experts, route to argmax,
    # scale expert output by its softmax probability.
    logits = (jnp.dot(n2_b, gw_ref[...], preferred_element_type=jnp.float32)
              + gb_ref[...])                                     # (T, E)
    m = jnp.max(logits, axis=-1, keepdims=True)
    pe = jnp.exp(logits - m)
    probs = pe / jnp.sum(pe, axis=-1, keepdims=True)
    top_p = jnp.max(probs, axis=-1, keepdims=True)               # (T, 1)
    col = lax.broadcasted_iota(jnp.int32, probs.shape, 1).astype(jnp.float32)
    masked = jnp.where(probs >= top_p, col, float(num_experts))
    top_idx = jnp.min(masked, axis=-1, keepdims=True)            # first argmax

    # TODO(synk): dense all-experts compute masked by the gate; at scale use
    # routed compute (sorted tokens + PrefetchScalarGridSpec group offsets).
    acc = jnp.zeros((T, D), jnp.float32)
    for e in range(num_experts):             # static unroll over experts
        gate_e = jnp.where(top_idx == float(e), top_p, 0.0)      # (T, 1)
        h = (jnp.dot(n2_b, w1_ref[e], preferred_element_type=jnp.float32)
             + b1_ref[e])
        # TODO(synk): PyTorch nn.GELU default is the exact erf form; tanh
        # approximation is used here for reliable Mosaic lowering.
        h = 0.5 * h * (1.0 + jnp.tanh(0.7978845608028654
                                      * (h + 0.044715 * h * h * h)))
        y = (jnp.dot(h.astype(jnp.bfloat16), w2_ref[e],
                     preferred_element_type=jnp.float32) + b2_ref[e])
        acc = acc + gate_e * y

    o_ref[...] = (x2 + acc).reshape(S, B, D).astype(o_ref.dtype)


def moe_block(x_sbd, blk, num_experts):
    S, B, D = x_sbd.shape
    ops = (x_sbd, blk['ln2_g'], blk['ln2_b'], blk['gate_w'], blk['gate_b'],
           blk['w1'], blk['b1'], blk['w2'], blk['b2'])
    return pl.pallas_call(
        functools.partial(_moe_block_kernel, num_experts=num_experts),
        out_shape=jax.ShapeDtypeStruct((S, B, D), jnp.float32),
        grid=(1,),
        in_specs=[_fb(o.shape) for o in ops],
        out_specs=_fb((S, B, D)),
        compiler_params=_ARB,
    )(*ops)


# ----------------------------------------------------------------------------
# Forward pass
# ----------------------------------------------------------------------------

@functools.partial(jax.jit, static_argnames=("patch_size", "num_heads",
                                             "num_experts"))
def moevit_forward(x, params, *, patch_size, num_heads, num_experts):
    B, C, H, W = x.shape
    p = patch_size
    nh, nw = H // p, W // p
    D = params['patch_b'].shape[-1]

    # Patch embed: Conv2d(stride=kernel) == matmul on non-overlapping patches.
    patches = (x.reshape(B, C, nh, p, nw, p)
                 .transpose(0, 2, 4, 1, 3, 5)
                 .reshape(B * nh * nw, C * p * p))
    tok = linear(patches, params['patch_w'], params['patch_b'])
    tok = tok.reshape(B, nh * nw, D)

    cls = jnp.broadcast_to(params['cls_token'], (B, 1, D))
    xs = jnp.concatenate([cls, tok], axis=1) + params['pos_embed']   # (B, S, D)

    # Single layout change: (B,S,D) -> (S,B,D).  With batch_first=False the
    # reference attention treats B as the sequence axis and S as the batch
    # axis; this layout keeps that convention with no further HBM transposes.
    xs = jnp.transpose(xs, (1, 0, 2)).astype(jnp.float32)            # (S, B, D)

    for blk in params['blocks']:
        xs = attn_block(xs, blk, num_heads)      # x = x + attn(norm1(x), x, x)
        xs = moe_block(xs, blk, num_experts)     # x = x + moe(norm2(x))

    cls_out = xs[0]                               # == x[:, 0] in (B,S,D)
    return linear(cls_out, params['head_w'], params['head_b'])


# ----------------------------------------------------------------------------
# Deterministic parameter init.  Weights are generated in PyTorch layouts and
# converted ONCE to kernel-friendly layouts (pre-transposed, pre-split per
# head / per expert, matmul weights stored in bf16).
# ----------------------------------------------------------------------------

def init_params(key, *, img_size, patch_size, in_chans, num_classes,
                embed_dim, depth, num_heads, num_experts, mlp_ratio=4.0):
    D = embed_dim
    Hh = int(D * mlp_ratio)
    hd = D // num_heads
    n_patches = (img_size // patch_size) ** 2
    keys = jax.random.split(key, 4 + depth)

    def nrm(k, shape):
        return jax.random.normal(k, shape, jnp.float32) * 0.02

    params = dict(
        # PyTorch conv weight (D, C*p*p) -> (C*p*p, D) bf16
        patch_w=nrm(keys[0], (D, in_chans * patch_size * patch_size)
                    ).T.astype(jnp.bfloat16),
        patch_b=jnp.zeros((1, D), jnp.float32),
        cls_token=nrm(keys[1], (1, 1, D)),
        pos_embed=nrm(keys[2], (1, n_patches + 1, D)),
        # PyTorch head weight (num_classes, D) -> (D, num_classes) bf16
        head_w=nrm(keys[3], (num_classes, D)).T.astype(jnp.bfloat16),
        head_b=jnp.zeros((1, num_classes), jnp.float32),
        blocks=[],
    )

    def split_heads_w(w):        # PyTorch (D_out, D_in) -> (H, D_in, hd) bf16
        return jnp.transpose(w.T.reshape(D, num_heads, hd),
                             (1, 0, 2)).astype(jnp.bfloat16)

    def split_heads_b(b):        # (D,) -> (H, 1, hd) f32
        return b.reshape(num_heads, 1, hd).astype(jnp.float32)

    for d in range(depth):
        bkeys = jax.random.split(keys[4 + d], 6)
        in_w = nrm(bkeys[0], (3 * D, D))          # nn.MHA in_proj_weight
        in_b = jnp.zeros((3 * D,), jnp.float32)   # nn.MHA in_proj_bias
        out_w = nrm(bkeys[1], (D, D))             # nn.MHA out_proj.weight
        gate_w = nrm(bkeys[2], (num_experts, D))
        w1 = nrm(bkeys[3], (num_experts, Hh, D))
        w2 = nrm(bkeys[4], (num_experts, D, Hh))

        params['blocks'].append(dict(
            ln1_g=jnp.ones((1, D), jnp.float32),
            ln1_b=jnp.zeros((1, D), jnp.float32),
            wq=split_heads_w(in_w[:D]), bq=split_heads_b(in_b[:D]),
            wk=split_heads_w(in_w[D:2 * D]), bk=split_heads_b(in_b[D:2 * D]),
            wv=split_heads_w(in_w[2 * D:]), bv=split_heads_b(in_b[2 * D:]),
            # out-proj split into per-head row blocks: (H, hd, D) bf16
            wo=out_w.T.reshape(num_heads, hd, D).astype(jnp.bfloat16),
            bo=jnp.zeros((1, D), jnp.float32),
            ln2_g=jnp.ones((1, D), jnp.float32),
            ln2_b=jnp.zeros((1, D), jnp.float32),
            gate_w=gate_w.T.astype(jnp.bfloat16),            # (D, E)
            gate_b=jnp.zeros((1, num_experts), jnp.float32),
            w1=jnp.transpose(w1, (0, 2, 1)).astype(jnp.bfloat16),  # (E, D, Hh)
            b1=jnp.zeros((num_experts, 1, Hh), jnp.float32),
            w2=jnp.transpose(w2, (0, 2, 1)).astype(jnp.bfloat16),  # (E, Hh, D)
            b2=jnp.zeros((num_experts, 1, D), jnp.float32),
        ))
    return params


if __name__ == "__main__":
    cfg = dict(img_size=16, patch_size=8, in_chans=3, num_classes=10,
               embed_dim=32, depth=2, num_heads=4, num_experts=4)
    key = jax.random.PRNGKey(0)
    pkey, xkey = jax.random.split(key)
    params = init_params(pkey, **cfg)
    x = jax.random.normal(
        xkey, (2, cfg['in_chans'], cfg['img_size'], cfg['img_size']),
        jnp.float32)
    out = moevit_forward(x, params,
                         patch_size=cfg['patch_size'],
                         num_heads=cfg['num_heads'],
                         num_experts=cfg['num_experts'])
    out = jax.block_until_ready(out)
    assert out.shape == (2, cfg['num_classes'])
    assert jnp.all(jnp.isfinite(out))
    print("KERNEL_OK")
</pallas_src>

<mosaic_0001>
module attributes {stable_mosaic.version = 11 : i64} {
  func.func @_linear_kernel(%arg0: i32, %arg1: memref<8x192xf32, #tpu.memory_space<vmem>>, %arg2: memref<192x32xbf16, #tpu.memory_space<vmem>>, %arg3: memref<1x32xf32, #tpu.memory_space<vmem>>, %arg4: memref<8x32xf32, #tpu.memory_space<vmem>>) attributes {dimension_semantics = [#tpu.dimension_semantics<arbitrary>], iteration_bounds = array<i64: 1>, scalar_prefetch = 0 : i64, scratch_operands = 0 : i64, tpu.core_type = #tpu.core_type<tc>, window_params = [{pipeline_mode = #tpu.pipeline_mode<synchronous>, transform_indices = @transform_0, window_bounds = array<i64: 8, 192>}, {pipeline_mode = #tpu.pipeline_mode<synchronous>, transform_indices = @transform_1, window_bounds = array<i64: 192, 32>}, {pipeline_mode = #tpu.pipeline_mode<synchronous>, transform_indices = @transform_2, window_bounds = array<i64: 1, 32>}, {pipeline_mode = #tpu.pipeline_mode<synchronous>, transform_indices = @transform_3, window_bounds = array<i64: 8, 32>}]} {
    %c0 = arith.constant 0 : index
    %c0_0 = arith.constant 0 : index
    %0 = vector.load %arg1[%c0, %c0_0] : memref<8x192xf32, #tpu.memory_space<vmem>>, vector<8x192xf32>
    %1 = arith.truncf %0 : vector<8x192xf32> to vector<8x192xbf16>
    %c0_1 = arith.constant 0 : index
    %c0_2 = arith.constant 0 : index
    %2 = vector.load %arg2[%c0_1, %c0_2] : memref<192x32xbf16, #tpu.memory_space<vmem>>, vector<192x32xbf16>
    %cst = arith.constant dense<0.000000e+00> : vector<8x32xf32>
    %3 = tpu.matmul %1, %2, %cst {dimension_numbers = #tpu.dot_dimension_numbers<[1], [0], [0], [1], [0, 0, 1, 1], [], []>} : vector<8x192xbf16>, vector<192x32xbf16>, vector<8x32xf32> -> vector<8x32xf32>
    %c0_3 = arith.constant 0 : index
    %c0_4 = arith.constant 0 : index
    %4 = vector.load %arg3[%c0_3, %c0_4] : memref<1x32xf32, #tpu.memory_space<vmem>>, vector<1x32xf32>
    %5 = vector.broadcast %4 : vector<1x32xf32> to vector<8x32xf32>
    %6 = arith.addf %3, %5 : vector<8x32xf32>
    %c0_5 = arith.constant 0 : index
    %c0_6 = arith.constant 0 : index
    %7 = vector.load %arg4[%c0_5, %c0_6] : memref<8x32xf32, #tpu.memory_space<vmem>>, vector<8x32xf32>
    tpu.vector_store %arg4[%c0_5, %c0_6], %6 {strides = array<i32>} : memref<8x32xf32, #tpu.memory_space<vmem>>, vector<8x32xf32>,
    return
  }
  func.func @transform_0(%arg0: i32) -> (i32, i32) {
    %c0_i32 = arith.constant 0 : i32
    %c0_i32_0 = arith.constant 0 : i32
    %c0_i32_1 = arith.constant 0 : i32
    return %c0_i32, %c0_i32_0 : i32, i32
  }
  func.func @transform_1(%arg0: i32) -> (i32, i32) {
    %c0_i32 = arith.constant 0 : i32
    %c0_i32_0 = arith.constant 0 : i32
    %c0_i32_1 = arith.constant 0 : i32
    return %c0_i32, %c0_i32_0 : i32, i32
  }
  func.func @transform_2(%arg0: i32) -> (i32, i32) {
    %c0_i32 = arith.constant 0 : i32
    %c0_i32_0 = arith.constant 0 : i32
    %c0_i32_1 = arith.constant 0 : i32
    return %c0_i32, %c0_i32_0 : i32, i32
  }
  func.func @transform_3(%arg0: i32) -> (i32, i32) {
    %c0_i32 = arith.constant 0 : i32
    %c0_i32_0 = arith.constant 0 : i32
    %c0_i32_1 = arith.constant 0 : i32
    return %c0_i32, %c0_i32_0 : i32, i32
  }
}

module attributes {stable_mosaic.version = 11 : i64} {
  func.func @_attn_block_kernel(%arg0: i32, %arg1: memref<5x2x32xf32, #tpu.memory_space<vmem>>, %arg2: memref<1x32xf32, #tpu.memory_space<vmem>>, %arg3: memref<1x32xf32, #tpu.memory_space<vmem>>, %arg4: memref<4x32x8xbf16, #tpu.memory_space<vmem>>, %arg5: memref<4x1x8xf32, #tpu.memory_space<vmem>>, %arg6: memref<4x32x8xbf16, #tpu.memory_space<vmem>>, %arg7: memref<4x1x8xf32, #tpu.memory_space<vmem>>, %arg8: memref<4x32x8xbf16, #tpu.memory_space<vmem>>, %arg9: memref<4x1x8xf32, #tpu.memory_space<vmem>>, %arg10: memref<4x8x32xbf16, #tpu.memory_space<vmem>>, %arg11: memref<1x32xf32, #tpu.memory_space<vmem>>, %arg12: memref<5x2x32xf32, #tpu.memory_space<vmem>>) attributes {dimension_semantics = [#tpu.dimension_semantics<arbitrary>], iteration_bounds = array<i64: 1>, scalar_prefetch = 0 : i64, scratch_operands = 0 : i64, tpu.core_type = #tpu.core_type<tc>, window_params = [{pipeline_mode = #tpu.pipeline_mode<synchronous>, transform_indices = @transform_0, window_bounds = array<i64: 5, 2, 32>}, {pipeline_mode = #tpu.pipeline_mode<synchronous>, transform_indices = @transform_1, window_bounds = array<i64: 1, 32>}, {pipeline_mode = #tpu.pipeline_mode<synchronous>, transform_indices = @transform_2, window_bounds = array<i64: 1, 32>}, {pipeline_mode = #tpu.pipeline_mode<synchronous>, transform_indices = @transform_3, window_bounds = array<i64: 4, 32, 8>}, {pipeline_mode = #tpu.pipeline_mode<synchronous>, transform_indices = @transform_4, window_bounds = array<i64: 4, 1, 8>}, {pipeline_mode = #tpu.pipeline_mode<synchronous>, transform_indices = @transform_5, window_bounds = array<i64: 4, 32, 8>}, {pipeline_mode = #tpu.pipeline_mode<synchronous>, transform_indices = @transform_6, window_bounds = array<i64: 4, 1, 8>}, {pipeline_mode = #tpu.pipeline_mode<synchronous>, transform_indices = @transform_7, window_bounds = array<i64: 4, 32, 8>}, {pipeline_mode = #tpu.pipeline_mode<synchronous>, transform_indices = @transform_8, window_bounds = array<i64: 4, 1, 8>}, {pipeline_mode = #tpu.pipeline_mode<synchronous>, transform_indices = @transform_9, window_bounds = array<i64: 4, 8, 32>}, {pipeline_mode = #tpu.pipeline_mode<synchronous>, transform_indices = @transform_10, window_bounds = array<i64: 1, 32>}, {pipeline_mode = #tpu.pipeline_mode<synchronous>, transform_indices = @transform_11, window_bounds = array<i64: 5, 2, 32>}]} {
    %c0 = arith.constant 0 : index
    %c0_0 = arith.constant 0 : index
    %c0_1 = arith.constant 0 : index
    %0 = vector.load %arg1[%c0, %c0_0, %c0_1] : memref<5x2x32xf32, #tpu.memory_space<vmem>>, vector<5x2x32xf32>
    %1 = vector.shape_cast %0 : vector<5x2x32xf32> to vector<10x32xf32>
    %cst = arith.constant dense<0.000000e+00> : vector<10xf32>
    %2 = vector.multi_reduction <add>, %1, %cst [1] : vector<10x32xf32> to vector<10xf32>
    %3 = vector.shape_cast %2 : vector<10xf32> to vector<10x1xf32>
    %cst_2 = arith.constant 3.200000e+01 : f32
    %4 = vector.broadcast %cst_2 : f32 to vector<10x1xf32>
    %5 = arith.divf %3, %4 : vector<10x1xf32>
    %6 = vector.broadcast %5 : vector<10x1xf32> to vector<10x32xf32>
    %7 = arith.subf %1, %6 : vector<10x32xf32>
    %8 = arith.mulf %7, %7 : vector<10x32xf32>
    %cst_3 = arith.constant dense<0.000000e+00> : vector<10xf32>
    %9 = vector.multi_reduction <add>, %8, %cst_3 [1] : vector<10x32xf32> to vector<10xf32>
    %10 = vector.shape_cast %9 : vector<10xf32> to vector<10x1xf32>
    %cst_4 = arith.constant 3.200000e+01 : f32
    %11 = vector.broadcast %cst_4 : f32 to vector<10x1xf32>
    %12 = arith.divf %10, %11 : vector<10x1xf32>
    %13 = vector.broadcast %5 : vector<10x1xf32> to vector<10x32xf32>
    %14 = arith.subf %1, %13 : vector<10x32xf32>
    %cst_5 = arith.constant 9.99999974E-6 : f32
    %15 = vector.broadcast %cst_5 : f32 to vector<10x1xf32>
    %16 = arith.addf %12, %15 : vector<10x1xf32>
    %17 = math.rsqrt %16 : vector<10x1xf32>
    %18 = vector.broadcast %17 : vector<10x1xf32> to vector<10x32xf32>
    %19 = arith.mulf %14, %18 : vector<10x32xf32>
    %c0_6 = arith.constant 0 : index
    %c0_7 = arith.constant 0 : index
    %20 = vector.load %arg2[%c0_6, %c0_7] : memref<1x32xf32, #tpu.memory_space<vmem>>, vector<1x32xf32>
    %21 = vector.broadcast %20 : vector<1x32xf32> to vector<10x32xf32>
    %22 = arith.mulf %19, %21 : vector<10x32xf32>
    %c0_8 = arith.constant 0 : index
    %c0_9 = arith.constant 0 : index
    %23 = vector.load %arg3[%c0_8, %c0_9] : memref<1x32xf32, #tpu.memory_space<vmem>>, vector<1x32xf32>
    %24 = vector.broadcast %23 : vector<1x32xf32> to vector<10x32xf32>
    %25 = arith.addf %22, %24 : vector<10x32xf32>
    %26 = arith.truncf %25 : vector<10x32xf32> to vector<10x32xbf16>
    %27 = arith.truncf %1 : vector<10x32xf32> to vector<10x32xbf16>
    %cst_10 = arith.constant 0.000000e+00 : f32
    %28 = vector.broadcast %cst_10 : f32 to vector<10x32xf32>
    %c0_11 = arith.constant 0 : index
    %c0_12 = arith.constant 0 : index
    %c0_13 = arith.constant 0 : index
    %29 = vector.load %arg4[%c0_11, %c0_12, %c0_13] : memref<4x32x8xbf16, #tpu.memory_space<vmem>>, vector<1x32x8xbf16>
    %30 = vector.shape_cast %29 : vector<1x32x8xbf16> to vector<32x8xbf16>
    %cst_14 = arith.constant dense<0.000000e+00> : vector<10x8xf32>
    %31 = tpu.matmul %26, %30, %cst_14 {dimension_numbers = #tpu.dot_dimension_numbers<[1], [0], [0], [1], [0, 0, 1, 1], [], []>} : vector<10x32xbf16>, vector<32x8xbf16>, vector<10x8xf32> -> vector<10x8xf32>
    %c0_15 = arith.constant 0 : index
    %c0_16 = arith.constant 0 : index
    %c0_17 = arith.constant 0 : index
    %32 = vector.load %arg5[%c0_15, %c0_16, %c0_17] : memref<4x1x8xf32, #tpu.memory_space<vmem>>, vector<1x1x8xf32>
    %33 = vector.shape_cast %32 : vector<1x1x8xf32> to vector<1x8xf32>
    %34 = vector.broadcast %33 : vector<1x8xf32> to vector<10x8xf32>
    %35 = arith.addf %31, %34 : vector<10x8xf32>
    %36 = vector.shape_cast %35 : vector<10x8xf32> to vector<5x2x8xf32>
    %c0_18 = arith.constant 0 : index
    %c0_19 = arith.constant 0 : index
    %c0_20 = arith.constant 0 : index
    %37 = vector.load %arg6[%c0_18, %c0_19, %c0_20] : memref<4x32x8xbf16, #tpu.memory_space<vmem>>, vector<1x32x8xbf16>
    %38 = vector.shape_cast %37 : vector<1x32x8xbf16> to vector<32x8xbf16>
    %cst_21 = arith.constant dense<0.000000e+00> : vector<10x8xf32>
    %39 = tpu.matmul %27, %38, %cst_21 {dimension_numbers = #tpu.dot_dimension_numbers<[1], [0], [0], [1], [0, 0, 1, 1], [], []>} : vector<10x32xbf16>, vector<32x8xbf16>, vector<10x8xf32> -> vector<10x8xf32>
    %c0_22 = arith.constant 0 : index
    %c0_23 = arith.constant 0 : index
    %c0_24 = arith.constant 0 : index
    %40 = vector.load %arg7[%c0_22, %c0_23, %c0_24] : memref<4x1x8xf32, #tpu.memory_space<vmem>>, vector<1x1x8xf32>
    %41 = vector.shape_cast %40 : vector<1x1x8xf32> to vector<1x8xf32>
    %42 = vector.broadcast %41 : vector<1x8xf32> to vector<10x8xf32>
    %43 = arith.addf %39, %42 : vector<10x8xf32>
    %44 = vector.shape_cast %43 : vector<10x8xf32> to vector<5x2x8xf32>
    %c0_25 = arith.constant 0 : index
    %c0_26 = arith.constant 0 : index
    %c0_27 = arith.constant 0 : index
    %45 = vector.load %arg8[%c0_25, %c0_26, %c0_27] : memref<4x32x8xbf16, #tpu.memory_space<vmem>>, vector<1x32x8xbf16>
    %46 = vector.shape_cast %45 : vector<1x32x8xbf16> to vector<32x8xbf16>
    %cst_28 = arith.constant dense<0.000000e+00> : vector<10x8xf32>
    %47 = tpu.matmul %27, %46, %cst_28 {dimension_numbers = #tpu.dot_dimension_numbers<[1], [0], [0], [1], [0, 0, 1, 1], [], []>} : vector<10x32xbf16>, vector<32x8xbf16>, vector<10x8xf32> -> vector<10x8xf32>
    %c0_29 = arith.constant 0 : index
    %c0_30 = arith.constant 0 : index
    %c0_31 = arith.constant 0 : index
    %48 = vector.load %arg9[%c0_29, %c0_30, %c0_31] : memref<4x1x8xf32, #tpu.memory_space<vmem>>, vector<1x1x8xf32>
    %49 = vector.shape_cast %48 : vector<1x1x8xf32> to vector<1x8xf32>
    %50 = vector.broadcast %49 : vector<1x8xf32> to vector<10x8xf32>
    %51 = arith.addf %47, %50 : vector<10x8xf32>
    %52 = vector.shape_cast %51 : vector<10x8xf32> to vector<5x2x8xf32>
    %53 = arith.truncf %36 : vector<5x2x8xf32> to vector<5x2x8xbf16>
    %54 = arith.truncf %44 : vector<5x2x8xf32> to vector<5x2x8xbf16>
    "tpu.trace_start"() <{level = 10 : i32, message = "nld,nmd->nlm"}> : () -> ()
    %cst_32 = arith.constant dense<0.000000e+00> : vector<5x2x2xf32>
    %55 = tpu.matmul %53, %54, %cst_32 {dimension_numbers = #tpu.dot_dimension_numbers<[2], [2], [1], [1], [0, 0, 0, 1, 1, 1], [0], [0]>} : vector<5x2x8xbf16>, vector<5x2x8xbf16>, vector<5x2x2xf32> -> vector<5x2x2xf32>
    "tpu.trace_stop"() : () -> ()
    %cst_33 = arith.constant 0.353553385 : f32
    %56 = vector.broadcast %cst_33 : f32 to vector<5x2x2xf32>
    %57 = arith.mulf %55, %56 : vector<5x2x2xf32>
    %cst_34 = arith.constant dense<0xFF800000> : vector<5x2xf32>
    %58 = vector.multi_reduction <maximumf>, %57, %cst_34 [2] : vector<5x2x2xf32> to vector<5x2xf32>
    %59 = vector.shape_cast %58 : vector<5x2xf32> to vector<5x2x1xf32>
    %60 = vector.broadcast %59 : vector<5x2x1xf32> to vector<5x2x2xf32>
    %61 = arith.subf %57, %60 : vector<5x2x2xf32>
    %62 = math.exp %61 : vector<5x2x2xf32>
    %cst_35 = arith.constant dense<0.000000e+00> : vector<5x2xf32>
    %63 = vector.multi_reduction <add>, %62, %cst_35 [2] : vector<5x2x2xf32> to vector<5x2xf32>
    %64 = vector.shape_cast %63 : vector<5x2xf32> to vector<5x2x1xf32>
    %65 = tpu.reciprocal %64 {approx = true} : vector<5x2x1xf32> -> vector<5x2x1xf32>
    %66 = vector.broadcast %65 : vector<5x2x1xf32> to vector<5x2x2xf32>
    %67 = arith.mulf %62, %66 : vector<5x2x2xf32>
    %68 = arith.truncf %67 : vector<5x2x2xf32> to vector<5x2x2xbf16>
    %69 = arith.truncf %52 : vector<5x2x8xf32> to vector<5x2x8xbf16>
    "tpu.trace_start"() <{level = 10 : i32, message = "nlm,nmd->nld"}> : () -> ()
    %cst_36 = arith.constant dense<0.000000e+00> : vector<5x2x8xf32>
    %70 = tpu.matmul %68, %69, %cst_36 {dimension_numbers = #tpu.dot_dimension_numbers<[2], [1], [1], [2], [0, 0, 0, 1, 1, 2], [0], [0]>} : vector<5x2x2xbf16>, vector<5x2x8xbf16>, vector<5x2x8xf32> -> vector<5x2x8xf32>
    "tpu.trace_stop"() : () -> ()
    %71 = vector.shape_cast %70 : vector<5x2x8xf32> to vector<10x8xf32>
    %72 = arith.truncf %71 : vector<10x8xf32> to vector<10x8xbf16>
    %c0_37 = arith.constant 0 : index
    %c0_38 = arith.constant 0 : index
    %c0_39 = arith.constant 0 : index
    %73 = vector.load %arg10[%c0_37, %c0_38, %c0_39] : memref<4x8x32xbf16, #tpu.memory_space<vmem>>, vector<1x8x32xbf16>
    %74 = vector.shape_cast %73 : vector<1x8x32xbf16> to vector<8x32xbf16>
    %cst_40 = arith.constant dense<0.000000e+00> : vector<10x32xf32>
    %75 = tpu.matmul %72, %74, %cst_40 {dimension_numbers = #tpu.dot_dimension_numbers<[1], [0], [0], [1], [0, 0, 1, 1], [], []>} : vector<10x8xbf16>, vector<8x32xbf16>, vector<10x32xf32> -> vector<10x32xf32>
    %76 = arith.addf %28, %75 : vector<10x32xf32>
    %c1 = arith.constant 1 : index
    %c0_41 = arith.constant 0 : index
    %c0_42 = arith.constant 0 : index
    %77 = vector.load %arg4[%c1, %c0_41, %c0_42] : memref<4x32x8xbf16, #tpu.memory_space<vmem>>, vector<1x32x8xbf16>
    %78 = vector.shape_cast %77 : vector<1x32x8xbf16> to vector<32x8xbf16>
    %cst_43 = arith.constant dense<0.000000e+00> : vector<10x8xf32>
    %79 = tpu.matmul %26, %78, %cst_43 {dimension_numbers = #tpu.dot_dimension_numbers<[1], [0], [0], [1], [0, 0, 1, 1], [], []>} : vector<10x32xbf16>, vector<32x8xbf16>, vector<10x8xf32> -> vector<10x8xf32>
    %c1_44 = arith.constant 1 : index
    %c0_45 = arith.constant 0 : index
    %c0_46 = arith.constant 0 : index
    %80 = vector.load %arg5[%c1_44, %c0_45, %c0_46] : memref<4x1x8xf32, #tpu.memory_space<vmem>>, vector<1x1x8xf32>
    %81 = vector.shape_cast %80 : vector<1x1x8xf32> to vector<1x8xf32>
    %82 = vector.broadcast %81 : vector<1x8xf32> to vector<10x8xf32>
    %83 = arith.addf %79, %82 : vector<10x8xf32>
    %84 = vector.shape_cast %83 : vector<10x8xf32> to vector<5x2x8xf32>
    %c1_47 = arith.constant 1 : index
    %c0_48 = arith.constant 0 : index
    %c0_49 = arith.constant 0 : index
    %85 = vector.load %arg6[%c1_47, %c0_48, %c0_49] : memref<4x32x8xbf16, #tpu.memory_space<vmem>>, vector<1x32x8xbf16>
    %86 = vector.shape_cast %85 : vector<1x32x8xbf16> to vector<32x8xbf16>
    %cst_50 = arith.constant dense<0.000000e+00> : vector<10x8xf32>
    %87 = tpu.matmul %27, %86, %cst_50 {dimension_numbers = #tpu.dot_dimension_numbers<[1], [0], [0], [1], [0, 0, 1, 1], [], []>} : vector<10x32xbf16>, vector<32x8xbf16>, vector<10x8xf32> -> vector<10x8xf32>
    %c1_51 = arith.constant 1 : index
    %c0_52 = arith.constant 0 : index
    %c0_53 = arith.constant 0 : index
    %88 = vector.load %arg7[%c1_51, %c0_52, %c0_53] : memref<4x1x8xf32, #tpu.memory_space<vmem>>, vector<1x1x8xf32>
    %89 = vector.shape_cast %88 : vector<1x1x8xf32> to vector<1x8xf32>
    %90 = vector.broadcast %89 : vector<1x8xf32> to vector<10x8xf32>
    %91 = arith.addf %87, %90 : vector<10x8xf32>
    %92 = vector.shape_cast %91 : vector<10x8xf32> to vector<5x2x8xf32>
    %c1_54 = arith.constant 1 : index
    %c0_55 = arith.constant 0 : index
    %c0_56 = arith.constant 0 : index
    %93 = vector.load %arg8[%c1_54, %c0_55, %c0_56] : memref<4x32x8xbf16, #tpu.memory_space<vmem>>, vector<1x32x8xbf16>
    %94 = vector.shape_cast %93 : vector<1x32x8xbf16> to vector<32x8xbf16>
    %cst_57 = arith.constant dense<0.000000e+00> : vector<10x8xf32>
    %95 = tpu.matmul %27, %94, %cst_57 {dimension_numbers = #tpu.dot_dimension_numbers<[1], [0], [0], [1], [0, 0, 1, 1], [], []>} : vector<10x32xbf16>, vector<32x8xbf16>, vector<10x8xf32> -> vector<10x8xf32>
    %c1_58 = arith.constant 1 : index
    %c0_59 = arith.constant 0 : index
    %c0_60 = arith.constant 0 : index
    %96 = vector.load %arg9[%c1_58, %c0_59, %c0_60] : memref<4x1x8xf32, #tpu.memory_space<vmem>>, vector<1x1x8xf32>
    %97 = vector.shape_cast %96 : vector<1x1x8xf32> to vector<1x8xf32>
    %98 = vector.broadcast %97 : vector<1x8xf32> to vector<10x8xf32>
    %99 = arith.addf %95, %98 : vector<10x8xf32>
    %100 = vector.shape_cast %99 : vector<10x8xf32> to vector<5x2x8xf32>
    %101 = arith.truncf %84 : vector<5x2x8xf32> to vector<5x2x8xbf16>
    %102 = arith.truncf %92 : vector<5x2x8xf32> to vector<5x2x8xbf16>
    "tpu.trace_start"() <{level = 10 : i32, message = "nld,nmd->nlm"}> : () -> ()
    %cst_61 = arith.constant dense<0.000000e+00> : vector<5x2x2xf32>
    %103 = tpu.matmul %101, %102, %cst_61 {dimension_numbers = #tpu.dot_dimension_numbers<[2], [2], [1], [1], [0, 0, 0, 1, 1, 1], [0], [0]>} : vector<5x2x8xbf16>, vector<5x2x8xbf16>, vector<5x2x2xf32> -> vector<5x2x2xf32>
    "tpu.trace_stop"() : () -> ()
    %cst_62 = arith.constant 0.353553385 : f32
    %104 = vector.broadcast %cst_62 : f32 to vector<5x2x2xf32>
    %105 = arith.mulf %103, %104 : vector<5x2x2xf32>
    %cst_63 = arith.constant dense<0xFF800000> : vector<5x2xf32>
    %106 = vector.multi_reduction <maximumf>, %105, %cst_63 [2] : vector<5x2x2xf32> to vector<5x2xf32>
    %107 = vector.shape_cast %106 : vector<5x2xf32> to vector<5x2x1xf32>
    %108 = vector.broadcast %107 : vector<5x2x1xf32> to vector<5x2x2xf32>
    %109 = arith.subf %105, %108 : vector<5x2x2xf32>
    %110 = math.exp %109 : vector<5x2x2xf32>
    %cst_64 = arith.constant dense<0.000000e+00> : vector<5x2xf32>
    %111 = vector.multi_reduction <add>, %110, %cst_64 [2] : vector<5x2x2xf32> to vector<5x2xf32>
    %112 = vector.shape_cast %111 : vector<5x2xf32> to vector<5x2x1xf32>
    %113 = tpu.reciprocal %112 {approx = true} : vector<5x2x1xf32> -> vector<5x2x1xf32>
    %114 = vector.broadcast %113 : vector<5x2x1xf32> to vector<5x2x2xf32>
    %115 = arith.mulf %110, %114 : vector<5x2x2xf32>
    %116 = arith.truncf %115 : vector<5x2x2xf32> to vector<5x2x2xbf16>
    %117 = arith.truncf %100 : vector<5x2x8xf32> to vector<5x2x8xbf16>
    "tpu.trace_start"() <{level = 10 : i32, message = "nlm,nmd->nld"}> : () -> ()
    %cst_65 = arith.constant dense<0.000000e+00> : vector<5x2x8xf32>
    %118 = tpu.matmul %116, %117, %cst_65 {dimension_numbers = #tpu.dot_dimension_numbers<[2], [1], [1], [2], [0, 0, 0, 1, 1, 2], [0], [0]>} : vector<5x2x2xbf16>, vector<5x2x8xbf16>, vector<5x2x8xf32> -> vector<5x2x8xf32>
    "tpu.trace_stop"() : () -> ()
    %119 = vector.shape_cast %118 : vector<5x2x8xf32> to vector<10x8xf32>
    %120 = arith.truncf %119 : vector<10x8xf32> to vector<10x8xbf16>
    %c1_66 = arith.constant 1 : index
    %c0_67 = arith.constant 0 : index
    %c0_68 = arith.constant 0 : index
    %121 = vector.load %arg10[%c1_66, %c0_67, %c0_68] : memref<4x8x32xbf16, #tpu.memory_space<vmem>>, vector<1x8x32xbf16>
    %122 = vector.shape_cast %121 : vector<1x8x32xbf16> to vector<8x32xbf16>
    %cst_69 = arith.constant dense<0.000000e+00> : vector<10x32xf32>
    %123 = tpu.matmul %120, %122, %cst_69 {dimension_numbers = #tpu.dot_dimension_numbers<[1], [0], [0], [1], [0, 0, 1, 1], [], []>} : vector<10x8xbf16>, vector<8x32xbf16>, vector<10x32xf32> -> vector<10x32xf32>
    %124 = arith.addf %76, %123 : vector<10x32xf32>
    %c2 = arith.constant 2 : index
    %c0_70 = arith.constant 0 : index
    %c0_71 = arith.constant 0 : index
    %125 = vector.load %arg4[%c2, %c0_70, %c0_71] : memref<4x32x8xbf16, #tpu.memory_space<vmem>>, vector<1x32x8xbf16>
    %126 = vector.shape_cast %125 : vector<1x32x8xbf16> to vector<32x8xbf16>
    %cst_72 = arith.constant dense<0.000000e+00> : vector<10x8xf32>
    %127 = tpu.matmul %26, %126, %cst_72 {dimension_numbers = #tpu.dot_dimension_numbers<[1], [0], [0], [1], [0, 0, 1, 1], [], []>} : vector<10x32xbf16>, vector<32x8xbf16>, vector<10x8xf32> -> vector<10x8xf32>
    %c2_73 = arith.constant 2 : index
    %c0_74 = arith.constant 0 : index
    %c0_75 = arith.constant 0 : index
    %128 = vector.load %arg5[%c2_73, %c0_74, %c0_75] : memref<4x1x8xf32, #tpu.memory_space<vmem>>, vector<1x1x8xf32>
    %129 = vector.shape_cast %128 : vector<1x1x8xf32> to vector<1x8xf32>
    %130 = vector.broadcast %129 : vector<1x8xf32> to vector<10x8xf32>
    %131 = arith.addf %127, %130 : vector<10x8xf32>
    %132 = vector.shape_cast %131 : vector<10x8xf32> to vector<5x2x8xf32>
    %c2_76 = arith.constant 2 : index
    %c0_77 = arith.constant 0 : index
    %c0_78 = arith.constant 0 : index
    %133 = vector.load %arg6[%c2_76, %c0_77, %c0_78] : memref<4x32x8xbf16, #tpu.memory_space<vmem>>, vector<1x32x8xbf16>
    %134 = vector.shape_cast %133 : vector<1x32x8xbf16> to vector<32x8xbf16>
    %cst_79 = arith.constant dense<0.000000e+00> : vector<10x8xf32>
    %135 = tpu.matmul %27, %134, %cst_79 {dimension_numbers = #tpu.dot_dimension_numbers<[1], [0], [0], [1], [0, 0, 1, 1], [], []>} : vector<10x32xbf16>, vector<32x8xbf16>, vector<10x8xf32> -> vector<10x8xf32>
    %c2_80 = arith.constant 2 : index
    %c0_81 = arith.constant 0 : index
    %c0_82 = arith.constant 0 : index
    %136 = vector.load %arg7[%c2_80, %c0_81, %c0_82] : memref<4x1x8xf32, #tpu.memory_space<vmem>>, vector<1x1x8xf32>
    %137 = vector.shape_cast %136 : vector<1x1x8xf32> to vector<1x8xf32>
    %138 = vector.broadcast %137 : vector<1x8xf32> to vector<10x8xf32>
    %139 = arith.addf %135, %138 : vector<10x8xf32>
    %140 = vector.shape_cast %139 : vector<10x8xf32> to vector<5x2x8xf32>
    %c2_83 = arith.constant 2 : index
    %c0_84 = arith.constant 0 : index
    %c0_85 = arith.constant 0 : index
    %141 = vector.load %arg8[%c2_83, %c0_84, %c0_85] : memref<4x32x8xbf16, #tpu.memory_space<vmem>>, vector<1x32x8xbf16>
    %142 = vector.shape_cast %141 : vector<1x32x8xbf16> to vector<32x8xbf16>
    %cst_86 = arith.constant dense<0.000000e+00> : vector<10x8xf32>
    %143 = tpu.matmul %27, %142, %cst_86 {dimension_numbers = #tpu.dot_dimension_numbers<[1], [0], [0], [1], [0, 0, 1, 1], [], []>} : vector<10x32xbf16>, vector<32x8xbf16>, vector<10x8xf32> -> vector<10x8xf32>
    %c2_87 = arith.constant 2 : index
    %c0_88 = arith.constant 0 : index
    %c0_89 = arith.constant 0 : index
    %144 = vector.load %arg9[%c2_87, %c0_88, %c0_89] : memref<4x1x8xf32, #tpu.memory_space<vmem>>, vector<1x1x8xf32>
    %145 = vector.shape_cast %144 : vector<1x1x8xf32> to vector<1x8xf32>
    %146 = vector.broadcast %145 : vector<1x8xf32> to vector<10x8xf32>
    %147 = arith.addf %143, %146 : vector<10x8xf32>
    %148 = vector.shape_cast %147 : vector<10x8xf32> to vector<5x2x8xf32>
    %149 = arith.truncf %132 : vector<5x2x8xf32> to vector<5x2x8xbf16>
    %150 = arith.truncf %140 : vector<5x2x8xf32> to vector<5x2x8xbf16>
    "tpu.trace_start"() <{level = 10 : i32, message = "nld,nmd->nlm"}> : () -> ()
    %cst_90 = arith.constant dense<0.000000e+00> : vector<5x2x2xf32>
    %151 = tpu.matmul %149, %150, %cst_90 {dimension_numbers = #tpu.dot_dimension_numbers<[2], [2], [1], [1], [0, 0, 0, 1, 1, 1], [0], [0]>} : vector<5x2x8xbf16>, vector<5x2x8xbf16>, vector<5x2x2xf32> -> vector<5x2x2xf32>
    "tpu.trace_stop"() : () -> ()
    %cst_91 = arith.constant 0.353553385 : f32
    %152 = vector.broadcast %cst_91 : f32 to vector<5x2x2xf32>
    %153 = arith.mulf %151, %152 : vector<5x2x2xf32>
    %cst_92 = arith.constant dense<0xFF800000> : vector<5x2xf32>
    %154 = vector.multi_reduction <maximumf>, %153, %cst_92 [2] : vector<5x2x2xf32> to vector<5x2xf32>
    %155 = vector.shape_cast %154 : vector<5x2xf32> to vector<5x2x1xf32>
    %156 = vector.broadcast %155 : vector<5x2x1xf32> to vector<5x2x2xf32>
    %157 = arith.subf %153, %156 : vector<5x2x2xf32>
    %158 = math.exp %157 : vector<5x2x2xf32>
    %cst_93 = arith.constant dense<0.000000e+00> : vector<5x2xf32>
    %159 = vector.multi_reduction <add>, %158, %cst_93 [2] : vector<5x2x2xf32> to vector<5x2xf32>
    %160 = vector.shape_cast %159 : vector<5x2xf32> to vector<5x2x1xf32>
    %161 = tpu.reciprocal %160 {approx = true} : vector<5x2x1xf32> -> vector<5x2x1xf32>
    %162 = vector.broadcast %161 : vector<5x2x1xf32> to vector<5x2x2xf32>
    %163 = arith.mulf %158, %162 : vector<5x2x2xf32>
    %164 = arith.truncf %163 : vector<5x2x2xf32> to vector<5x2x2xbf16>
    %165 = arith.truncf %148 : vector<5x2x8xf32> to vector<5x2x8xbf16>
    "tpu.trace_start"() <{level = 10 : i32, message = "nlm,nmd->nld"}> : () -> ()
    %cst_94 = arith.constant dense<0.000000e+00> : vector<5x2x8xf32>
    %166 = tpu.matmul %164, %165, %cst_94 {dimension_numbers = #tpu.dot_dimension_numbers<[2], [1], [1], [2], [0, 0, 0, 1, 1, 2], [0], [0]>} : vector<5x2x2xbf16>, vector<5x2x8xbf16>, vector<5x2x8xf32> -> vector<5x2x8xf32>
    "tpu.trace_stop"() : () -> ()
    %167 = vector.shape_cast %166 : vector<5x2x8xf32> to vector<10x8xf32>
    %168 = arith.truncf %167 : vector<10x8xf32> to vector<10x8xbf16>
    %c2_95 = arith.constant 2 : index
    %c0_96 = arith.constant 0 : index
    %c0_97 = arith.constant 0 : index
    %169 = vector.load %arg10[%c2_95, %c0_96, %c0_97] : memref<4x8x32xbf16, #tpu.memory_space<vmem>>, vector<1x8x32xbf16>
    %170 = vector.shape_cast %169 : vector<1x8x32xbf16> to vector<8x32xbf16>
    %cst_98 = arith.constant dense<0.000000e+00> : vector<10x32xf32>
    %171 = tpu.matmul %168, %170, %cst_98 {dimension_numbers = #tpu.dot_dimension_numbers<[1], [0], [0], [1], [0, 0, 1, 1], [], []>} : vector<10x8xbf16>, vector<8x32xbf16>, vector<10x32xf32> -> vector<10x32xf32>
    %172 = arith.addf %124, %171 : vector<10x32xf32>
    %c3 = arith.constant 3 : index
    %c0_99 = arith.constant 0 : index
    %c0_100 = arith.constant 0 : index
    %173 = vector.load %arg4[%c3, %c0_99, %c0_100] : memref<4x32x8xbf16, #tpu.memory_space<vmem>>, vector<1x32x8xbf16>
    %174 = vector.shape_cast %173 : vector<1x32x8xbf16> to vector<32x8xbf16>
    %cst_101 = arith.constant dense<0.000000e+00> : vector<10x8xf32>
    %175 = tpu.matmul %26, %174, %cst_101 {dimension_numbers = #tpu.dot_dimension_numbers<[1], [0], [0], [1], [0, 0, 1, 1], [], []>} : vector<10x32xbf16>, vector<32x8xbf16>, vector<10x8xf32> -> vector<10x8xf32>
    %c3_102 = arith.constant 3 : index
    %c0_103 = arith.constant 0 : index
    %c0_104 = arith.constant 0 : index
    %176 = vector.load %arg5[%c3_102, %c0_103, %c0_104] : memref<4x1x8xf32, #tpu.memory_space<vmem>>, vector<1x1x8xf32>
    %177 = vector.shape_cast %176 : vector<1x1x8xf32> to vector<1x8xf32>
    %178 = vector.broadcast %177 : vector<1x8xf32> to vector<10x8xf32>
    %179 = arith.addf %175, %178 : vector<10x8xf32>
    %180 = vector.shape_cast %179 : vector<10x8xf32> to vector<5x2x8xf32>
    %c3_105 = arith.constant 3 : index
    %c0_106 = arith.constant 0 : index
    %c0_107 = arith.constant 0 : index
    %181 = vector.load %arg6[%c3_105, %c0_106, %c0_107] : memref<4x32x8xbf16, #tpu.memory_space<vmem>>, vector<1x32x8xbf16>
    %182 = vector.shape_cast %181 : vector<1x32x8xbf16> to vector<32x8xbf16>
    %cst_108 = arith.constant dense<0.000000e+00> : vector<10x8xf32>
    %183 = tpu.matmul %27, %182, %cst_108 {dimension_numbers = #tpu.dot_dimension_numbers<[1], [0], [0], [1], [0, 0, 1, 1], [], []>} : vector<10x32xbf16>, vector<32x8xbf16>, vector<10x8xf32> -> vector<10x8xf32>
    %c3_109 = arith.constant 3 : index
    %c0_110 = arith.constant 0 : index
    %c0_111 = arith.constant 0 : index
    %184 = vector.load %arg7[%c3_109, %c0_110, %c0_111] : memref<4x1x8xf32, #tpu.memory_space<vmem>>, vector<1x1x8xf32>
    %185 = vector.shape_cast %184 : vector<1x1x8xf32> to vector<1x8xf32>
    %186 = vector.broadcast %185 : vector<1x8xf32> to vector<10x8xf32>
    %187 = arith.addf %183, %186 : vector<10x8xf32>
    %188 = vector.shape_cast %187 : vector<10x8xf32> to vector<5x2x8xf32>
    %c3_112 = arith.constant 3 : index
    %c0_113 = arith.constant 0 : index
    %c0_114 = arith.constant 0 : index
    %189 = vector.load %arg8[%c3_112, %c0_113, %c0_114] : memref<4x32x8xbf16, #tpu.memory_space<vmem>>, vector<1x32x8xbf16>
    %190 = vector.shape_cast %189 : vector<1x32x8xbf16> to vector<32x8xbf16>
    %cst_115 = arith.constant dense<0.000000e+00> : vector<10x8xf32>
    %191 = tpu.matmul %27, %190, %cst_115 {dimension_numbers = #tpu.dot_dimension_numbers<[1], [0], [0], [1], [0, 0, 1, 1], [], []>} : vector<10x32xbf16>, vector<32x8xbf16>, vector<10x8xf32> -> vector<10x8xf32>
    %c3_116 = arith.constant 3 : index
    %c0_117 = arith.constant 0 : index
    %c0_118 = arith.constant 0 : index
    %192 = vector.load %arg9[%c3_116, %c0_117, %c0_118] : memref<4x1x8xf32, #tpu.memory_space<vmem>>, vector<1x1x8xf32>
    %193 = vector.shape_cast %192 : vector<1x1x8xf32> to vector<1x8xf32>
    %194 = vector.broadcast %193 : vector<1x8xf32> to vector<10x8xf32>
    %195 = arith.addf %191, %194 : vector<10x8xf32>
    %196 = vector.shape_cast %195 : vector<10x8xf32> to vector<5x2x8xf32>
    %197 = arith.truncf %180 : vector<5x2x8xf32> to vector<5x2x8xbf16>
    %198 = arith.truncf %188 : vector<5x2x8xf32> to vector<5x2x8xbf16>
    "tpu.trace_start"() <{level = 10 : i32, message = "nld,nmd->nlm"}> : () -> ()
    %cst_119 = arith.constant dense<0.000000e+00> : vector<5x2x2xf32>
    %199 = tpu.matmul %197, %198, %cst_119 {dimension_numbers = #tpu.dot_dimension_numbers<[2], [2], [1], [1], [0, 0, 0, 1, 1, 1], [0], [0]>} : vector<5x2x8xbf16>, vector<5x2x8xbf16>, vector<5x2x2xf32> -> vector<5x2x2xf32>
    "tpu.trace_stop"() : () -> ()
    %cst_120 = arith.constant 0.353553385 : f32
    %200 = vector.broadcast %cst_120 : f32 to vector<5x2x2xf32>
    %201 = arith.mulf %199, %200 : vector<5x2x2xf32>
    %cst_121 = arith.constant dense<0xFF800000> : vector<5x2xf32>
    %202 = vector.multi_reduction <maximumf>, %201, %cst_121 [2] : vector<5x2x2xf32> to vector<5x2xf32>
    %203 = vector.shape_cast %202 : vector<5x2xf32> to vector<5x2x1xf32>
    %204 = vector.broadcast %203 : vector<5x2x1xf32> to vector<5x2x2xf32>
    %205 = arith.subf %201, %204 : vector<5x2x2xf32>
    %206 = math.exp %205 : vector<5x2x2xf32>
    %cst_122 = arith.constant dense<0.000000e+00> : vector<5x2xf32>
    %207 = vector.multi_reduction <add>, %206, %cst_122 [2] : vector<5x2x2xf32> to vector<5x2xf32>
    %208 = vector.shape_cast %207 : vector<5x2xf32> to vector<5x2x1xf32>
    %209 = tpu.reciprocal %208 {approx = true} : vector<5x2x1xf32> -> vector<5x2x1xf32>
    %210 = vector.broadcast %209 : vector<5x2x1xf32> to vector<5x2x2xf32>
    %211 = arith.mulf %206, %210 : vector<5x2x2xf32>
    %212 = arith.truncf %211 : vector<5x2x2xf32> to vector<5x2x2xbf16>
    %213 = arith.truncf %196 : vector<5x2x8xf32> to vector<5x2x8xbf16>
    "tpu.trace_start"() <{level = 10 : i32, message = "nlm,nmd->nld"}> : () -> ()
    %cst_123 = arith.constant dense<0.000000e+00> : vector<5x2x8xf32>
    %214 = tpu.matmul %212, %213, %cst_123 {dimension_numbers = #tpu.dot_dimension_numbers<[2], [1], [1], [2], [0, 0, 0, 1, 1, 2], [0], [0]>} : vector<5x2x2xbf16>, vector<5x2x8xbf16>, vector<5x2x8xf32> -> vector<5x2x8xf32>
    "tpu.trace_stop"() : () -> ()
    %215 = vector.shape_cast %214 : vector<5x2x8xf32> to vector<10x8xf32>
    %216 = arith.truncf %215 : vector<10x8xf32> to vector<10x8xbf16>
    %c3_124 = arith.constant 3 : index
    %c0_125 = arith.constant 0 : index
    %c0_126 = arith.constant 0 : index
    %217 = vector.load %arg10[%c3_124, %c0_125, %c0_126] : memref<4x8x32xbf16, #tpu.memory_space<vmem>>, vector<1x8x32xbf16>
    %218 = vector.shape_cast %217 : vector<1x8x32xbf16> to vector<8x32xbf16>
    %cst_127 = arith.constant dense<0.000000e+00> : vector<10x32xf32>
    %219 = tpu.matmul %216, %218, %cst_127 {dimension_numbers = #tpu.dot_dimension_numbers<[1], [0], [0], [1], [0, 0, 1, 1], [], []>} : vector<10x8xbf16>, vector<8x32xbf16>, vector<10x32xf32> -> vector<10x32xf32>
    %220 = arith.addf %172, %219 : vector<10x32xf32>
    %221 = arith.addf %1, %220 : vector<10x32xf32>
    %c0_128 = arith.constant 0 : index
    %c0_129 = arith.constant 0 : index
    %222 = vector.load %arg11[%c0_128, %c0_129] : memref<1x32xf32, #tpu.memory_space<vmem>>, vector<1x32xf32>
    %223 = vector.broadcast %222 : vector<1x32xf32> to vector<10x32xf32>
    %224 = arith.addf %221, %223 : vector<10x32xf32>
    %225 = vector.shape_cast %224 : vector<10x32xf32> to vector<5x2x32xf32>
    %c0_130 = arith.constant 0 : index
    %c0_131 = arith.constant 0 : index
    %c0_132 = arith.constant 0 : index
    %226 = vector.load %arg12[%c0_130, %c0_131, %c0_132] : memref<5x2x32xf32, #tpu.memory_space<vmem>>, vector<5x2x32xf32>
    tpu.vector_store %arg12[%c0_130, %c0_131, %c0_132], %225 {strides = array<i32>} : memref<5x2x32xf32, #tpu.memory_space<vmem>>, vector<5x2x32xf32>,
    return
  }
  func.func @transform_0(%arg0: i32) -> (i32, i32, i32) {
    %c0_i32 = arith.constant 0 : i32
    %c0_i32_0 = arith.constant 0 : i32
    %c0_i32_1 = arith.constant 0 : i32
    %c0_i32_2 = arith.constant 0 : i32
    return %c0_i32, %c0_i32_0, %c0_i32_1 : i32, i32, i32
  }
  func.func @transform_1(%arg0: i32) -> (i32, i32) {
    %c0_i32 = arith.constant 0 : i32
    %c0_i32_0 = arith.constant 0 : i32
    %c0_i32_1 = arith.constant 0 : i32
    return %c0_i32, %c0_i32_0 : i32, i32
  }
  func.func @transform_2(%arg0: i32) -> (i32, i32) {
    %c0_i32 = arith.constant 0 : i32
    %c0_i32_0 = arith.constant 0 : i32
    %c0_i32_1 = arith.constant 0 : i32
    return %c0_i32, %c0_i32_0 : i32, i32
  }
  func.func @transform_3(%arg0: i32) -> (i32, i32, i32) {
    %c0_i32 = arith.constant 0 : i32
    %c0_i32_0 = arith.constant 0 : i32
    %c0_i32_1 = arith.constant 0 : i32
    %c0_i32_2 = arith.constant 0 : i32
    return %c0_i32, %c0_i32_0, %c0_i32_1 : i32, i32, i32
  }
  func.func @transform_4(%arg0: i32) -> (i32, i32, i32) {
    %c0_i32 = arith.constant 0 : i32
    %c0_i32_0 = arith.constant 0 : i32
    %c0_i32_1 = arith.constant 0 : i32
    %c0_i32_2 = arith.constant 0 : i32
    return %c0_i32, %c0_i32_0, %c0_i32_1 : i32, i32, i32
  }
  func.func @transform_5(%arg0: i32) -> (i32, i32, i32) {
    %c0_i32 = arith.constant 0 : i32
    %c0_i32_0 = arith.constant 0 : i32
    %c0_i32_1 = arith.constant 0 : i32
    %c0_i32_2 = arith.constant 0 : i32
    return %c0_i32, %c0_i32_0, %c0_i32_1 : i32, i32, i32
  }
  func.func @transform_6(%arg0: i32) -> (i32, i32, i32) {
    %c0_i32 = arith.constant 0 : i32
    %c0_i32_0 = arith.constant 0 : i32
    %c0_i32_1 = arith.constant 0 : i32
    %c0_i32_2 = arith.constant 0 : i32
    return %c0_i32, %c0_i32_0, %c0_i32_1 : i32, i32, i32
  }
  func.func @transform_7(%arg0: i32) -> (i32, i32, i32) {
    %c0_i32 = arith.constant 0 : i32
    %c0_i32_0 = arith.constant 0 : i32
    %c0_i32_1 = arith.constant 0 : i32
    %c0_i32_2 = arith.constant 0 : i32
    return %c0_i32, %c0_i32_0, %c0_i32_1 : i32, i32, i32
  }
  func.func @transform_8(%arg0: i32) -> (i32, i32, i32) {
    %c0_i32 = arith.constant 0 : i32
    %c0_i32_0 = arith.constant 0 : i32
    %c0_i32_1 = arith.constant 0 : i32
    %c0_i32_2 = arith.constant 0 : i32
    return %c0_i32, %c0_i32_0, %c0_i32_1 : i32, i32, i32
  }
  func.func @transform_9(%arg0: i32) -> (i32, i32, i32) {
    %c0_i32 = arith.constant 0 : i32
    %c0_i32_0 = arith.constant 0 : i32
    %c0_i32_1 = arith.constant 0 : i32
    %c0_i32_2 = arith.constant 0 : i32
    return %c0_i32, %c0_i32_0, %c0_i32_1 : i32, i32, i32
  }
  func.func @transform_10(%arg0: i32) -> (i32, i32) {
    %c0_i32 = arith.constant 0 : i32
    %c0_i32_0 = arith.constant 0 : i32
    %c0_i32_1 = arith.constant 0 : i32
    return %c0_i32, %c0_i32_0 : i32, i32
  }
  func.func @transform_11(%arg0: i32) -> (i32, i32, i32) {
    %c0_i32 = arith.constant 0 : i32
    %c0_i32_0 = arith.constant 0 : i32
    %c0_i32_1 = arith.constant 0 : i32
    %c0_i32_2 = arith.constant 0 : i32
    return %c0_i32, %c0_i32_0, %c0_i32_1 : i32, i32, i32
  }
}

module attributes {stable_mosaic.version = 11 : i64} {
  func.func @_moe_block_kernel(%arg0: i32, %arg1: memref<5x2x32xf32, #tpu.memory_space<vmem>>, %arg2: memref<1x32xf32, #tpu.memory_space<vmem>>, %arg3: memref<1x32xf32, #tpu.memory_space<vmem>>, %arg4: memref<32x4xbf16, #tpu.memory_space<vmem>>, %arg5: memref<1x4xf32, #tpu.memory_space<vmem>>, %arg6: memref<4x32x128xbf16, #tpu.memory_space<vmem>>, %arg7: memref<4x1x128xf32, #tpu.memory_space<vmem>>, %arg8: memref<4x128x32xbf16, #tpu.memory_space<vmem>>, %arg9: memref<4x1x32xf32, #tpu.memory_space<vmem>>, %arg10: memref<5x2x32xf32, #tpu.memory_space<vmem>>) attributes {dimension_semantics = [#tpu.dimension_semantics<arbitrary>], iteration_bounds = array<i64: 1>, scalar_prefetch = 0 : i64, scratch_operands = 0 : i64, tpu.core_type = #tpu.core_type<tc>, window_params = [{pipeline_mode = #tpu.pipeline_mode<synchronous>, transform_indices = @transform_0, window_bounds = array<i64: 5, 2, 32>}, {pipeline_mode = #tpu.pipeline_mode<synchronous>, transform_indices = @transform_1, window_bounds = array<i64: 1, 32>}, {pipeline_mode = #tpu.pipeline_mode<synchronous>, transform_indices = @transform_2, window_bounds = array<i64: 1, 32>}, {pipeline_mode = #tpu.pipeline_mode<synchronous>, transform_indices = @transform_3, window_bounds = array<i64: 32, 4>}, {pipeline_mode = #tpu.pipeline_mode<synchronous>, transform_indices = @transform_4, window_bounds = array<i64: 1, 4>}, {pipeline_mode = #tpu.pipeline_mode<synchronous>, transform_indices = @transform_5, window_bounds = array<i64: 4, 32, 128>}, {pipeline_mode = #tpu.pipeline_mode<synchronous>, transform_indices = @transform_6, window_bounds = array<i64: 4, 1, 128>}, {pipeline_mode = #tpu.pipeline_mode<synchronous>, transform_indices = @transform_7, window_bounds = array<i64: 4, 128, 32>}, {pipeline_mode = #tpu.pipeline_mode<synchronous>, transform_indices = @transform_8, window_bounds = array<i64: 4, 1, 32>}, {pipeline_mode = #tpu.pipeline_mode<synchronous>, transform_indices = @transform_9, window_bounds = array<i64: 5, 2, 32>}]} {
    %c0 = arith.constant 0 : index
    %c0_0 = arith.constant 0 : index
    %c0_1 = arith.constant 0 : index
    %0 = vector.load %arg1[%c0, %c0_0, %c0_1] : memref<5x2x32xf32, #tpu.memory_space<vmem>>, vector<5x2x32xf32>
    %1 = vector.shape_cast %0 : vector<5x2x32xf32> to vector<10x32xf32>
    %cst = arith.constant dense<0.000000e+00> : vector<10xf32>
    %2 = vector.multi_reduction <add>, %1, %cst [1] : vector<10x32xf32> to vector<10xf32>
    %3 = vector.shape_cast %2 : vector<10xf32> to vector<10x1xf32>
    %cst_2 = arith.constant 3.200000e+01 : f32
    %4 = vector.broadcast %cst_2 : f32 to vector<10x1xf32>
    %5 = arith.divf %3, %4 : vector<10x1xf32>
    %6 = vector.broadcast %5 : vector<10x1xf32> to vector<10x32xf32>
    %7 = arith.subf %1, %6 : vector<10x32xf32>
    %8 = arith.mulf %7, %7 : vector<10x32xf32>
    %cst_3 = arith.constant dense<0.000000e+00> : vector<10xf32>
    %9 = vector.multi_reduction <add>, %8, %cst_3 [1] : vector<10x32xf32> to vector<10xf32>
    %10 = vector.shape_cast %9 : vector<10xf32> to vector<10x1xf32>
    %cst_4 = arith.constant 3.200000e+01 : f32
    %11 = vector.broadcast %cst_4 : f32 to vector<10x1xf32>
    %12 = arith.divf %10, %11 : vector<10x1xf32>
    %13 = vector.broadcast %5 : vector<10x1xf32> to vector<10x32xf32>
    %14 = arith.subf %1, %13 : vector<10x32xf32>
    %cst_5 = arith.constant 9.99999974E-6 : f32
    %15 = vector.broadcast %cst_5 : f32 to vector<10x1xf32>
    %16 = arith.addf %12, %15 : vector<10x1xf32>
    %17 = math.rsqrt %16 : vector<10x1xf32>
    %18 = vector.broadcast %17 : vector<10x1xf32> to vector<10x32xf32>
    %19 = arith.mulf %14, %18 : vector<10x32xf32>
    %c0_6 = arith.constant 0 : index
    %c0_7 = arith.constant 0 : index
    %20 = vector.load %arg2[%c0_6, %c0_7] : memref<1x32xf32, #tpu.memory_space<vmem>>, vector<1x32xf32>
    %21 = vector.broadcast %20 : vector<1x32xf32> to vector<10x32xf32>
    %22 = arith.mulf %19, %21 : vector<10x32xf32>
    %c0_8 = arith.constant 0 : index
    %c0_9 = arith.constant 0 : index
    %23 = vector.load %arg3[%c0_8, %c0_9] : memref<1x32xf32, #tpu.memory_space<vmem>>, vector<1x32xf32>
    %24 = vector.broadcast %23 : vector<1x32xf32> to vector<10x32xf32>
    %25 = arith.addf %22, %24 : vector<10x32xf32>
    %26 = arith.truncf %25 : vector<10x32xf32> to vector<10x32xbf16>
    %c0_10 = arith.constant 0 : index
    %c0_11 = arith.constant 0 : index
    %27 = vector.load %arg4[%c0_10, %c0_11] : memref<32x4xbf16, #tpu.memory_space<vmem>>, vector<32x4xbf16>
    %cst_12 = arith.constant dense<0.000000e+00> : vector<10x4xf32>
    %28 = tpu.matmul %26, %27, %cst_12 {dimension_numbers = #tpu.dot_dimension_numbers<[1], [0], [0], [1], [0, 0, 1, 1], [], []>} : vector<10x32xbf16>, vector<32x4xbf16>, vector<10x4xf32> -> vector<10x4xf32>
    %c0_13 = arith.constant 0 : index
    %c0_14 = arith.constant 0 : index
    %29 = vector.load %arg5[%c0_13, %c0_14] : memref<1x4xf32, #tpu.memory_space<vmem>>, vector<1x4xf32>
    %30 = vector.broadcast %29 : vector<1x4xf32> to vector<10x4xf32>
    %31 = arith.addf %28, %30 : vector<10x4xf32>
    %cst_15 = arith.constant dense<0xFF800000> : vector<10xf32>
    %32 = vector.multi_reduction <maximumf>, %31, %cst_15 [1] : vector<10x4xf32> to vector<10xf32>
    %33 = vector.shape_cast %32 : vector<10xf32> to vector<10x1xf32>
    %34 = vector.broadcast %33 : vector<10x1xf32> to vector<10x4xf32>
    %35 = arith.subf %31, %34 : vector<10x4xf32>
    %36 = math.exp %35 : vector<10x4xf32>
    %cst_16 = arith.constant dense<0.000000e+00> : vector<10xf32>
    %37 = vector.multi_reduction <add>, %36, %cst_16 [1] : vector<10x4xf32> to vector<10xf32>
    %38 = vector.shape_cast %37 : vector<10xf32> to vector<10x1xf32>
    %39 = vector.broadcast %38 : vector<10x1xf32> to vector<10x4xf32>
    %40 = arith.divf %36, %39 : vector<10x4xf32>
    %cst_17 = arith.constant dense<0xFF800000> : vector<10xf32>
    %41 = vector.multi_reduction <maximumf>, %40, %cst_17 [1] : vector<10x4xf32> to vector<10xf32>
    %42 = vector.shape_cast %41 : vector<10xf32> to vector<10x1xf32>
    %43 = tpu.iota {dimensions = array<i32: 1>} : vector<10x4xi32>
    %44 = arith.sitofp %43 : vector<10x4xi32> to vector<10x4xf32>
    %45 = vector.broadcast %42 : vector<10x1xf32> to vector<10x4xf32>
    %46 = arith.cmpf oge, %40, %45 : vector<10x4xf32>
    %cst_18 = arith.constant 4.000000e+00 : f32
    %47 = vector.broadcast %cst_18 : f32 to vector<10x4xf32>
    %48 = arith.select %46, %44, %47 : vector<10x4xi1>, vector<10x4xf32>
    %cst_19 = arith.constant dense<0x7F800000> : vector<10xf32>
    %49 = vector.multi_reduction <minimumf>, %48, %cst_19 [1] : vector<10x4xf32> to vector<10xf32>
    %50 = vector.shape_cast %49 : vector<10xf32> to vector<10x1xf32>
    %cst_20 = arith.constant 0.000000e+00 : f32
    %51 = vector.broadcast %cst_20 : f32 to vector<10x32xf32>
    %cst_21 = arith.constant 0.000000e+00 : f32
    %52 = vector.broadcast %cst_21 : f32 to vector<10x1xf32>
    %53 = arith.cmpf oeq, %50, %52 : vector<10x1xf32>
    %cst_22 = arith.constant 0.000000e+00 : f32
    %54 = vector.broadcast %cst_22 : f32 to vector<10x1xf32>
    %55 = arith.select %53, %42, %54 : vector<10x1xi1>, vector<10x1xf32>
    %c0_23 = arith.constant 0 : index
    %c0_24 = arith.constant 0 : index
    %c0_25 = arith.constant 0 : index
    %56 = vector.load %arg6[%c0_23, %c0_24, %c0_25] : memref<4x32x128xbf16, #tpu.memory_space<vmem>>, vector<1x32x128xbf16>
    %57 = vector.shape_cast %56 : vector<1x32x128xbf16> to vector<32x128xbf16>
    %cst_26 = arith.constant dense<0.000000e+00> : vector<10x128xf32>
    %58 = tpu.matmul %26, %57, %cst_26 {dimension_numbers = #tpu.dot_dimension_numbers<[1], [0], [0], [1], [0, 0, 1, 1], [], []>} : vector<10x32xbf16>, vector<32x128xbf16>, vector<10x128xf32> -> vector<10x128xf32>
    %c0_27 = arith.constant 0 : index
    %c0_28 = arith.constant 0 : index
    %c0_29 = arith.constant 0 : index
    %59 = vector.load %arg7[%c0_27, %c0_28, %c0_29] : memref<4x1x128xf32, #tpu.memory_space<vmem>>, vector<1x1x128xf32>
    %60 = vector.shape_cast %59 : vector<1x1x128xf32> to vector<1x128xf32>
    %61 = vector.broadcast %60 : vector<1x128xf32> to vector<10x128xf32>
    %62 = arith.addf %58, %61 : vector<10x128xf32>
    %cst_30 = arith.constant 5.000000e-01 : f32
    %63 = vector.broadcast %cst_30 : f32 to vector<10x128xf32>
    %64 = arith.mulf %63, %62 : vector<10x128xf32>
    %cst_31 = arith.constant 4.471500e-02 : f32
    %65 = vector.broadcast %cst_31 : f32 to vector<10x128xf32>
    %66 = arith.mulf %65, %62 : vector<10x128xf32>
    %67 = arith.mulf %66, %62 : vector<10x128xf32>
    %68 = arith.mulf %67, %62 : vector<10x128xf32>
    %69 = arith.addf %62, %68 : vector<10x128xf32>
    %cst_32 = arith.constant 0.797884583 : f32
    %70 = vector.broadcast %cst_32 : f32 to vector<10x128xf32>
    %71 = arith.mulf %70, %69 : vector<10x128xf32>
    %72 = math.tanh %71 : vector<10x128xf32>
    %cst_33 = arith.constant 1.000000e+00 : f32
    %73 = vector.broadcast %cst_33 : f32 to vector<10x128xf32>
    %74 = arith.addf %73, %72 : vector<10x128xf32>
    %75 = arith.mulf %64, %74 : vector<10x128xf32>
    %76 = arith.truncf %75 : vector<10x128xf32> to vector<10x128xbf16>
    %c0_34 = arith.constant 0 : index
    %c0_35 = arith.constant 0 : index
    %c0_36 = arith.constant 0 : index
    %77 = vector.load %arg8[%c0_34, %c0_35, %c0_36] : memref<4x128x32xbf16, #tpu.memory_space<vmem>>, vector<1x128x32xbf16>
    %78 = vector.shape_cast %77 : vector<1x128x32xbf16> to vector<128x32xbf16>
    %cst_37 = arith.constant dense<0.000000e+00> : vector<10x32xf32>
    %79 = tpu.matmul %76, %78, %cst_37 {dimension_numbers = #tpu.dot_dimension_numbers<[1], [0], [0], [1], [0, 0, 1, 1], [], []>} : vector<10x128xbf16>, vector<128x32xbf16>, vector<10x32xf32> -> vector<10x32xf32>
    %c0_38 = arith.constant 0 : index
    %c0_39 = arith.constant 0 : index
    %c0_40 = arith.constant 0 : index
    %80 = vector.load %arg9[%c0_38, %c0_39, %c0_40] : memref<4x1x32xf32, #tpu.memory_space<vmem>>, vector<1x1x32xf32>
    %81 = vector.shape_cast %80 : vector<1x1x32xf32> to vector<1x32xf32>
    %82 = vector.broadcast %81 : vector<1x32xf32> to vector<10x32xf32>
    %83 = arith.addf %79, %82 : vector<10x32xf32>
    %84 = vector.broadcast %55 : vector<10x1xf32> to vector<10x32xf32>
    %85 = arith.mulf %84, %83 : vector<10x32xf32>
    %86 = arith.addf %51, %85 : vector<10x32xf32>
    %cst_41 = arith.constant 1.000000e+00 : f32
    %87 = vector.broadcast %cst_41 : f32 to vector<10x1xf32>
    %88 = arith.cmpf oeq, %50, %87 : vector<10x1xf32>
    %cst_42 = arith.constant 0.000000e+00 : f32
    %89 = vector.broadcast %cst_42 : f32 to vector<10x1xf32>
    %90 = arith.select %88, %42, %89 : vector<10x1xi1>, vector<10x1xf32>
    %c1 = arith.constant 1 : index
    %c0_43 = arith.constant 0 : index
    %c0_44 = arith.constant 0 : index
    %91 = vector.load %arg6[%c1, %c0_43, %c0_44] : memref<4x32x128xbf16, #tpu.memory_space<vmem>>, vector<1x32x128xbf16>
    %92 = vector.shape_cast %91 : vector<1x32x128xbf16> to vector<32x128xbf16>
    %cst_45 = arith.constant dense<0.000000e+00> : vector<10x128xf32>
    %93 = tpu.matmul %26, %92, %cst_45 {dimension_numbers = #tpu.dot_dimension_numbers<[1], [0], [0], [1], [0, 0, 1, 1], [], []>} : vector<10x32xbf16>, vector<32x128xbf16>, vector<10x128xf32> -> vector<10x128xf32>
    %c1_46 = arith.constant 1 : index
    %c0_47 = arith.constant 0 : index
    %c0_48 = arith.constant 0 : index
    %94 = vector.load %arg7[%c1_46, %c0_47, %c0_48] : memref<4x1x128xf32, #tpu.memory_space<vmem>>, vector<1x1x128xf32>
    %95 = vector.shape_cast %94 : vector<1x1x128xf32> to vector<1x128xf32>
    %96 = vector.broadcast %95 : vector<1x128xf32> to vector<10x128xf32>
    %97 = arith.addf %93, %96 : vector<10x128xf32>
    %cst_49 = arith.constant 5.000000e-01 : f32
    %98 = vector.broadcast %cst_49 : f32 to vector<10x128xf32>
    %99 = arith.mulf %98, %97 : vector<10x128xf32>
    %cst_50 = arith.constant 4.471500e-02 : f32
    %100 = vector.broadcast %cst_50 : f32 to vector<10x128xf32>
    %101 = arith.mulf %100, %97 : vector<10x128xf32>
    %102 = arith.mulf %101, %97 : vector<10x128xf32>
    %103 = arith.mulf %102, %97 : vector<10x128xf32>
    %104 = arith.addf %97, %103 : vector<10x128xf32>
    %cst_51 = arith.constant 0.797884583 : f32
    %105 = vector.broadcast %cst_51 : f32 to vector<10x128xf32>
    %106 = arith.mulf %105, %104 : vector<10x128xf32>
    %107 = math.tanh %106 : vector<10x128xf32>
    %cst_52 = arith.constant 1.000000e+00 : f32
    %108 = vector.broadcast %cst_52 : f32 to vector<10x128xf32>
    %109 = arith.addf %108, %107 : vector<10x128xf32>
    %110 = arith.mulf %99, %109 : vector<10x128xf32>
    %111 = arith.truncf %110 : vector<10x128xf32> to vector<10x128xbf16>
    %c1_53 = arith.constant 1 : index
    %c0_54 = arith.constant 0 : index
    %c0_55 = arith.constant 0 : index
    %112 = vector.load %arg8[%c1_53, %c0_54, %c0_55] : memref<4x128x32xbf16, #tpu.memory_space<vmem>>, vector<1x128x32xbf16>
    %113 = vector.shape_cast %112 : vector<1x128x32xbf16> to vector<128x32xbf16>
    %cst_56 = arith.constant dense<0.000000e+00> : vector<10x32xf32>
    %114 = tpu.matmul %111, %113, %cst_56 {dimension_numbers = #tpu.dot_dimension_numbers<[1], [0], [0], [1], [0, 0, 1, 1], [], []>} : vector<10x128xbf16>, vector<128x32xbf16>, vector<10x32xf32> -> vector<10x32xf32>
    %c1_57 = arith.constant 1 : index
    %c0_58 = arith.constant 0 : index
    %c0_59 = arith.constant 0 : index
    %115 = vector.load %arg9[%c1_57, %c0_58, %c0_59] : memref<4x1x32xf32, #tpu.memory_space<vmem>>, vector<1x1x32xf32>
    %116 = vector.shape_cast %115 : vector<1x1x32xf32> to vector<1x32xf32>
    %117 = vector.broadcast %116 : vector<1x32xf32> to vector<10x32xf32>
    %118 = arith.addf %114, %117 : vector<10x32xf32>
    %119 = vector.broadcast %90 : vector<10x1xf32> to vector<10x32xf32>
    %120 = arith.mulf %119, %118 : vector<10x32xf32>
    %121 = arith.addf %86, %120 : vector<10x32xf32>
    %cst_60 = arith.constant 2.000000e+00 : f32
    %122 = vector.broadcast %cst_60 : f32 to vector<10x1xf32>
    %123 = arith.cmpf oeq, %50, %122 : vector<10x1xf32>
    %cst_61 = arith.constant 0.000000e+00 : f32
    %124 = vector.broadcast %cst_61 : f32 to vector<10x1xf32>
    %125 = arith.select %123, %42, %124 : vector<10x1xi1>, vector<10x1xf32>
    %c2 = arith.constant 2 : index
    %c0_62 = arith.constant 0 : index
    %c0_63 = arith.constant 0 : index
    %126 = vector.load %arg6[%c2, %c0_62, %c0_63] : memref<4x32x128xbf16, #tpu.memory_space<vmem>>, vector<1x32x128xbf16>
    %127 = vector.shape_cast %126 : vector<1x32x128xbf16> to vector<32x128xbf16>
    %cst_64 = arith.constant dense<0.000000e+00> : vector<10x128xf32>
    %128 = tpu.matmul %26, %127, %cst_64 {dimension_numbers = #tpu.dot_dimension_numbers<[1], [0], [0], [1], [0, 0, 1, 1], [], []>} : vector<10x32xbf16>, vector<32x128xbf16>, vector<10x128xf32> -> vector<10x128xf32>
    %c2_65 = arith.constant 2 : index
    %c0_66 = arith.constant 0 : index
    %c0_67 = arith.constant 0 : index
    %129 = vector.load %arg7[%c2_65, %c0_66, %c0_67] : memref<4x1x128xf32, #tpu.memory_space<vmem>>, vector<1x1x128xf32>
    %130 = vector.shape_cast %129 : vector<1x1x128xf32> to vector<1x128xf32>
    %131 = vector.broadcast %130 : vector<1x128xf32> to vector<10x128xf32>
    %132 = arith.addf %128, %131 : vector<10x128xf32>
    %cst_68 = arith.constant 5.000000e-01 : f32
    %133 = vector.broadcast %cst_68 : f32 to vector<10x128xf32>
    %134 = arith.mulf %133, %132 : vector<10x128xf32>
    %cst_69 = arith.constant 4.471500e-02 : f32
    %135 = vector.broadcast %cst_69 : f32 to vector<10x128xf32>
    %136 = arith.mulf %135, %132 : vector<10x128xf32>
    %137 = arith.mulf %136, %132 : vector<10x128xf32>
    %138 = arith.mulf %137, %132 : vector<10x128xf32>
    %139 = arith.addf %132, %138 : vector<10x128xf32>
    %cst_70 = arith.constant 0.797884583 : f32
    %140 = vector.broadcast %cst_70 : f32 to vector<10x128xf32>
    %141 = arith.mulf %140, %139 : vector<10x128xf32>
    %142 = math.tanh %141 : vector<10x128xf32>
    %cst_71 = arith.constant 1.000000e+00 : f32
    %143 = vector.broadcast %cst_71 : f32 to vector<10x128xf32>
    %144 = arith.addf %143, %142 : vector<10x128xf32>
    %145 = arith.mulf %134, %144 : vector<10x128xf32>
    %146 = arith.truncf %145 : vector<10x128xf32> to vector<10x128xbf16>
    %c2_72 = arith.constant 2 : index
    %c0_73 = arith.constant 0 : index
    %c0_74 = arith.constant 0 : index
    %147 = vector.load %arg8[%c2_72, %c0_73, %c0_74] : memref<4x128x32xbf16, #tpu.memory_space<vmem>>, vector<1x128x32xbf16>
    %148 = vector.shape_cast %147 : vector<1x128x32xbf16> to vector<128x32xbf16>
    %cst_75 = arith.constant dense<0.000000e+00> : vector<10x32xf32>
    %149 = tpu.matmul %146, %148, %cst_75 {dimension_numbers = #tpu.dot_dimension_numbers<[1], [0], [0], [1], [0, 0, 1, 1], [], []>} : vector<10x128xbf16>, vector<128x32xbf16>, vector<10x32xf32> -> vector<10x32xf32>
    %c2_76 = arith.constant 2 : index
    %c0_77 = arith.constant 0 : index
    %c0_78 = arith.constant 0 : index
    %150 = vector.load %arg9[%c2_76, %c0_77, %c0_78] : memref<4x1x32xf32, #tpu.memory_space<vmem>>, vector<1x1x32xf32>
    %151 = vector.shape_cast %150 : vector<1x1x32xf32> to vector<1x32xf32>
    %152 = vector.broadcast %151 : vector<1x32xf32> to vector<10x32xf32>
    %153 = arith.addf %149, %152 : vector<10x32xf32>
    %154 = vector.broadcast %125 : vector<10x1xf32> to vector<10x32xf32>
    %155 = arith.mulf %154, %153 : vector<10x32xf32>
    %156 = arith.addf %121, %155 : vector<10x32xf32>
    %cst_79 = arith.constant 3.000000e+00 : f32
    %157 = vector.broadcast %cst_79 : f32 to vector<10x1xf32>
    %158 = arith.cmpf oeq, %50, %157 : vector<10x1xf32>
    %cst_80 = arith.constant 0.000000e+00 : f32
    %159 = vector.broadcast %cst_80 : f32 to vector<10x1xf32>
    %160 = arith.select %158, %42, %159 : vector<10x1xi1>, vector<10x1xf32>
    %c3 = arith.constant 3 : index
    %c0_81 = arith.constant 0 : index
    %c0_82 = arith.constant 0 : index
    %161 = vector.load %arg6[%c3, %c0_81, %c0_82] : memref<4x32x128xbf16, #tpu.memory_space<vmem>>, vector<1x32x128xbf16>
    %162 = vector.shape_cast %161 : vector<1x32x128xbf16> to vector<32x128xbf16>
    %cst_83 = arith.constant dense<0.000000e+00> : vector<10x128xf32>
    %163 = tpu.matmul %26, %162, %cst_83 {dimension_numbers = #tpu.dot_dimension_numbers<[1], [0], [0], [1], [0, 0, 1, 1], [], []>} : vector<10x32xbf16>, vector<32x128xbf16>, vector<10x128xf32> -> vector<10x128xf32>
    %c3_84 = arith.constant 3 : index
    %c0_85 = arith.constant 0 : index
    %c0_86 = arith.constant 0 : index
    %164 = vector.load %arg7[%c3_84, %c0_85, %c0_86] : memref<4x1x128xf32, #tpu.memory_space<vmem>>, vector<1x1x128xf32>
    %165 = vector.shape_cast %164 : vector<1x1x128xf32> to vector<1x128xf32>
    %166 = vector.broadcast %165 : vector<1x128xf32> to vector<10x128xf32>
    %167 = arith.addf %163, %166 : vector<10x128xf32>
    %cst_87 = arith.constant 5.000000e-01 : f32
    %168 = vector.broadcast %cst_87 : f32 to vector<10x128xf32>
    %169 = arith.mulf %168, %167 : vector<10x128xf32>
    %cst_88 = arith.constant 4.471500e-02 : f32
    %170 = vector.broadcast %cst_88 : f32 to vector<10x128xf32>
    %171 = arith.mulf %170, %167 : vector<10x128xf32>
    %172 = arith.mulf %171, %167 : vector<10x128xf32>
    %173 = arith.mulf %172, %167 : vector<10x128xf32>
    %174 = arith.addf %167, %173 : vector<10x128xf32>
    %cst_89 = arith.constant 0.797884583 : f32
    %175 = vector.broadcast %cst_89 : f32 to vector<10x128xf32>
    %176 = arith.mulf %175, %174 : vector<10x128xf32>
    %177 = math.tanh %176 : vector<10x128xf32>
    %cst_90 = arith.constant 1.000000e+00 : f32
    %178 = vector.broadcast %cst_90 : f32 to vector<10x128xf32>
    %179 = arith.addf %178, %177 : vector<10x128xf32>
    %180 = arith.mulf %169, %179 : vector<10x128xf32>
    %181 = arith.truncf %180 : vector<10x128xf32> to vector<10x128xbf16>
    %c3_91 = arith.constant 3 : index
    %c0_92 = arith.constant 0 : index
    %c0_93 = arith.constant 0 : index
    %182 = vector.load %arg8[%c3_91, %c0_92, %c0_93] : memref<4x128x32xbf16, #tpu.memory_space<vmem>>, vector<1x128x32xbf16>
    %183 = vector.shape_cast %182 : vector<1x128x32xbf16> to vector<128x32xbf16>
    %cst_94 = arith.constant dense<0.000000e+00> : vector<10x32xf32>
    %184 = tpu.matmul %181, %183, %cst_94 {dimension_numbers = #tpu.dot_dimension_numbers<[1], [0], [0], [1], [0, 0, 1, 1], [], []>} : vector<10x128xbf16>, vector<128x32xbf16>, vector<10x32xf32> -> vector<10x32xf32>
    %c3_95 = arith.constant 3 : index
    %c0_96 = arith.constant 0 : index
    %c0_97 = arith.constant 0 : index
    %185 = vector.load %arg9[%c3_95, %c0_96, %c0_97] : memref<4x1x32xf32, #tpu.memory_space<vmem>>, vector<1x1x32xf32>
    %186 = vector.shape_cast %185 : vector<1x1x32xf32> to vector<1x32xf32>
    %187 = vector.broadcast %186 : vector<1x32xf32> to vector<10x32xf32>
    %188 = arith.addf %184, %187 : vector<10x32xf32>
    %189 = vector.broadcast %160 : vector<10x1xf32> to vector<10x32xf32>
    %190 = arith.mulf %189, %188 : vector<10x32xf32>
    %191 = arith.addf %156, %190 : vector<10x32xf32>
    %192 = arith.addf %1, %191 : vector<10x32xf32>
    %193 = vector.shape_cast %192 : vector<10x32xf32> to vector<5x2x32xf32>
    %c0_98 = arith.constant 0 : index
    %c0_99 = arith.constant 0 : index
    %c0_100 = arith.constant 0 : index
    %194 = vector.load %arg10[%c0_98, %c0_99, %c0_100] : memref<5x2x32xf32, #tpu.memory_space<vmem>>, vector<5x2x32xf32>
    tpu.vector_store %arg10[%c0_98, %c0_99, %c0_100], %193 {strides = array<i32>} : memref<5x2x32xf32, #tpu.memory_space<vmem>>, vector<5x2x32xf32>,
    return
  }
  func.func @transform_0(%arg0: i32) -> (i32, i32, i32) {
    %c0_i32 = arith.constant 0 : i32
    %c0_i32_0 = arith.constant 0 : i32
    %c0_i32_1 = arith.constant 0 : i32
    %c0_i32_2 = arith.constant 0 : i32
    return %c0_i32, %c0_i32_0, %c0_i32_1 : i32, i32, i32
  }
  func.func @transform_1(%arg0: i32) -> (i32, i32) {
    %c0_i32 = arith.constant 0 : i32
    %c0_i32_0 = arith.constant 0 : i32
    %c0_i32_1 = arith.constant 0 : i32
    return %c0_i32, %c0_i32_0 : i32, i32
  }
  func.func @transform_2(%arg0: i32) -> (i32, i32) {
    %c0_i32 = arith.constant 0 : i32
    %c0_i32_0 = arith.constant 0 : i32
    %c0_i32_1 = arith.constant 0 : i32
    return %c0_i32, %c0_i32_0 : i32, i32
  }
  func.func @transform_3(%arg0: i32) -> (i32, i32) {
    %c0_i32 = arith.constant 0 : i32
    %c0_i32_0 = arith.constant 0 : i32
    %c0_i32_1 = arith.constant 0 : i32
    return %c0_i32, %c0_i32_0 : i32, i32
  }
  func.func @transform_4(%arg0: i32) -> (i32, i32) {
    %c0_i32 = arith.constant 0 : i32
    %c0_i32_0 = arith.constant 0 : i32
    %c0_i32_1 = arith.constant 0 : i32
    return %c0_i32, %c0_i32_0 : i32, i32
  }
  func.func @transform_5(%arg0: i32) -> (i32, i32, i32) {
    %c0_i32 = arith.constant 0 : i32
    %c0_i32_0 = arith.constant 0 : i32
    %c0_i32_1 = arith.constant 0 : i32
    %c0_i32_2 = arith.constant 0 : i32
    return %c0_i32, %c0_i32_0, %c0_i32_1 : i32, i32, i32
  }
  func.func @transform_6(%arg0: i32) -> (i32, i32, i32) {
    %c0_i32 = arith.constant 0 : i32
    %c0_i32_0 = arith.constant 0 : i32
    %c0_i32_1 = arith.constant 0 : i32
    %c0_i32_2 = arith.constant 0 : i32
    return %c0_i32, %c0_i32_0, %c0_i32_1 : i32, i32, i32
  }
  func.func @transform_7(%arg0: i32) -> (i32, i32, i32) {
    %c0_i32 = arith.constant 0 : i32
    %c0_i32_0 = arith.constant 0 : i32
    %c0_i32_1 = arith.constant 0 : i32
    %c0_i32_2 = arith.constant 0 : i32
    return %c0_i32, %c0_i32_0, %c0_i32_1 : i32, i32, i32
  }
  func.func @transform_8(%arg0: i32) -> (i32, i32, i32) {
    %c0_i32 = arith.constant 0 : i32
    %c0_i32_0 = arith.constant 0 : i32
    %c0_i32_1 = arith.constant 0 : i32
    %c0_i32_2 = arith.constant 0 : i32
    return %c0_i32, %c0_i32_0, %c0_i32_1 : i32, i32, i32
  }
  func.func @transform_9(%arg0: i32) -> (i32, i32, i32) {
    %c0_i32 = arith.constant 0 : i32
    %c0_i32_0 = arith.constant 0 : i32
    %c0_i32_1 = arith.constant 0 : i32
    %c0_i32_2 = arith.constant 0 : i32
    return %c0_i32, %c0_i32_0, %c0_i32_1 : i32, i32, i32
  }
}

module attributes {stable_mosaic.version = 11 : i64} {
  func.func @_linear_kernel(%arg0: i32, %arg1: memref<2x32xf32, #tpu.memory_space<vmem>>, %arg2: memref<32x10xbf16, #tpu.memory_space<vmem>>, %arg3: memref<1x10xf32, #tpu.memory_space<vmem>>, %arg4: memref<2x10xf32, #tpu.memory_space<vmem>>) attributes {dimension_semantics = [#tpu.dimension_semantics<arbitrary>], iteration_bounds = array<i64: 1>, scalar_prefetch = 0 : i64, scratch_operands = 0 : i64, tpu.core_type = #tpu.core_type<tc>, window_params = [{pipeline_mode = #tpu.pipeline_mode<synchronous>, transform_indices = @transform_0, window_bounds = array<i64: 2, 32>}, {pipeline_mode = #tpu.pipeline_mode<synchronous>, transform_indices = @transform_1, window_bounds = array<i64: 32, 10>}, {pipeline_mode = #tpu.pipeline_mode<synchronous>, transform_indices = @transform_2, window_bounds = array<i64: 1, 10>}, {pipeline_mode = #tpu.pipeline_mode<synchronous>, transform_indices = @transform_3, window_bounds = array<i64: 2, 10>}]} {
    %c0 = arith.constant 0 : index
    %c0_0 = arith.constant 0 : index
    %0 = vector.load %arg1[%c0, %c0_0] : memref<2x32xf32, #tpu.memory_space<vmem>>, vector<2x32xf32>
    %1 = arith.truncf %0 : vector<2x32xf32> to vector<2x32xbf16>
    %c0_1 = arith.constant 0 : index
    %c0_2 = arith.constant 0 : index
    %2 = vector.load %arg2[%c0_1, %c0_2] : memref<32x10xbf16, #tpu.memory_space<vmem>>, vector<32x10xbf16>
    %cst = arith.constant dense<0.000000e+00> : vector<2x10xf32>
    %3 = tpu.matmul %1, %2, %cst {dimension_numbers = #tpu.dot_dimension_numbers<[1], [0], [0], [1], [0, 0, 1, 1], [], []>} : vector<2x32xbf16>, vector<32x10xbf16>, vector<2x10xf32> -> vector<2x10xf32>
    %c0_3 = arith.constant 0 : index
    %c0_4 = arith.constant 0 : index
    %4 = vector.load %arg3[%c0_3, %c0_4] : memref<1x10xf32, #tpu.memory_space<vmem>>, vector<1x10xf32>
    %5 = vector.broadcast %4 : vector<1x10xf32> to vector<2x10xf32>
    %6 = arith.addf %3, %5 : vector<2x10xf32>
    %c0_5 = arith.constant 0 : index
    %c0_6 = arith.constant 0 : index
    %7 = vector.load %arg4[%c0_5, %c0_6] : memref<2x10xf32, #tpu.memory_space<vmem>>, vector<2x10xf32>
    tpu.vector_store %arg4[%c0_5, %c0_6], %6 {strides = array<i32>} : memref<2x10xf32, #tpu.memory_space<vmem>>, vector<2x10xf32>,
    return
  }
  func.func @transform_0(%arg0: i32) -> (i32, i32) {
    %c0_i32 = arith.constant 0 : i32
    %c0_i32_0 = arith.constant 0 : i32
    %c0_i32_1 = arith.constant 0 : i32
    return %c0_i32, %c0_i32_0 : i32, i32
  }
  func.func @transform_1(%arg0: i32) -> (i32, i32) {
    %c0_i32 = arith.constant 0 : i32
    %c0_i32_0 = arith.constant 0 : i32
    %c0_i32_1 = arith.constant 0 : i32
    return %c0_i32, %c0_i32_0 : i32, i32
  }
  func.func @transform_2(%arg0: i32) -> (i32, i32) {
    %c0_i32 = arith.constant 0 : i32
    %c0_i32_0 = arith.constant 0 : i32
    %c0_i32_1 = arith.constant 0 : i32
    return %c0_i32, %c0_i32_0 : i32, i32
  }
  func.func @transform_3(%arg0: i32) -> (i32, i32) {
    %c0_i32 = arith.constant 0 : i32
    %c0_i32_0 = arith.constant 0 : i32
    %c0_i32_1 = arith.constant 0 : i32
    return %c0_i32, %c0_i32_0 : i32, i32
  }
}

</mosaic_0001>

<bundles_post_ra>
// kernel: moevit_forward.6
= control target key start
LH: loop header
LB: loop body
LE: loop exit
PB: predicated region body
PF: predicated region fallthrough
CT: control target
= control target key end

     0   :  { %v199_v0 = vmov 0   ;;  %vm122_vm0 = vcmask 523264   ;;  %vm166_vm1 = vcmask 261120   ;;  %s268_s1 = inlined_call_operand.vmem [shape: bf16[192,32], index: 1, kind: input, shape index: {}]   ;;  %s269_s0 = inlined_call_operand.vmem [shape: f32[8,192], index: 0, kind: input, shape index: {}]   ;;  %s270_s2 = inlined_call_operand.vmem [shape: f32[1,32], index: 2, kind: input, shape index: {}]   ;;  %s271_s3 = inlined_call_operand.vmem [shape: f32[8,32], index: 3, kind: output, shape index: {}]  }
   0x1   :  { %126 = vmatprep.subr.bf16.mxu0 %v199_v0  ;;  %v187_v1 = vld [vmem:[%s268_s1] sm:$0xff]   ;;  %v188_v2 = vld [vmem:[%s268_s1 + $0x8] sm:$0xff]   ;;  %v189_v3 = vld [vmem:[%s268_s1 + $0x10] sm:$0xff]  }
   0x2   :  { %127 = vmatpush1.bf16.msra.mxu0 %v187_v1  ;;  %v190_v4 = vld [vmem:[%s268_s1 + $0x18] sm:$0xff]   ;;  %v16_v5 = vld [vmem:[%s269_s0 + $0x8] sm:$0xff]  ;;  %v191_v7 = vld [vmem:[%s268_s1 + $0x20] sm:$0xff]  }
   0x3   :  { %128 = vmatprep.subr.bf16.mxu0 %v199_v0  ;;  %v18_v6 = vpack.c.bf16 %v16_v5, %v16_v5  ;;  %v192_v8 = vld [vmem:[%s268_s1 + $0x28] sm:$0xff]   ;;  %v193_v9 = vld [vmem:[%s268_s1 + $0x30] sm:$0xff]   ;;  %v194_v10 = vld [vmem:[%s268_s1 + $0x38] sm:$0xff]  }
   0x4   :  { %v195_v11 = vld [vmem:[%s268_s1 + $0x40] sm:$0xff]   ;;  %v196_v12 = vld [vmem:[%s268_s1 + $0x48] sm:$0xff]   ;;  %v197_v13 = vld [vmem:[%s268_s1 + $0x50] sm:$0xff]  }
   0x5   :  { %185 = vmatprep.mubr.msk.bf16.mxu0 %vm122_vm0, %v18_v6  ;;  %v198_v14 = vld [vmem:[%s268_s1 + $0x58] sm:$0xff]   ;;  %v15_v15 = vld [vmem:[%s269_s0] sm:$0xff] }
   0x6   :  { %129 = vmatpush1.bf16.msra.mxu0 %v188_v2  ;;  %v17_v16 = vpack.c.bf16 %v15_v15, %v15_v15  ;;  %v172_v17 = vld [vmem:[%s270_s2] ss:$0 sm:$0xff] }
   0x7   :  { %130 = vmatprep.subr.bf16.mxu0 %v199_v0 }
   0xa   :  { %131 = vmatpush1.bf16.msra.mxu0 %v189_v3 }
   0xb   :  { %132 = vmatprep.subr.bf16.mxu0 %v199_v0 }
   0xe   :  { %133 = vmatpush1.bf16.msra.mxu0 %v190_v4 }
   0xf   :  { %134 = vmatprep.subr.bf16.mxu0 %v199_v0 }
  0x12   :  { %135 = vmatpush1.bf16.msra.mxu0 %v191_v7 }
  0x13   :  { %136 = vmatprep.subr.bf16.mxu0 %v199_v0 }
  0x16   :  { %137 = vmatpush1.bf16.msra.mxu0 %v192_v8 }
  0x17   :  { %138 = vmatprep.subr.bf16.mxu0 %v199_v0 }
  0x1a   :  { %139 = vmatpush1.bf16.msra.mxu0 %v193_v9 }
  0x1b   :  { %140 = vmatprep.subr.bf16.mxu0 %v199_v0 }
  0x1e   :  { %141 = vmatpush1.bf16.msra.mxu0 %v194_v10 }
  0x1f   :  { %142 = vmatprep.subr.bf16.mxu0 %v199_v0 }
  0x22   :  { %143 = vmatpush1.bf16.msra.mxu0 %v195_v11 }
  0x23   :  { %144 = vmatprep.subr.bf16.mxu0 %v199_v0 }
  0x26   :  { %145 = vmatpush1.bf16.msra.mxu0 %v196_v12 }
  0x27   :  { %146 = vmatprep.subr.bf16.mxu0 %v199_v0 }
  0x2a   :  { %147 = vmatpush1.bf16.msra.mxu0 %v197_v13 }
  0x2b   :  { %148 = vmatprep.subr.bf16.mxu0 %v199_v0 }
  0x2e   :  { %149 = vmatpush1.bf16.msra.mxu0 %v198_v14 }
  0x31   :  { %159 = vmatmul.mubr.bf16.vlgmr.msra.gmra.mrb[0].mxu0 %v17_v16 }
 0x104   :  { %v160_v18 = vpop.f32.mrb[0].mxu0 }
 0x105   :  { %v161_v19 = vadd.f32 %v172_v17, %v160_v18  ;;  %v162_v20 = vpop.f32.mrb[1].mxu0 }
 0x106   :  { %v163_v21 = vpop.f32.mrb[2].mxu0 }
 0x107   :  { %167 = vst.msk [vmem:[%s271_s3] sm:$0xff] %vm166_vm1, %v161_v19  ;;  %v164_v22 = vpop.f32.mrb[3].mxu0 }

// kernel: moevit_forward.11
= control target key start
LH: loop header
LB: loop body
LE: loop exit
PB: predicated region body
PF: predicated region fallthrough
CT: control target
= control target key end

     0   :  { %v145_v1 = vmov 0.0   ;;  %vm146_vm0 = vmmov 0   ;;  %s192_s0 = inlined_call_operand.vmem [shape: f32[2,32], index: 0, kind: input, shape index: {}]   ;;  %s193_s1 = inlined_call_operand.vmem [shape: bf16[32,10], index: 1, kind: input, shape index: {}]   ;;  %s194_s2 = inlined_call_operand.vmem [shape: f32[1,10], index: 2, kind: input, shape index: {}]   ;;  %s195_s3 = inlined_call_operand.hbm [shape: f32[2,10], index: 3, kind: output, shape index: {}]  }
   0x1   :  { %v119_v0 = vld [vmem:[%s193_s1] sm:$0xff]   ;;  %108 = vmatprep.subr.bf16.mxu0 %v145_v1  ;;  %v120_v2 = vld [vmem:[%s193_s1 + $0x8] sm:$0xff]   ;;  %112 = vmatprep.mubr.msk.bf16.mxu0 %vm146_vm0, %v145_v1 }
   0x2   :  { %109 = vmatpush3.bf16.msra.mxu0 %v119_v0  ;;  %v16_v3 = vld [vmem:[%s192_s0] sm:$0x3] }
   0x3   :  { %110 = vmatprep.subr.bf16.mxu0 %v145_v1 }
   0x4   :  { %8 = vsyncpa [#allocation3], 0  ;;  %v17_v4 = vpack.c.bf16 %v16_v3, %v16_v3  ;;  %vm41_vm1 = vcmask 261120   ;;  %v101_v5 = vld [vmem:[%s194_s2] ss:$0 sm:$0xff]  ;;  %s147_s20 = smov [#allocation2]  }
   0x5   :  { %s93_s21 = sshll.u32 %s147_s20, 4  ;;  %vm85_vm2 = vcmask 74752   ;;  %s94_s21 = int_to_ptr.vmem [resolvable:$true] %s93_s21 }
   0x6   :  { %111 = vmatpush3.bf16.msra.mxu0 %v120_v2  ;;  %s121_s0 = scalar_lea.vmem %s94_s21, 32  ;;  %p126_p1 = scmp.lt.s32.totalorder %s94_s21, %s94_s21 }
   0x7   :  { %p122_p0 = scmp.ne.s32.totalorder %s94_s21, %s121_s0  ;;  %p127_p2 = scmp.lt.s32.totalorder %s121_s0, %s121_s0 }
   0x9   :  { %113 = vmatmul.mubr.msk.bf16.vlgmr.msra.gmra.mrb[0].mxu0 %vm41_vm1, %v17_v4  ;;  %p128_p3 = por %p127_p2, %p126_p1 }
   0xb   :  { %p129_p4 = pnand %p128_p3, %p122_p0 }
  0xdc   :  { %v79_v6 = vpop.f32.mrb[0].mxu0 }
  0xdd   :  { %v80_v7 = vadd.f32 %v101_v5, %v79_v6  ;;  %v114_v8 = vpop.f32.mrb[1].mxu0 }
  0xde   :  { %v82_v9 = vpop.f32.mrb[2].mxu0 }
  0xdf   :  { %v115_v10 = vpop.f32.mrb[3].mxu0  ;;  %86 = vst.msk [vmem:[#allocation2] sm:$0x3] %vm85_vm2, %v80_v7 }
  0xe0   :  { %132 = shalt.err (!%p129_p4)
}
  0xe1   :  { %s133_s2 = scalar_lea.hbm %s195_s3, 32 }
  0xe2   :  { %p134_p5 = scmp.ne.s32.totalorder %s195_s3, %s133_s2  ;;  %p137_p6 = scmp.lt.u32.totalorder %s133_s2, %s195_s3 }
  0xe4   :  { %p139_p7 = pnand %p137_p6, %p134_p5 }
  0xe6   :  { %142 = shalt.err (!%p139_p7)
}
  0xe7   :  { %96 = dma.vmem_to_hbm [thread:$0]  %s94_s21, 32, %s195_s3, [#allocation3]  }
  0xe8   :  { %143 = dma.done.wait [#allocation3], 32  }
  0xe9   :  { %144 = vsyncadd [#allocation3], 4294967264 }
  0xea   :  { %100 = vsyncpa [#allocation3], 1 }

// kernel: moevit_forward.8
= control target key start
LH: loop header
LB: loop body
LE: loop exit
PB: predicated region body
PF: predicated region fallthrough
CT: control target
= control target key end

     0   :  { %v48_v0 = vlaneseq  ;;  %v1674_v4 = vmov 1983009808   ;;  %vm69_vm0 = vcmask 261120   ;;  %vm73_vm1 = vcmask 254976   ;;  %s2115_s0 = inlined_call_operand.vmem [shape: f32[5,2,32], index: 0, kind: input, shape index: {}]   ;;  %s2116_s3 = inlined_call_operand.vmem [shape: bf16[32,4], index: 3, kind: input, shape index: {}]   ;;  %s2117_s5 = inlined_call_operand.vmem [shape: bf16[4,32,128], index: 5, kind: input, shape index: {}]   ;;  %s2118_s1 = inlined_call_operand.vmem [shape: f32[1,32], index: 1, kind: input, shape index: {}]   ;;  %s2119_s2 = inlined_call_operand.vmem [shape: f32[1,32], index: 2, kind: input, shape index: {}]   ;;  %s2120_s7 = inlined_call_operand.vmem [shape: bf16[4,128,32], index: 7, kind: input, shape index: {}]   ;;  %s2121_s4 = inlined_call_operand.vmem [shape: f32[1,4], index: 4, kind: input, shape index: {}]   ;;  %s2122_s6 = inlined_call_operand.vmem [shape: f32[4,1,128], index: 6, kind: input, shape index: {}]   ;;  %s2123_s8 = inlined_call_operand.vmem [shape: f32[4,1,32], index: 8, kind: input, shape index: {}]   ;;  %s2124_s9 = inlined_call_operand.vmem [shape: f32[5,2,32], index: 9, kind: output, shape index: {}]  }
   0x1   :  { %v33_v1 = vld [vmem:[%s2115_s0] sm:$0x3]  ;;  %v34_v2 = vld [vmem:[%s2115_s0 + $0x2] sm:$0x3]  ;;  %v35_v3 = vld [vmem:[%s2115_s0 + $0x4] sm:$0x3]  ;;  %v46_v5 = vunpack.c.l.s4 %v1674_v4 }
   0x2   :  { %v36_v6 = vld [vmem:[%s2115_s0 + $0x6] sm:$0x3]  ;;  %v49_v7 = vshrl.u32 %v48_v0, 7  ;;  %v43_v8 = vcombine.low %v33_v1, %v34_v2  ;;  %v37_v12 = vld [vmem:[%s2115_s0 + $0x8] sm:$0x3]  ;;  %v1679_v63 = vmov 0.0  }
   0x3   :  { %v44_v9 = vcombine.low %v35_v3, %v36_v6  ;;  %v47_v10 = vunpack.c.0.s8 %v46_v5  ;;  %v1675_v19 = vmov 269488144   ;;  %v1676_v21 = vmov 842150450   ;;  %v1599_v62 = vld [vmem:[%s2116_s3] sm:$0xff]   ;;  %1472 = vmatprep.subr.bf16.mxu0 %v1679_v63  ;;  %1480 = vmatprep.subr.bf16.mxu1 %v1679_v63 }
   0x4   :  { %v83_v20 = vunpack.c.l.s4 %v1675_v19  ;;  %v90_v22 = vunpack.c.l.s4 %v1676_v21  ;;  %v1677_v23 = vmov 1414812756   ;;  %v1678_v25 = vmov 1987475062   ;;  %1473 = vmatpush3.bf16.msra.mxu0 %v1599_v62  ;;  %v1613_v62 = vld [vmem:[%s2120_s7 + $0x28] sm:$0xff]  }
   0x5   :  { %v1744_v11 = vsub.s32 %v47_v10, %v49_v7  ;;  %v97_v24 = vunpack.c.l.s4 %v1677_v23  ;;  %v104_v26 = vunpack.c.l.s4 %v1678_v25  ;;  %vm1680_vm2 = vmmov 0   ;;  %1474 = vmatprep.subr.bf16.mxu0 %v1679_v63 }
   0x6   :  { %v84_v27 = vunpack.c.0.s8 %v83_v20  ;;  %v91_v28 = vunpack.c.0.s8 %v90_v22  ;;  %1476 = vmatprep.mubr.msk.bf16.mxu0 %vm1680_vm2, %v1679_v63  ;;  %1484 = vmatprep.mubr.msk.bf16.mxu1 %vm1680_vm2, %v1679_v63  ;;  %vm385_vm3 = vcmask 31744   ;;  %vm389_vm4 = vcmask 25600  }
   0x7   :  { %v51_v13 = vrot.slane %v43_v8, %v1744_v11  ;;  %v58_v14 = vrot.slane %v44_v9, %v1744_v11  ;;  %v66_v16 = vrot.slane %v37_v12, %v1744_v11  ;;  %v98_v29 = vunpack.c.0.s8 %v97_v24  ;;  %v1297_v9 = vld [vmem:[%s2118_s1] ss:$0 sm:$0xff] }
   0x8   :  { %v105_v30 = vunpack.c.0.s8 %v104_v26  ;;  %v1754_v31 = vsub.s32 %v84_v27, %v49_v7  ;;  %v1756_v32 = vsub.s32 %v91_v28, %v49_v7 }
   0x9   :  { %v59_v15 = vcombine.low %v51_v13, %v58_v14  ;;  %v74_v18 = vsel %vm73_vm1, %v66_v16, 0.0  ;;  %v1758_v33 = vsub.s32 %v98_v29, %v49_v7  ;;  %v228_v13 = vcombine.high %v1297_v9, %v1297_v9 }
   0xa   :  { %v1760_v34 = vsub.s32 %v105_v30, %v49_v7  ;;  %v235_v14 = vrot.slane %v1297_v9, %v1744_v11  ;;  %v1303_v9 = vld [vmem:[%s2122_s6] ss:$0 sm:$0xff] }
   0xb   :  { %v70_v17 = vsel %vm69_vm0, %v59_v15, 0.0  ;;  %v242_v16 = vrot.slane %v228_v13, %v1744_v11 }
   0xc   :  { %71 = vadd.xlane.f32.xlu0 %v70_v17  ;;  %v243_v19 = vcombine.high %v235_v14, %v235_v14 }
   0xd   :  { %v244_v25 = vcombine.high %v242_v16, %v242_v16 }
  0x10   :  { %75 = vadd.xlane.f32.xlu0 %v74_v18 }
  0x99   :  { %v72_v35 = vpop.xlane.xlu0 %71 }
  0x9a   :  { %v78_v36 = vmul.f32 0.03125, %v72_v35 }
  0x9c   :  { %v88_v37 = vrot.slane %v78_v36, %v1754_v31  ;;  %v95_v38 = vrot.slane %v78_v36, %v1756_v32  ;;  %v102_v39 = vrot.slane %v78_v36, %v1758_v33  ;;  %v109_v40 = vrot.slane %v78_v36, %v1760_v34 }
  0x9d   :  { %v76_v41 = vpop.xlane.xlu0 %75 }
  0x9e   :  { %v79_v42 = vmul.f32 0.03125, %v76_v41  ;;  %v1766_v43 = vsub.f32 %v33_v1, %v88_v37  ;;  %v1768_v44 = vsub.f32 %v34_v2, %v95_v38  ;;  %v1770_v45 = vsub.f32 %v35_v3, %v102_v39  ;;  %v1600_v1 = vld [vmem:[%s2117_s5] sm:$0xff]   ;;  %v1601_v2 = vld [vmem:[%s2116_s3 + $0x8] sm:$0xff]  }
  0x9f   :  { %v1772_v46 = vsub.f32 %v36_v6, %v109_v40  ;;  %1481 = vmatpush3.bf16.msra.mxu1 %v1600_v1  ;;  %v1602_v3 = vld [vmem:[%s2117_s5 + $0x8] sm:$0xff]   ;;  %1475 = vmatpush3.bf16.msra.mxu0 %v1601_v2  ;;  %v1614_v1 = vld [vmem:[%s2120_s7 + $0x58] sm:$0xff]   ;;  %v1615_v2 = vld [vmem:[%s2120_s7 + $0x30] sm:$0xff]  }
  0xa0   :  { %v116_v47 = vrot.slane %v79_v42, %v1754_v31  ;;  %v127_v48 = vmul.f32 %v1766_v43, %v1766_v43  ;;  %v128_v49 = vmul.f32 %v1768_v44, %v1768_v44  ;;  %v129_v50 = vmul.f32 %v1770_v45, %v1770_v45  ;;  %1482 = vmatprep.subr.bf16.mxu1 %v1679_v63 }
  0xa1   :  { %v130_v51 = vmul.f32 %v1772_v46, %v1772_v46  ;;  %1488 = vmatprep.subr.bf16.mxu0 %v1679_v63 }
  0xa2   :  { %v1783_v52 = vsub.f32 %v37_v12, %v116_v47  ;;  %v137_v53 = vcombine.low %v127_v48, %v128_v49  ;;  %v1298_v12 = vld [vmem:[%s2119_s2] ss:$0 sm:$0xff] }
  0xa3   :  { %v138_v54 = vcombine.low %v129_v50, %v130_v51  ;;  %1483 = vmatpush3.bf16.msra.mxu1 %v1602_v3  ;;  %v260_v15 = vcombine.high %v1298_v12, %v1298_v12  ;;  %v267_v17 = vrot.slane %v1298_v12, %v1744_v11  ;;  %v1603_v51 = vld [vmem:[%s2117_s5 + $0x10] sm:$0xff]   ;;  %v1616_v3 = vld [vmem:[%s2120_s7 + $0x60] sm:$0xff]  }
  0xa4   :  { %v145_v55 = vrot.slane %v137_v53, %v1744_v11  ;;  %v131_v56 = vmul.f32 %v1783_v52, %v1783_v52  ;;  %1508 = vmatprep.subr.bf16.mxu1 %v1679_v63  ;;  %v1604_v53 = vld [vmem:[%s2117_s5 + $0x18] sm:$0xff]  }
  0xa5   :  { %v152_v57 = vrot.slane %v138_v54, %v1744_v11  ;;  %v274_v20 = vrot.slane %v260_v15, %v1744_v11  ;;  %v275_v26 = vcombine.high %v267_v17, %v267_v17  ;;  %v1605_v54 = vld [vmem:[%s2120_s7] sm:$0xff]  }
  0xa6   :  { %v160_v59 = vrot.slane %v131_v56, %v1744_v11  ;;  %v1607_v56 = vld [vmem:[%s2120_s7 + $0x10] sm:$0xff]  }
  0xa7   :  { %v153_v58 = vcombine.low %v145_v55, %v152_v57  ;;  %v276_v36 = vcombine.high %v274_v20, %v274_v20  ;;  %v1606_v55 = vld [vmem:[%s2120_s7 + $0x8] sm:$0xff]   ;;  %v1608_v57 = vld [vmem:[%s2120_s7 + $0x40] sm:$0xff]  }
  0xa8   :  { %v166_v61 = vsel %vm73_vm1, %v160_v59, 0.0  ;;  %v1610_v59 = vld [vmem:[%s2120_s7 + $0x48] sm:$0xff]  }
  0xa9   :  { %v163_v60 = vsel %vm69_vm0, %v153_v58, 0.0  ;;  %v1609_v58 = vld [vmem:[%s2120_s7 + $0x18] sm:$0xff]  }
  0xaa   :  { %164 = vadd.xlane.f32.xlu1 %v163_v60  ;;  %v1611_v60 = vld [vmem:[%s2120_s7 + $0x20] sm:$0xff]  }
  0xae   :  { %167 = vadd.xlane.f32.xlu1 %v166_v61  ;;  %v1612_v61 = vld [vmem:[%s2120_s7 + $0x50] sm:$0xff]  }
 0x137   :  { %v165_v4 = vpop.xlane.xlu1 %164 }
 0x138   :  { %v169_v5 = vmul.f32 0.03125, %v165_v4  ;;  %v1617_v4 = vld [vmem:[%s2120_s7 + $0x38] sm:$0xff]  }
 0x13a   :  { %v171_v6 = vadd.f32 1e-05, %v169_v5  ;;  %v1618_v5 = vld [vmem:[%s2120_s7 + $0x68] sm:$0xff]  }
 0x13b   :  { %v168_v7 = vpop.xlane.xlu1 %167 }
 0x13c   :  { %1641 = vrsqrt.f32 %v171_v6  ;;  %v170_v8 = vmul.f32 0.03125, %v168_v7  ;;  %v1619_v6 = vld [vmem:[%s2120_s7 + $0x70] sm:$0xff]   ;;  %v1621_v7 = vld [vmem:[%s2120_s7 + $0x78] sm:$0xff]  }
 0x13e   :  { %v172_v10 = vadd.f32 1e-05, %v170_v8  ;;  %v1299_v8 = vld [vmem:[%s2121_s4] ss:$0 sm:$0xff] }
 0x140   :  { %1643 = vrsqrt.f32 %v172_v10 }
 0x146   :  { %v1642_v18 = vpop.eup %1641 }
 0x147   :  { %v183_v21 = vrot.slane %v1642_v18, %v1754_v31  ;;  %v190_v22 = vrot.slane %v1642_v18, %v1756_v32  ;;  %v197_v23 = vrot.slane %v1642_v18, %v1758_v33  ;;  %v204_v24 = vrot.slane %v1642_v18, %v1760_v34 }
 0x149   :  { %v217_v27 = vmul.f32 %v183_v21, %v1766_v43  ;;  %v218_v28 = vmul.f32 %v190_v22, %v1768_v44  ;;  %v219_v29 = vmul.f32 %v197_v23, %v1770_v45  ;;  %v220_v30 = vmul.f32 %v204_v24, %v1772_v46 }
 0x14a   :  { %v1644_v35 = vpop.eup %1643 }
 0x14b   :  { %v211_v37 = vrot.slane %v1644_v35, %v1754_v31  ;;  %v249_v38 = vmul.f32 %v235_v14, %v217_v27  ;;  %v250_v32 = vmul.f32 %v243_v19, %v218_v28  ;;  %v251_v39 = vmul.f32 %v242_v16, %v219_v29  ;;  %v1321_v28 = vld [vmem:[%s2122_s6 + $0x1] ss:$0 sm:$0xff] }
 0x14c   :  { %v252_v33 = vmul.f32 %v244_v25, %v220_v30 }
 0x14d   :  { %v221_v34 = vmul.f32 %v211_v37, %v1783_v52  ;;  %v281_v40 = vadd.f32 %v267_v17, %v249_v38  ;;  %v282_v41 = vadd.f32 %v275_v26, %v250_v32  ;;  %v283_v42 = vadd.f32 %v274_v20, %v251_v39 }
 0x14e   :  { %v284_v43 = vadd.f32 %v276_v36, %v252_v33 }
 0x14f   :  { %v253_v47 = vmul.f32 %v235_v14, %v221_v34  ;;  %v291_v44 = vcombine.low %v281_v40, %v282_v41 }
 0x150   :  { %v292_v48 = vcombine.low %v283_v42, %v284_v43 }
 0x151   :  { %v285_v45 = vadd.f32 %v267_v17, %v253_v47  ;;  %v299_v46 = vrot.slane %v291_v44, %v1744_v11 }
 0x152   :  { %v306_v49 = vrot.slane %v292_v48, %v1744_v11 }
 0x153   :  { %v314_v31 = vrot.slane %v285_v45, %v1744_v11 }
 0x154   :  { %v307_v50 = vcombine.low %v299_v46, %v306_v49 }
 0x156   :  { %v1840_v52 = vpack.c.bf16 %v314_v31, %v307_v50 }
 0x158   :  { %1477 = vmatmul.mubr.msk.bf16.vlgmr.msra.gmra.mrb[0].mxu0 %vm69_vm0, %v1840_v52  ;;  %1485 = vmatmul.mubr.msk.bf16.vlgmr.msra.gmra.mrb[0].mxu1 %vm69_vm0, %v1840_v52 }
 0x159   :  { %1509 = vmatpush3.bf16.msra.mxu1 %v1603_v51  ;;  %1512 = vmatprep.mubr.msk.bf16.mxu1 %vm1680_vm2, %v1679_v63 }
 0x15a   :  { %1510 = vmatprep.subr.bf16.mxu1 %v1679_v63  ;;  %1504 = vmatprep.mubr.msk.bf16.mxu0 %vm1680_vm2, %v1679_v63 }
 0x15b   :  { %1489 = vmatpush3.bf16.msra.mxu0 %v1605_v54 }
 0x15c   :  { %1490 = vmatprep.subr.bf16.mxu0 %v1679_v63 }
 0x15d   :  { %1511 = vmatpush3.bf16.msra.mxu1 %v1604_v53 }
 0x15e   :  { %1516 = vmatprep.subr.bf16.mxu1 %v1679_v63 }
 0x15f   :  { %1491 = vmatpush3.bf16.msra.mxu0 %v1606_v55 }
 0x160   :  { %1513 = vmatmul.mubr.msk.bf16.vlgmr.msra.gmra.mrb[4].mxu1 %vm69_vm0, %v1840_v52  ;;  %1492 = vmatprep.subr.bf16.mxu0 %v1679_v63 }
 0x161   :  { %1532 = vmatprep.mubr.msk.bf16.mxu1 %vm1680_vm2, %v1679_v63  ;;  %1517 = vmatpush3.bf16.msra.mxu1 %v1608_v57 }
 0x162   :  { %1518 = vmatprep.subr.bf16.mxu1 %v1679_v63 }
 0x163   :  { %1493 = vmatpush3.bf16.msra.mxu0 %v1607_v56 }
 0x164   :  { %1494 = vmatprep.subr.bf16.mxu0 %v1679_v63 }
 0x165   :  { %1519 = vmatpush3.bf16.msra.mxu1 %v1610_v59 }
 0x166   :  { %1520 = vmatprep.subr.bf16.mxu1 %v1679_v63 }
 0x167   :  { %1495 = vmatpush3.bf16.msra.mxu0 %v1609_v58 }
 0x168   :  { %1496 = vmatprep.subr.bf16.mxu0 %v1679_v63 }
 0x169   :  { %1521 = vmatpush3.bf16.msra.mxu1 %v1612_v61  ;;  %v1620_v61 = vld [vmem:[%s2117_s5 + $0x20] sm:$0xff]  }
 0x16a   :  { %1522 = vmatprep.subr.bf16.mxu1 %v1679_v63 }
 0x16b   :  { %1497 = vmatpush3.bf16.msra.mxu0 %v1611_v60 }
 0x16c   :  { %1498 = vmatprep.subr.bf16.mxu0 %v1679_v63 }
 0x16d   :  { %1523 = vmatpush3.bf16.msra.mxu1 %v1614_v1 }
 0x16e   :  { %1524 = vmatprep.subr.bf16.mxu1 %v1679_v63 }
 0x16f   :  { %1499 = vmatpush3.bf16.msra.mxu0 %v1613_v62 }
 0x170   :  { %1500 = vmatprep.subr.bf16.mxu0 %v1679_v63 }
 0x171   :  { %1525 = vmatpush3.bf16.msra.mxu1 %v1616_v3 }
 0x172   :  { %1526 = vmatprep.subr.bf16.mxu1 %v1679_v63 }
 0x173   :  { %1501 = vmatpush3.bf16.msra.mxu0 %v1615_v2 }
 0x174   :  { %1502 = vmatprep.subr.bf16.mxu0 %v1679_v63 }
 0x175   :  { %1527 = vmatpush3.bf16.msra.mxu1 %v1618_v5 }
 0x176   :  { %1528 = vmatprep.subr.bf16.mxu1 %v1679_v63 }
 0x177   :  { %1503 = vmatpush3.bf16.msra.mxu0 %v1617_v4  ;;  %v1622_v4 = vld [vmem:[%s2117_s5 + $0x28] sm:$0xff]  }
 0x178   :  { %1536 = vmatprep.subr.bf16.mxu0 %v1679_v63 }
 0x179   :  { %1529 = vmatpush3.bf16.msra.mxu1 %v1619_v6 }
 0x17a   :  { %1530 = vmatprep.subr.bf16.mxu1 %v1679_v63 }
 0x17d   :  { %1531 = vmatpush3.bf16.msra.mxu1 %v1621_v7 }
 0x17e   :  { %1564 = vmatprep.subr.bf16.mxu1 %v1679_v63 }
 0x22b   :  { %v378_v10 = vpop.f32.mrb[0].mxu0  ;;  %v489_v12 = vpop.f32.mrb[0].mxu1 }
 0x22c   :  { %v1929_v13 = vadd.f32 %v1299_v8, %v378_v10  ;;  %v490_v14 = vadd.f32 %v1303_v9, %v489_v12  ;;  %v1478_v15 = vpop.f32.mrb[1].mxu0  ;;  %v1486_v16 = vpop.f32.mrb[1].mxu1  ;;  %v1623_v10 = vld [vmem:[%s2117_s5 + $0x30] sm:$0xff]  }
 0x22d   :  { %v381_v17 = vpop.f32.mrb[2].mxu0  ;;  %v492_v18 = vpop.f32.mrb[2].mxu1  ;;  %v1625_v15 = vld [vmem:[%s2120_s7 + $0x80] sm:$0xff]   ;;  %v1626_v16 = vld [vmem:[%s2120_s7 + $0x88] sm:$0xff]  }
 0x22e   :  { %v498_v19 = vmul.f32 0.044715, %v490_v14  ;;  %v1931_v20 = vadd.f32 %v1299_v8, %v381_v17  ;;  %v493_v21 = vadd.f32 %v1303_v9, %v492_v18  ;;  %v1479_v22 = vpop.f32.mrb[3].mxu0  ;;  %v1487_v23 = vpop.f32.mrb[3].mxu1  ;;  %v386_v24 = vsel %vm385_vm3, %v1929_v13, -inf  ;;  %v1628_v17 = vld [vmem:[%s2120_s7 + $0xc0] sm:$0xff]  }
 0x22f   :  { %387 = vmax.xlane.f32.xlu0 %v386_v24  ;;  %v496_v56 = vmul.f32 0.5, %v490_v14  ;;  %v1629_v18 = vld [vmem:[%s2120_s7 + $0x98] sm:$0xff]   ;;  %v1632_v22 = vld [vmem:[%s2120_s7 + $0xd0] sm:$0xff]   ;;  %v1633_v23 = vld [vmem:[%s2120_s7 + $0xa8] sm:$0xff]  }
 0x230   :  { %v500_v25 = vmul.f32 %v498_v19, %v490_v14  ;;  %v499_v26 = vmul.f32 0.044715, %v493_v21  ;;  %v390_v27 = vsel %vm389_vm4, %v1931_v20, -inf  ;;  %v497_v57 = vmul.f32 0.5, %v493_v21  ;;  %v1630_v19 = vld [vmem:[%s2120_s7 + $0xc8] sm:$0xff]   ;;  %v1634_v24 = vld [vmem:[%s2120_s7 + $0xd8] sm:$0xff]  }
 0x231   :  { %391 = vmax.xlane.f32.xlu1 %v390_v27  ;;  %v1635_v27 = vld [vmem:[%s2120_s7 + $0xb0] sm:$0xff]  }
 0x232   :  { %v502_v29 = vmul.f32 %v500_v25, %v490_v14  ;;  %v501_v30 = vmul.f32 %v499_v26, %v493_v21 }
 0x233   :  { %v694_v35 = vpop.f32.mrb[4].mxu1 }
 0x234   :  { %v504_v36 = vadd.f32 %v502_v29, %v490_v14  ;;  %v503_v37 = vmul.f32 %v501_v30, %v493_v21  ;;  %v695_v38 = vadd.f32 %v1321_v28, %v694_v35  ;;  %v1514_v32 = vpop.f32.mrb[5].mxu1  ;;  %v1624_v14 = vld [vmem:[%s2117_s5 + $0x38] sm:$0xff]  }
 0x235   :  { %v697_v39 = vpop.f32.mrb[6].mxu1 }
 0x236   :  { %v506_v33 = vmul.f32 0.7978846, %v504_v36  ;;  %v505_v34 = vadd.f32 %v503_v37, %v493_v21  ;;  %v703_v40 = vmul.f32 0.044715, %v695_v38  ;;  %v698_v41 = vadd.f32 %v1321_v28, %v697_v39  ;;  %v1515_v42 = vpop.f32.mrb[7].mxu1  ;;  %v1631_v21 = vld [vmem:[%s2120_s7 + $0xa0] sm:$0xff]  }
 0x237   :  { %v701_v5 = vmul.f32 0.5, %v695_v38  ;;  %v1636_v28 = vld [vmem:[%s2120_s7 + $0xe0] sm:$0xff]   ;;  %v1638_v36 = vld [vmem:[%s2120_s7 + $0xe8] sm:$0xff]  }
 0x238   :  { %1645 = vtanh.f32 %v506_v33  ;;  %v507_v43 = vmul.f32 0.7978846, %v505_v34  ;;  %v705_v47 = vmul.f32 %v703_v40, %v695_v38  ;;  %v704_v44 = vmul.f32 0.044715, %v698_v41 }
 0x239   :  { %v702_v6 = vmul.f32 0.5, %v698_v41 }
 0x23a   :  { %1647 = vtanh.f32 %v507_v43  ;;  %v707_v48 = vmul.f32 %v705_v47, %v695_v38  ;;  %v706_v45 = vmul.f32 %v704_v44, %v698_v41 }
 0x23c   :  { %v709_v46 = vadd.f32 %v707_v48, %v695_v38  ;;  %v708_v49 = vmul.f32 %v706_v45, %v698_v41  ;;  %v1640_v38 = vld [vmem:[%s2120_s7 + $0xf8] sm:$0xff]  }
 0x23e   :  { %v711_v31 = vmul.f32 0.7978846, %v709_v46  ;;  %v710_v50 = vadd.f32 %v708_v49, %v698_v41 }
 0x240   :  { %1649 = vtanh.f32 %v711_v31  ;;  %v712_v51 = vmul.f32 0.7978846, %v710_v50 }
 0x242   :  { %v1646_v53 = vpop.eup %1645  ;;  %1651 = vtanh.f32 %v712_v51 }
 0x243   :  { %v510_v54 = vadd.f32 1.0, %v1646_v53 }
 0x244   :  { %v1648_v55 = vpop.eup %1647 }
 0x245   :  { %v511_v58 = vadd.f32 1.0, %v1648_v55  ;;  %v512_v59 = vmul.f32 %v510_v54, %v496_v56 }
 0x247   :  { %v513_v60 = vmul.f32 %v511_v58, %v497_v57  ;;  %v1391_v57 = vld [vmem:[%s2122_s6 + $0x3] ss:$0 sm:$0xff] }
 0x249   :  { %v514_v62 = vpack.c.bf16 %v513_v60, %v512_v59 }
 0x24a   :  { %v1650_v1 = vpop.eup %1649 }
 0x24b   :  { %1505 = vmatmul.mubr.bf16.vlgmr.msra.gmra.mrb[4].mxu0 %v514_v62  ;;  %v715_v2 = vadd.f32 1.0, %v1650_v1 }
 0x24c   :  { %v1652_v3 = vpop.eup %1651  ;;  %1537 = vmatpush3.bf16.msra.mxu0 %v1620_v61  ;;  %1540 = vmatprep.mubr.msk.bf16.mxu0 %vm1680_vm2, %v1679_v63 }
 0x24d   :  { %1538 = vmatprep.subr.bf16.mxu0 %v1679_v63  ;;  %v716_v7 = vadd.f32 1.0, %v1652_v3  ;;  %v717_v8 = vmul.f32 %v715_v2, %v701_v5 }
 0x24f   :  { %v718_v9 = vmul.f32 %v716_v7, %v702_v6 }
 0x250   :  { %1539 = vmatpush3.bf16.msra.mxu0 %v1622_v4 }
 0x251   :  { %v719_v12 = vpack.c.bf16 %v718_v9, %v717_v8  ;;  %1544 = vmatprep.subr.bf16.mxu0 %v1679_v63 }
 0x253   :  { %1533 = vmatmul.mubr.bf16.vlgmr.msra.gmra.mrb[8].mxu1 %v719_v12  ;;  %1541 = vmatmul.mubr.msk.bf16.vlgmr.msra.gmra.mrb[8].mxu0 %vm69_vm0, %v1840_v52 }
 0x254   :  { %1565 = vmatpush3.bf16.msra.mxu1 %v1623_v10  ;;  %1568 = vmatprep.mubr.msk.bf16.mxu1 %vm1680_vm2, %v1679_v63 }
 0x255   :  { %1566 = vmatprep.subr.bf16.mxu1 %v1679_v63  ;;  %1560 = vmatprep.mubr.msk.bf16.mxu0 %vm1680_vm2, %v1679_v63 }
 0x256   :  { %1545 = vmatpush3.bf16.msra.mxu0 %v1625_v15 }
 0x257   :  { %1546 = vmatprep.subr.bf16.mxu0 %v1679_v63 }
 0x258   :  { %1567 = vmatpush3.bf16.msra.mxu1 %v1624_v14 }
 0x259   :  { %1572 = vmatprep.subr.bf16.mxu1 %v1679_v63 }
 0x25a   :  { %1547 = vmatpush3.bf16.msra.mxu0 %v1626_v16 }
 0x25b   :  { %1569 = vmatmul.mubr.msk.bf16.vlgmr.msra.gmra.mrb[12].mxu1 %vm69_vm0, %v1840_v52  ;;  %1548 = vmatprep.subr.bf16.mxu0 %v1679_v63  ;;  %v1627_v52 = vld [vmem:[%s2120_s7 + $0x90] sm:$0xff]  }
 0x25c   :  { %1588 = vmatprep.mubr.msk.bf16.mxu1 %vm1680_vm2, %v1679_v63  ;;  %1573 = vmatpush3.bf16.msra.mxu1 %v1628_v17 }
 0x25d   :  { %1574 = vmatprep.subr.bf16.mxu1 %v1679_v63 }
 0x25e   :  { %1549 = vmatpush3.bf16.msra.mxu0 %v1627_v52 }
 0x25f   :  { %1550 = vmatprep.subr.bf16.mxu0 %v1679_v63 }
 0x260   :  { %1575 = vmatpush3.bf16.msra.mxu1 %v1630_v19 }
 0x261   :  { %1576 = vmatprep.subr.bf16.mxu1 %v1679_v63 }
 0x262   :  { %1551 = vmatpush3.bf16.msra.mxu0 %v1629_v18 }
 0x263   :  { %1552 = vmatprep.subr.bf16.mxu0 %v1679_v63 }
 0x264   :  { %1577 = vmatpush3.bf16.msra.mxu1 %v1632_v22 }
 0x265   :  { %1578 = vmatprep.subr.bf16.mxu1 %v1679_v63 }
 0x266   :  { %1553 = vmatpush3.bf16.msra.mxu0 %v1631_v21 }
 0x267   :  { %1554 = vmatprep.subr.bf16.mxu0 %v1679_v63 }
 0x268   :  { %1579 = vmatpush3.bf16.msra.mxu1 %v1634_v24 }
 0x269   :  { %1580 = vmatprep.subr.bf16.mxu1 %v1679_v63 }
 0x26a   :  { %1555 = vmatpush3.bf16.msra.mxu0 %v1633_v23 }
 0x26b   :  { %1556 = vmatprep.subr.bf16.mxu0 %v1679_v63 }
 0x26c   :  { %1581 = vmatpush3.bf16.msra.mxu1 %v1636_v28 }
 0x26d   :  { %1582 = vmatprep.subr.bf16.mxu1 %v1679_v63 }
 0x26e   :  { %1557 = vmatpush3.bf16.msra.mxu0 %v1635_v27 }
 0x26f   :  { %1558 = vmatprep.subr.bf16.mxu0 %v1679_v63 }
 0x270   :  { %1583 = vmatpush3.bf16.msra.mxu1 %v1638_v36 }
 0x271   :  { %1584 = vmatprep.subr.bf16.mxu1 %v1679_v63 }
 0x2bc   :  { %v388_v25 = vpop.xlane.xlu0 %387 }
 0x2bd   :  { %v393_v26 = vsub.f32 %v1929_v13, %v388_v25  ;;  %v1637_v13 = vld [vmem:[%s2120_s7 + $0xb8] sm:$0xff]  }
 0x2be   :  { %v392_v29 = vpop.xlane.xlu1 %391  ;;  %1559 = vmatpush3.bf16.msra.mxu0 %v1637_v13 }
 0x2bf   :  { %v395_v30 = vmul.f32 1.442695, %v393_v26  ;;  %v394_v35 = vsub.f32 %v1931_v20, %v392_v29  ;;  %v1639_v20 = vld [vmem:[%s2120_s7 + $0xf0] sm:$0xff]  }
 0x2c0   :  { %1585 = vmatpush3.bf16.msra.mxu1 %v1639_v20 }
 0x2c1   :  { %1653 = vpow2.f32 %v395_v30  ;;  %v397_v37 = vmul.f32 1.442695, %v394_v35  ;;  %1586 = vmatprep.subr.bf16.mxu1 %v1679_v63  ;;  %v1356_v63 = vld [vmem:[%s2122_s6 + $0x2] ss:$0 sm:$0xff] }
 0x2c3   :  { %1655 = vpow2.f32 %v397_v37 }
 0x2c4   :  { %1587 = vmatpush3.bf16.msra.mxu1 %v1640_v38 }
 0x2cb   :  { %v2032_v32 = vpop.eup %1653 }
 0x2cc   :  { %v399_v39 = vsel %vm385_vm3, %v2032_v32, 0.0 }
 0x2cd   :  { %v2036_v33 = vpop.eup %1655  ;;  %400 = vadd.xlane.f32.xlu0 %v399_v39 }
 0x2ce   :  { %v402_v34 = vsel %vm389_vm4, %v2036_v33, 0.0 }
 0x2cf   :  { %403 = vadd.xlane.f32.xlu1 %v402_v34 }
 0x31e   :  { %v2040_v40 = vpop.f32.mrb[4].mxu0 }
 0x31f   :  { %v1506_v41 = vpop.f32.mrb[5].mxu0 }
 0x320   :  { %v2042_v42 = vpop.f32.mrb[6].mxu0 }
 0x321   :  { %v1507_v43 = vpop.f32.mrb[7].mxu0 }
 0x326   :  { %v2047_v47 = vpop.f32.mrb[8].mxu1  ;;  %v901_v44 = vpop.f32.mrb[8].mxu0 }
 0x327   :  { %v902_v48 = vadd.f32 %v1356_v63, %v901_v44  ;;  %v1534_v45 = vpop.f32.mrb[9].mxu1  ;;  %v1542_v46 = vpop.f32.mrb[9].mxu0 }
 0x328   :  { %v2049_v49 = vpop.f32.mrb[10].mxu1  ;;  %v904_v31 = vpop.f32.mrb[10].mxu0 }
 0x329   :  { %v910_v50 = vmul.f32 0.044715, %v902_v48  ;;  %v905_v51 = vadd.f32 %v1356_v63, %v904_v31  ;;  %v1535_v53 = vpop.f32.mrb[11].mxu1  ;;  %v1543_v54 = vpop.f32.mrb[11].mxu0  ;;  %v908_v24 = vmul.f32 0.5, %v902_v48 }
 0x32b   :  { %v912_v55 = vmul.f32 %v910_v50, %v902_v48  ;;  %v911_v56 = vmul.f32 0.044715, %v905_v51  ;;  %v909_v25 = vmul.f32 0.5, %v905_v51  ;;  %v416_v50 = vand.u32 127, %v48_v0 }
 0x32d   :  { %v914_v58 = vmul.f32 %v912_v55, %v902_v48  ;;  %v913_v59 = vmul.f32 %v911_v56, %v905_v51 }
 0x32e   :  { %v1108_v60 = vpop.f32.mrb[12].mxu1 }
 0x32f   :  { %v916_v61 = vadd.f32 %v914_v58, %v902_v48  ;;  %v915_v62 = vmul.f32 %v913_v59, %v905_v51  ;;  %v1109_v1 = vadd.f32 %v1391_v57, %v1108_v60  ;;  %v1570_v2 = vpop.f32.mrb[13].mxu1 }
 0x330   :  { %v1111_v3 = vpop.f32.mrb[14].mxu1  ;;  %v1307_v2 = vld [vmem:[%s2123_s8] ss:$0 sm:$0xff] }
 0x331   :  { %v918_v4 = vmul.f32 0.7978846, %v916_v61  ;;  %v917_v5 = vadd.f32 %v915_v62, %v905_v51  ;;  %v1117_v6 = vmul.f32 0.044715, %v1109_v1  ;;  %v1112_v7 = vadd.f32 %v1391_v57, %v1111_v3  ;;  %v1571_v8 = vpop.f32.mrb[15].mxu1 }
 0x332   :  { %v1115_v36 = vmul.f32 0.5, %v1109_v1  ;;  %v417_v51 = vcvt.s32.f32 %v416_v50  ;;  %v1342_v3 = vld [vmem:[%s2123_s8 + $0x1] ss:$0 sm:$0xff] }
 0x333   :  { %1657 = vtanh.f32 %v918_v4  ;;  %v919_v9 = vmul.f32 0.7978846, %v917_v5  ;;  %v1119_v10 = vmul.f32 %v1117_v6, %v1109_v1  ;;  %v1118_v12 = vmul.f32 0.044715, %v1112_v7  ;;  %v1377_v4 = vld [vmem:[%s2123_s8 + $0x2] ss:$0 sm:$0xff] }
 0x334   :  { %v1116_v37 = vmul.f32 0.5, %v1112_v7  ;;  %v621_v5 = vadd.f32 %v1307_v2, %v2040_v40  ;;  %v1412_v6 = vld [vmem:[%s2123_s8 + $0x3] ss:$0 sm:$0xff]  ;;  %v828_v8 = vadd.f32 %v1342_v3, %v2047_v47 }
 0x335   :  { %1659 = vtanh.f32 %v919_v9  ;;  %v1121_v14 = vmul.f32 %v1119_v10, %v1109_v1  ;;  %v1120_v15 = vmul.f32 %v1118_v12, %v1112_v7  ;;  %v831_v9 = vadd.f32 %v1342_v3, %v2049_v49 }
 0x337   :  { %v1123_v16 = vadd.f32 %v1121_v14, %v1109_v1  ;;  %v1122_v52 = vmul.f32 %v1120_v15, %v1112_v7 }
 0x339   :  { %v1125_v17 = vmul.f32 0.7978846, %v1123_v16  ;;  %v1124_v18 = vadd.f32 %v1122_v52, %v1112_v7  ;;  %v624_v7 = vadd.f32 %v1307_v2, %v2042_v42 }
 0x33b   :  { %1661 = vtanh.f32 %v1125_v17  ;;  %v1126_v19 = vmul.f32 0.7978846, %v1124_v18 }
 0x33d   :  { %v1658_v21 = vpop.eup %1657  ;;  %1663 = vtanh.f32 %v1126_v19 }
 0x33e   :  { %v922_v22 = vadd.f32 1.0, %v1658_v21 }
 0x33f   :  { %v1660_v23 = vpop.eup %1659 }
 0x340   :  { %v923_v26 = vadd.f32 1.0, %v1660_v23  ;;  %v924_v27 = vmul.f32 %v922_v22, %v908_v24 }
 0x342   :  { %v925_v28 = vmul.f32 %v923_v26, %v909_v25 }
 0x344   :  { %v926_v29 = vpack.c.bf16 %v925_v28, %v924_v27 }
 0x345   :  { %v1662_v30 = vpop.eup %1661 }
 0x346   :  { %1561 = vmatmul.mubr.bf16.vlgmr.msra.gmra.mrb[12].mxu0 %v926_v29  ;;  %v1129_v35 = vadd.f32 1.0, %v1662_v30 }
 0x347   :  { %v1664_v13 = vpop.eup %1663 }
 0x348   :  { %v1130_v20 = vadd.f32 1.0, %v1664_v13  ;;  %v1131_v38 = vmul.f32 %v1129_v35, %v1115_v36 }
 0x34a   :  { %v1132_v39 = vmul.f32 %v1130_v20, %v1116_v37 }
 0x34c   :  { %v1133_v34 = vpack.c.bf16 %v1132_v39, %v1131_v38 }
 0x34e   :  { %1589 = vmatmul.mubr.bf16.vlgmr.msra.gmra.mrb[16].mxu1 %v1133_v34 }
 0x35a   :  { %v401_v41 = vpop.xlane.xlu0 %400 }
 0x35b   :  { %1665 = vrcp.f32 %v401_v41 }
 0x35c   :  { %v404_v43 = vpop.xlane.xlu1 %403 }
 0x35d   :  { %1667 = vrcp.f32 %v404_v43  ;;  %v1669_v43 = vld [vmem:[%s2115_s0] sm:$0x3] }
 0x365   :  { %v1666_v63 = vpop.eup %1665 }
 0x366   :  { %v406_v44 = vmul.f32 %v1666_v63, %v2032_v32 }
 0x367   :  { %v1668_v48 = vpop.eup %1667 }
 0x368   :  { %v409_v45 = vsel %vm385_vm3, %v406_v44, -inf  ;;  %v408_v46 = vmul.f32 %v1668_v48, %v2036_v33 }
 0x369   :  { %410 = vmax.xlane.f32.xlu0 %v409_v45  ;;  %v1670_v45 = vld [vmem:[%s2115_s0 + $0x2] sm:$0x3] }
 0x36a   :  { %v412_v31 = vsel %vm389_vm4, %v408_v46, -inf }
 0x36b   :  { %413 = vmax.xlane.f32.xlu1 %v412_v31  ;;  %v1671_v31 = vld [vmem:[%s2115_s0 + $0x4] sm:$0x3] }
 0x3f6   :  { %v411_v53 = vpop.xlane.xlu0 %410 }
 0x3f7   :  { %vm418_vm5 = vcmp.ge.f32.partialorder %v406_v44, %v411_v53 }
 0x3f8   :  { %v414_v54 = vpop.xlane.xlu1 %413  ;;  %v420_v55 = vsel %vm418_vm5, %v417_v51, 4.0 }
 0x3f9   :  { %v422_v56 = vsel %vm385_vm3, %v420_v55, inf  ;;  %vm419_vm6 = vcmp.ge.f32.partialorder %v408_v46, %v414_v54 }
 0x3fa   :  { %423 = vmin.xlane.f32.xlu0 %v422_v56  ;;  %v421_v32 = vsel %vm419_vm6, %v417_v51, 4.0 }
 0x3fb   :  { %v425_v57 = vsel %vm389_vm4, %v421_v32, inf }
 0x3fc   :  { %426 = vmin.xlane.f32.xlu1 %v425_v57 }
 0x419   :  { %v1034_v33 = vpop.f32.mrb[12].mxu0 }
 0x41a   :  { %v1562_v58 = vpop.f32.mrb[13].mxu0  ;;  %v1035_v10 = vadd.f32 %v1377_v4, %v1034_v33 }
 0x41b   :  { %v1037_v59 = vpop.f32.mrb[14].mxu0 }
 0x41c   :  { %v1563_v60 = vpop.f32.mrb[15].mxu0  ;;  %v1038_v23 = vadd.f32 %v1377_v4, %v1037_v59 }
 0x421   :  { %v1241_v61 = vpop.f32.mrb[16].mxu1 }
 0x422   :  { %v1590_v62 = vpop.f32.mrb[17].mxu1  ;;  %v1242_v14 = vadd.f32 %v1412_v6, %v1241_v61 }
 0x423   :  { %v1244_v0 = vpop.f32.mrb[18].mxu1 }
 0x424   :  { %v1591_v1 = vpop.f32.mrb[19].mxu1  ;;  %v1245_v29 = vadd.f32 %v1412_v6, %v1244_v0 }
 0x487   :  { %v424_v12 = vpop.xlane.xlu0 %423 }
 0x488   :  { %vm428_vm7 = vcmp.eq.f32.partialorder %v424_v12, 0.0  ;;  %vm631_vm8 = vcmp.eq.f32.partialorder %v424_v12, 1.0  ;;  %vm838_vm9 = vcmp.eq.f32.partialorder %v424_v12, 2.0  ;;  %vm1045_vm10 = vcmp.eq.f32.partialorder %v424_v12, 3.0 }
 0x489   :  { %v430_v15 = vsel %vm428_vm7, %v411_v53, 0.0  ;;  %v633_v16 = vsel %vm631_vm8, %v411_v53, 0.0  ;;  %v840_v40 = vsel %vm838_vm9, %v411_v53, 0.0  ;;  %v427_v52 = vpop.xlane.xlu1 %426  ;;  %v1047_v21 = vsel %vm1045_vm10, %v411_v53, 0.0  ;;  %v1673_v53 = vld [vmem:[%s2115_s0 + $0x6] sm:$0x3] }
 0x48a   :  { %v627_v17 = vmul.f32 %v621_v5, %v430_v15  ;;  %v834_v18 = vmul.f32 %v828_v8, %v633_v16  ;;  %v1041_v19 = vmul.f32 %v1035_v10, %v840_v40  ;;  %vm429_vm11 = vcmp.eq.f32.partialorder %v427_v52, 0.0 }
 0x48b   :  { %vm632_vm12 = vcmp.eq.f32.partialorder %v427_v52, 1.0  ;;  %vm839_vm13 = vcmp.eq.f32.partialorder %v427_v52, 2.0  ;;  %vm1046_vm14 = vcmp.eq.f32.partialorder %v427_v52, 3.0  ;;  %v431_v47 = vsel %vm429_vm11, %v414_v54, 0.0 }
 0x48c   :  { %v836_v42 = vadd.f32 %v834_v18, %v627_v17  ;;  %v634_v49 = vsel %vm632_vm12, %v414_v54, 0.0  ;;  %v841_v22 = vsel %vm839_vm13, %v414_v54, 0.0  ;;  %v628_v24 = vmul.f32 %v624_v7, %v431_v47 }
 0x48d   :  { %v835_v25 = vmul.f32 %v831_v9, %v634_v49  ;;  %v1248_v27 = vmul.f32 %v1242_v14, %v1047_v21  ;;  %v1048_v28 = vsel %vm1046_vm14, %v414_v54, 0.0  ;;  %v1042_v35 = vmul.f32 %v1038_v23, %v841_v22 }
 0x48e   :  { %v1043_v26 = vadd.f32 %v1041_v19, %v836_v42  ;;  %v1249_v37 = vmul.f32 %v1245_v29, %v1048_v28 }
 0x48f   :  { %v837_v30 = vadd.f32 %v835_v25, %v628_v24 }
 0x490   :  { %v1250_v13 = vadd.f32 %v1248_v27, %v1043_v26 }
 0x491   :  { %v1044_v36 = vadd.f32 %v1042_v35, %v837_v30 }
 0x492   :  { %v1254_v20 = vcombine.high %v1250_v13, %v1250_v13  ;;  %v1261_v38 = vrot.slane %v1250_v13, %v1744_v11 }
 0x493   :  { %v1251_v39 = vadd.f32 %v1249_v37, %v1044_v36 }
 0x494   :  { %v1268_v34 = vrot.slane %v1254_v20, %v1744_v11  ;;  %v1269_v41 = vcombine.high %v1261_v38, %v1261_v38  ;;  %v1283_v63 = vadd.f32 %v1669_v43, %v1261_v38 }
 0x495   :  { %v1277_v44 = vrot.slane %v1251_v39, %v1744_v11  ;;  %v1672_v11 = vld [vmem:[%s2115_s0 + $0x8] sm:$0x3] }
 0x496   :  { %v1270_v48 = vcombine.high %v1268_v34, %v1268_v34  ;;  %v1284_v46 = vadd.f32 %v1670_v45, %v1269_v41  ;;  %v1285_v50 = vadd.f32 %v1671_v31, %v1268_v34  ;;  %1288 = vst.msk [vmem:[%s2124_s9] sm:$0x3] %vm73_vm1, %v1283_v63 }
 0x497   :  { %v1287_v51 = vadd.f32 %v1672_v11, %v1277_v44 }
 0x498   :  { %v1286_v54 = vadd.f32 %v1673_v53, %v1270_v48  ;;  %1289 = vst.msk [vmem:[%s2124_s9 + $0x2] sm:$0x3] %vm73_vm1, %v1284_v46  ;;  %1290 = vst.msk [vmem:[%s2124_s9 + $0x4] sm:$0x3] %vm73_vm1, %v1285_v50 }
 0x499   :  { %1292 = vst.msk [vmem:[%s2124_s9 + $0x8] sm:$0x3] %vm73_vm1, %v1287_v51 }
 0x49a   :  { %1291 = vst.msk [vmem:[%s2124_s9 + $0x6] sm:$0x3] %vm73_vm1, %v1286_v54 }

// kernel: moevit_forward.7
= control target key start
LH: loop header
LB: loop body
LE: loop exit
PB: predicated region body
PF: predicated region fallthrough
CT: control target
= control target key end

     0   :  { %v54_v0 = vlaneseq  ;;  %v4817_v4 = vmov 1983009808   ;;  %vm75_vm0 = vcmask 261120   ;;  %vm79_vm1 = vcmask 254976   ;;  %s5529_s0 = inlined_call_operand.vmem [shape: f32[5,2,32], index: 0, kind: input, shape index: {}]   ;;  %s5530_s3 = inlined_call_operand.vmem [shape: bf16[4,32,8], index: 3, kind: input, shape index: {}]   ;;  %s5531_s5 = inlined_call_operand.vmem [shape: bf16[4,32,8], index: 5, kind: input, shape index: {}]   ;;  %s5532_s1 = inlined_call_operand.vmem [shape: f32[1,32], index: 1, kind: input, shape index: {}]   ;;  %s5533_s2 = inlined_call_operand.vmem [shape: f32[1,32], index: 2, kind: input, shape index: {}]   ;;  %s5534_s7 = inlined_call_operand.vmem [shape: bf16[4,32,8], index: 7, kind: input, shape index: {}]   ;;  %s5535_s6 = inlined_call_operand.vmem [shape: f32[4,1,8], index: 6, kind: input, shape index: {}]   ;;  %s5536_s4 = inlined_call_operand.vmem [shape: f32[4,1,8], index: 4, kind: input, shape index: {}]   ;;  %s5537_s8 = inlined_call_operand.vmem [shape: f32[4,1,8], index: 8, kind: input, shape index: {}]   ;;  %s5538_s9 = inlined_call_operand.vmem [shape: bf16[4,8,32], index: 9, kind: input, shape index: {}]   ;;  %s5539_s10 = inlined_call_operand.vmem [shape: f32[1,32], index: 10, kind: input, shape index: {}]   ;;  %s5540_s11 = inlined_call_operand.vmem [shape: f32[5,2,32], index: 11, kind: output, shape index: {}]  }
   0x1   :  { %v39_v1 = vld [vmem:[%s5529_s0] sm:$0x3]  ;;  %v40_v2 = vld [vmem:[%s5529_s0 + $0x2] sm:$0x3]  ;;  %v41_v3 = vld [vmem:[%s5529_s0 + $0x4] sm:$0x3]  ;;  %v52_v5 = vunpack.c.l.s4 %v4817_v4 }
   0x2   :  { %v42_v6 = vld [vmem:[%s5529_s0 + $0x6] sm:$0x3]  ;;  %v55_v7 = vshrl.u32 %v54_v0, 7  ;;  %v49_v8 = vcombine.low %v39_v1, %v40_v2  ;;  %v43_v12 = vld [vmem:[%s5529_s0 + $0x8] sm:$0x3]  ;;  %v4822_v63 = vmov 0.0  }
   0x3   :  { %v50_v9 = vcombine.low %v41_v3, %v42_v6  ;;  %v53_v10 = vunpack.c.0.s8 %v52_v5  ;;  %v4818_v20 = vmov 269488144   ;;  %v4819_v22 = vmov 842150450   ;;  %4325 = vmatprep.subr.bf16.mxu1 %v4822_v63  ;;  %v4704_v0 = vld [vmem:[%s5530_s3] sm:$0xff]   ;;  %4341 = vmatprep.subr.bf16.mxu0 %v4822_v63 }
   0x4   :  { %v89_v21 = vunpack.c.l.s4 %v4818_v20  ;;  %v96_v23 = vunpack.c.l.s4 %v4819_v22  ;;  %v4820_v24 = vmov 1414812756   ;;  %v4821_v26 = vmov 1987475062   ;;  %4326 = vmatpush3.bf16.msra.mxu1 %v4704_v0 }
   0x5   :  { %v4896_v11 = vsub.s32 %v53_v10, %v55_v7  ;;  %v103_v25 = vunpack.c.l.s4 %v4820_v24  ;;  %v110_v27 = vunpack.c.l.s4 %v4821_v26  ;;  %vm4823_vm2 = vmmov 0   ;;  %4327 = vmatprep.subr.bf16.mxu1 %v4822_v63 }
   0x6   :  { %v90_v28 = vunpack.c.0.s8 %v89_v21  ;;  %v97_v29 = vunpack.c.0.s8 %v96_v23  ;;  %4329 = vmatprep.mubr.msk.bf16.mxu1 %vm4823_vm2, %v4822_v63  ;;  %4345 = vmatprep.mubr.msk.bf16.mxu0 %vm4823_vm2, %v4822_v63  ;;  %vm626_vm3 = vcmask 64512   ;;  %vm932_vm4 = vcmask 1040384  }
   0x7   :  { %v57_v13 = vrot.slane %v49_v8, %v4896_v11  ;;  %v64_v14 = vrot.slane %v50_v9, %v4896_v11  ;;  %v72_v16 = vrot.slane %v43_v12, %v4896_v11  ;;  %v104_v30 = vunpack.c.0.s8 %v103_v25  ;;  %v4059_v9 = vld [vmem:[%s5533_s2] ss:$0 sm:$0xff] }
   0x8   :  { %v111_v31 = vunpack.c.0.s8 %v110_v27  ;;  %v4908_v32 = vsub.s32 %v90_v28, %v55_v7  ;;  %v4910_v33 = vsub.s32 %v97_v29, %v55_v7  ;;  %vm862_vm5 = vcmask 9216  }
   0x9   :  { %v65_v15 = vcombine.low %v57_v13, %v64_v14  ;;  %v80_v19 = vsel %vm79_vm1, %v72_v16, 0.0  ;;  %v4912_v34 = vsub.s32 %v104_v30, %v55_v7  ;;  %v266_v13 = vcombine.high %v4059_v9, %v4059_v9 }
   0xa   :  { %v4914_v35 = vsub.s32 %v111_v31, %v55_v7  ;;  %v4058_v7 = vld [vmem:[%s5532_s1] ss:$0 sm:$0xff]  ;;  %vm928_vm6 = vcmask 15360   ;;  %vm2061_vm7 = vcmask 1043456  }
   0xb   :  { %v76_v17 = vsel %vm75_vm0, %v65_v15, 0.0  ;;  %v4905_v18 = vpack.c.bf16 %v72_v16, %v65_v15  ;;  %v234_v10 = vcombine.high %v4058_v7, %v4058_v7  ;;  %v273_v15 = vrot.slane %v4059_v9, %v4896_v11 }
   0xc   :  { %77 = vadd.xlane.f32.xlu0 %v76_v17 }
   0xd   :  { %v248_v14 = vrot.slane %v234_v10, %v4896_v11  ;;  %v281_v25 = vcombine.high %v273_v15, %v273_v15 }
   0xf   :  { %v250_v24 = vcombine.high %v248_v14, %v248_v14 }
  0x10   :  { %81 = vadd.xlane.f32.xlu0 %v80_v19  ;;  %v280_v19 = vrot.slane %v266_v13, %v4896_v11 }
  0x12   :  { %v282_v31 = vcombine.high %v280_v19, %v280_v19 }
  0x99   :  { %v78_v36 = vpop.xlane.xlu0 %77 }
  0x9a   :  { %v84_v37 = vmul.f32 0.03125, %v78_v36 }
  0x9c   :  { %v94_v38 = vrot.slane %v84_v37, %v4908_v32  ;;  %v101_v39 = vrot.slane %v84_v37, %v4910_v33  ;;  %v108_v40 = vrot.slane %v84_v37, %v4912_v34  ;;  %v115_v41 = vrot.slane %v84_v37, %v4914_v35 }
  0x9d   :  { %v82_v42 = vpop.xlane.xlu0 %81 }
  0x9e   :  { %v85_v43 = vmul.f32 0.03125, %v82_v42  ;;  %v128_v44 = vsub.f32 %v39_v1, %v94_v38  ;;  %v129_v45 = vsub.f32 %v40_v2, %v101_v39  ;;  %v130_v46 = vsub.f32 %v41_v3, %v108_v40  ;;  %v4705_v1 = vld [vmem:[%s5530_s3 + $0x8] sm:$0xff]  }
  0x9f   :  { %v131_v47 = vsub.f32 %v42_v6, %v115_v41  ;;  %4328 = vmatpush3.bf16.msra.mxu1 %v4705_v1 }
  0xa0   :  { %v122_v48 = vrot.slane %v85_v43, %v4908_v32  ;;  %v133_v49 = vmul.f32 %v128_v44, %v128_v44  ;;  %v134_v50 = vmul.f32 %v129_v45, %v129_v45  ;;  %v135_v51 = vmul.f32 %v130_v46, %v130_v46  ;;  %4333 = vmatprep.subr.bf16.mxu1 %v4822_v63 }
  0xa1   :  { %v136_v52 = vmul.f32 %v131_v47, %v131_v47 }
  0xa2   :  { %v4921_v53 = vsub.f32 %v43_v12, %v122_v48  ;;  %v143_v54 = vcombine.low %v133_v49, %v134_v50  ;;  %v241_v12 = vrot.slane %v4058_v7, %v4896_v11  ;;  %v4706_v50 = vld [vmem:[%s5531_s5] sm:$0xff]  }
  0xa3   :  { %v144_v55 = vcombine.low %v135_v51, %v136_v52  ;;  %v4707_v52 = vld [vmem:[%s5531_s5 + $0x8] sm:$0xff]  }
  0xa4   :  { %v151_v56 = vrot.slane %v143_v54, %v4896_v11  ;;  %v137_v57 = vmul.f32 %v4921_v53, %v4921_v53  ;;  %v249_v17 = vcombine.high %v241_v12, %v241_v12  ;;  %v4709_v54 = vld [vmem:[%s5534_s7 + $0x8] sm:$0xff]  }
  0xa5   :  { %v158_v58 = vrot.slane %v144_v55, %v4896_v11 }
  0xa6   :  { %v166_v60 = vrot.slane %v137_v57, %v4896_v11 }
  0xa7   :  { %v159_v59 = vcombine.low %v151_v56, %v158_v58 }
  0xa8   :  { %v172_v62 = vsel %vm79_vm1, %v166_v60, 0.0  ;;  %v4060_v60 = vld [vmem:[%s5536_s4] ss:$0 sm:$0xff] }
  0xa9   :  { %v169_v61 = vsel %vm75_vm0, %v159_v59, 0.0  ;;  %v4064_v59 = vld [vmem:[%s5535_s6] ss:$0 sm:$0xff] }
  0xaa   :  { %170 = vadd.xlane.f32.xlu1 %v169_v61 }
  0xae   :  { %173 = vadd.xlane.f32.xlu1 %v172_v62 }
 0x137   :  { %v171_v2 = vpop.xlane.xlu1 %170 }
 0x138   :  { %v175_v3 = vmul.f32 0.03125, %v171_v2 }
 0x13a   :  { %v177_v4 = vadd.f32 1e-05, %v175_v3 }
 0x13b   :  { %v174_v5 = vpop.xlane.xlu1 %173 }
 0x13c   :  { %4728 = vrsqrt.f32 %v177_v4  ;;  %v176_v6 = vmul.f32 0.03125, %v174_v5 }
 0x13e   :  { %v178_v8 = vadd.f32 1e-05, %v176_v6 }
 0x140   :  { %4730 = vrsqrt.f32 %v178_v8 }
 0x146   :  { %v4729_v16 = vpop.eup %4728 }
 0x147   :  { %v189_v20 = vrot.slane %v4729_v16, %v4908_v32  ;;  %v196_v21 = vrot.slane %v4729_v16, %v4910_v33  ;;  %v203_v22 = vrot.slane %v4729_v16, %v4912_v34  ;;  %v210_v23 = vrot.slane %v4729_v16, %v4914_v35 }
 0x149   :  { %v223_v26 = vmul.f32 %v189_v20, %v128_v44  ;;  %v224_v27 = vmul.f32 %v196_v21, %v129_v45  ;;  %v225_v28 = vmul.f32 %v203_v22, %v130_v46  ;;  %v226_v29 = vmul.f32 %v210_v23, %v131_v47 }
 0x14a   :  { %v4731_v30 = vpop.eup %4730 }
 0x14b   :  { %v217_v36 = vrot.slane %v4731_v30, %v4908_v32  ;;  %v255_v37 = vmul.f32 %v241_v12, %v223_v26  ;;  %v256_v38 = vmul.f32 %v249_v17, %v224_v27  ;;  %v257_v39 = vmul.f32 %v248_v14, %v225_v28 }
 0x14c   :  { %v258_v40 = vmul.f32 %v250_v24, %v226_v29 }
 0x14d   :  { %v227_v33 = vmul.f32 %v217_v36, %v4921_v53  ;;  %v287_v41 = vadd.f32 %v273_v15, %v255_v37  ;;  %v288_v34 = vadd.f32 %v281_v25, %v256_v38  ;;  %v289_v42 = vadd.f32 %v280_v19, %v257_v39  ;;  %v4708_v53 = vld [vmem:[%s5534_s7] sm:$0xff]  }
 0x14e   :  { %v290_v35 = vadd.f32 %v282_v31, %v258_v40  ;;  %4342 = vmatpush3.bf16.msra.mxu0 %v4708_v53  ;;  %v4068_v39 = vld [vmem:[%s5537_s8] ss:$0 sm:$0xff] }
 0x14f   :  { %v259_v43 = vmul.f32 %v241_v12, %v227_v33  ;;  %v297_v48 = vcombine.low %v287_v41, %v288_v34  ;;  %4343 = vmatprep.subr.bf16.mxu0 %v4822_v63 }
 0x150   :  { %v298_v44 = vcombine.low %v289_v42, %v290_v35 }
 0x151   :  { %v291_v45 = vadd.f32 %v273_v15, %v259_v43  ;;  %v305_v46 = vrot.slane %v297_v48, %v4896_v11 }
 0x152   :  { %v312_v47 = vrot.slane %v298_v44, %v4896_v11  ;;  %4344 = vmatpush3.bf16.msra.mxu0 %v4709_v54 }
 0x153   :  { %v320_v32 = vrot.slane %v291_v45, %v4896_v11  ;;  %4355 = vmatprep.subr.bf16.mxu0 %v4822_v63 }
 0x154   :  { %v313_v49 = vcombine.low %v305_v46, %v312_v47 }
 0x155   :  { %4346 = vmatmul.mubr.msk.bf16.vlgmr.msra.gmra.mrb[0].mxu0 %vm75_vm0, %v4905_v18 }
 0x156   :  { %v4966_v51 = vpack.c.bf16 %v320_v32, %v313_v49  ;;  %4357 = vmatprep.mubr.msk.bf16.mxu0 %vm4823_vm2, %v4822_v63 }
 0x158   :  { %4330 = vmatmul.mubr.msk.bf16.vlgmr.msra.gmra.mrb[0].mxu1 %vm75_vm0, %v4966_v51 }
 0x159   :  { %4334 = vmatpush3.bf16.msra.mxu1 %v4706_v50  ;;  %4337 = vmatprep.mubr.msk.bf16.mxu1 %vm4823_vm2, %v4822_v63 }
 0x15a   :  { %4335 = vmatprep.subr.bf16.mxu1 %v4822_v63 }
 0x15d   :  { %4336 = vmatpush3.bf16.msra.mxu1 %v4707_v52 }
 0x15e   :  { %4349 = vmatprep.subr.bf16.mxu1 %v4822_v63 }
 0x160   :  { %4338 = vmatmul.mubr.msk.bf16.vlgmr.msra.gmra.mrb[4].mxu1 %vm75_vm0, %v4905_v18 }
 0x161   :  { %4351 = vmatprep.mubr.msk.bf16.mxu1 %vm4823_vm2, %v4822_v63 }
 0x228   :  { %v578_v40 = vpop.f32.mrb[0].mxu0 }
 0x229   :  { %v4347_v33 = vpop.f32.mrb[1].mxu0  ;;  %v5035_v35 = vadd.f32 %v4068_v39, %v578_v40 }
 0x22a   :  { %v581_v41 = vpop.f32.mrb[2].mxu0 }
 0x22b   :  { %v385_v55 = vpop.f32.mrb[0].mxu1  ;;  %v5033_v34 = vadd.f32 %v4068_v39, %v581_v41  ;;  %v4348_v42 = vpop.f32.mrb[3].mxu0  ;;  %v594_v43 = vrot.slane %v5035_v35, %v4896_v11 }
 0x22c   :  { %v4331_v56 = vpop.f32.mrb[1].mxu1  ;;  %v386_v2 = vadd.f32 %v4060_v60, %v385_v55 }
 0x22d   :  { %v388_v57 = vpop.f32.mrb[2].mxu1  ;;  %v602_v48 = vcombine.high %v594_v43, %v594_v43  ;;  %v923_v44 = vpack.c.bf16 %v594_v43, %v594_v43 }
 0x22e   :  { %v4332_v58 = vpop.f32.mrb[3].mxu1  ;;  %v401_v9 = vrot.slane %v386_v2, %v4896_v11  ;;  %v394_v15 = vcombine.high %v386_v2, %v386_v2  ;;  %v389_v30 = vadd.f32 %v4060_v60, %v388_v57 }
 0x22f   :  { %v924_v45 = vpack.c.bf16 %v602_v48, %v602_v48  ;;  %v934_v46 = vsel %vm932_vm4, %v923_v44, 0 }
 0x230   :  { %v409_v16 = vcombine.high %v401_v9, %v401_v9  ;;  %v616_v20 = vpack.c.bf16 %v401_v9, %v401_v9  ;;  %v408_v22 = vrot.slane %v394_v15, %v4896_v11  ;;  %v417_v37 = vrot.slane %v389_v30, %v4896_v11 }
 0x231   :  { %v980_v47 = vsel %vm932_vm4, %v924_v45, 0 }
 0x232   :  { %v617_v23 = vpack.c.bf16 %v409_v16, %v409_v16  ;;  %v410_v27 = vcombine.high %v408_v22, %v408_v22  ;;  %v618_v29 = vpack.c.bf16 %v408_v22, %v408_v22  ;;  %v620_v38 = vpack.c.bf16 %v417_v37, %v417_v37 }
 0x233   :  { %v483_v61 = vpop.f32.mrb[4].mxu1 }
 0x234   :  { %v484_v62 = vadd.f32 %v4064_v59, %v483_v61  ;;  %v4339_v0 = vpop.f32.mrb[5].mxu1  ;;  %v619_v31 = vpack.c.bf16 %v410_v27, %v410_v27 }
 0x235   :  { %v486_v1 = vpop.f32.mrb[6].mxu1 }
 0x236   :  { %v492_v3 = vcombine.high %v484_v62, %v484_v62  ;;  %v499_v4 = vrot.slane %v484_v62, %v4896_v11  ;;  %v4340_v5 = vpop.f32.mrb[7].mxu1  ;;  %v487_v17 = vadd.f32 %v4064_v59, %v486_v1 }
 0x238   :  { %v506_v6 = vrot.slane %v492_v3, %v4896_v11  ;;  %v507_v7 = vcombine.high %v499_v4, %v499_v4  ;;  %v621_v8 = vpack.c.bf16 %v499_v4, %v499_v4  ;;  %v515_v24 = vrot.slane %v487_v17, %v4896_v11 }
 0x23a   :  { %v622_v10 = vpack.c.bf16 %v507_v7, %v507_v7  ;;  %v631_v12 = vsel %vm626_vm3, %v621_v8, 0  ;;  %v508_v14 = vcombine.high %v506_v6, %v506_v6  ;;  %v623_v19 = vpack.c.bf16 %v506_v6, %v506_v6 }
 0x23b   :  { %4350 = vmatpush3.bf16.xpose.msra.mxu1 %v631_v12  ;;  %v625_v28 = vpack.c.bf16 %v515_v24, %v515_v24 }
 0x23c   :  { %v677_v13 = vsel %vm626_vm3, %v622_v10, 0  ;;  %4361 = vmatprep.subr.bf16.mxu1 %v4822_v63  ;;  %v624_v21 = vpack.c.bf16 %v508_v14, %v508_v14  ;;  %v723_v25 = vsel %vm626_vm3, %v623_v19, 0 }
 0x23d   :  { %4356 = vmatpush3.bf16.xpose.msra.mxu0 %v677_v13  ;;  %v815_v36 = vsel %vm626_vm3, %v625_v28, 0 }
 0x23e   :  { %4367 = vmatprep.subr.bf16.mxu0 %v4822_v63  ;;  %v769_v26 = vsel %vm626_vm3, %v624_v21, 0 }
 0x242   :  { %4352 = vmatmul.mubr.msk.bf16.vlgmr.msra.gmra.mrb[8].mxu1 %vm626_vm3, %v616_v20 }
 0x243   :  { %4362 = vmatpush3.bf16.xpose.msra.mxu1 %v723_v25  ;;  %4363 = vmatprep.mubr.msk.bf16.mxu1 %vm4823_vm2, %v4822_v63 }
 0x244   :  { %4358 = vmatmul.mubr.msk.bf16.vlgmr.msra.gmra.mrb[4].mxu0 %vm626_vm3, %v617_v23  ;;  %4373 = vmatprep.subr.bf16.mxu1 %v4822_v63 }
 0x245   :  { %4368 = vmatpush3.bf16.xpose.msra.mxu0 %v769_v26  ;;  %4369 = vmatprep.mubr.msk.bf16.mxu0 %vm4823_vm2, %v4822_v63 }
 0x246   :  { %4379 = vmatprep.subr.bf16.mxu0 %v4822_v63 }
 0x24a   :  { %4364 = vmatmul.mubr.msk.bf16.vlgmr.msra.gmra.mrb[12].mxu1 %vm626_vm3, %v618_v29 }
 0x24b   :  { %4374 = vmatpush3.bf16.xpose.msra.mxu1 %v815_v36  ;;  %4375 = vmatprep.mubr.msk.bf16.mxu1 %vm4823_vm2, %v4822_v63 }
 0x24c   :  { %4370 = vmatmul.mubr.msk.bf16.vlgmr.msra.gmra.mrb[8].mxu0 %vm626_vm3, %v619_v31  ;;  %4385 = vmatprep.subr.bf16.mxu1 %v4822_v63 }
 0x24d   :  { %4381 = vmatprep.mubr.msk.bf16.mxu0 %vm4823_vm2, %v4822_v63  ;;  %4380 = vmatpush3.bf16.msra.mxu0 %v934_v46  ;;  %v587_v46 = vcombine.high %v5035_v35, %v5035_v35 }
 0x24e   :  { %4391 = vmatprep.subr.bf16.mxu0 %v4822_v63 }
 0x252   :  { %4376 = vmatmul.mubr.msk.bf16.vlgmr.msra.gmra.mrb[16].mxu1 %vm626_vm3, %v620_v38 }
 0x253   :  { %4387 = vmatprep.mubr.msk.bf16.mxu1 %vm4823_vm2, %v4822_v63  ;;  %4386 = vmatpush3.bf16.msra.mxu1 %v980_v47 }
 0x254   :  { %4397 = vmatprep.subr.bf16.mxu1 %v4822_v63 }
 0x315   :  { %v667_v32 = vpop.f32.mrb[8].mxu1 }
 0x316   :  { %v857_v49 = vmul.f32 0.35355338, %v667_v32  ;;  %v4353_v50 = vpop.f32.mrb[9].mxu1  ;;  %v601_v32 = vrot.slane %v587_v46, %v4896_v11 }
 0x317   :  { %v670_v52 = vpop.f32.mrb[10].mxu1  ;;  %v713_v53 = vpop.f32.mrb[4].mxu0 }
 0x318   :  { %v858_v54 = vmul.f32 0.35355338, %v713_v53  ;;  %v4354_v55 = vpop.f32.mrb[11].mxu1  ;;  %v4359_v56 = vpop.f32.mrb[5].mxu0  ;;  %v863_v57 = vsel %vm862_vm5, %v857_v49, -inf }
 0x319   :  { %v716_v58 = vpop.f32.mrb[6].mxu0  ;;  %864 = vmax.xlane.f32.xlu0 %v863_v57  ;;  %v603_v55 = vcombine.high %v601_v32, %v601_v32 }
 0x31a   :  { %v4360_v59 = vpop.f32.mrb[7].mxu0  ;;  %v866_v60 = vsel %vm862_vm5, %v858_v54, -inf  ;;  %v610_v58 = vrot.slane %v5033_v34, %v4896_v11 }
 0x31d   :  { %867 = vmax.xlane.f32.xlu0 %v866_v60  ;;  %v759_v61 = vpop.f32.mrb[12].mxu1 }
 0x31e   :  { %v859_v62 = vmul.f32 0.35355338, %v759_v61  ;;  %v4365_v0 = vpop.f32.mrb[13].mxu1  ;;  %v926_v61 = vpack.c.bf16 %v603_v55, %v603_v55  ;;  %v4087_v55 = vld [vmem:[%s5536_s4 + $0x1] ss:$0 sm:$0xff] }
 0x31f   :  { %v762_v1 = vpop.f32.mrb[14].mxu1  ;;  %v805_v2 = vpop.f32.mrb[8].mxu0 }
 0x320   :  { %v860_v3 = vmul.f32 0.35355338, %v805_v2  ;;  %v4366_v4 = vpop.f32.mrb[15].mxu1  ;;  %v4371_v5 = vpop.f32.mrb[9].mxu0  ;;  %v869_v6 = vsel %vm862_vm5, %v859_v62, -inf  ;;  %v927_v1 = vpack.c.bf16 %v610_v58, %v610_v58  ;;  %v1072_v34 = vsel %vm932_vm4, %v926_v61, 0 }
 0x321   :  { %v808_v7 = vpop.f32.mrb[10].mxu0  ;;  %870 = vmax.xlane.f32.xlu1 %v869_v6 }
 0x322   :  { %v4372_v8 = vpop.f32.mrb[11].mxu0  ;;  %v872_v9 = vsel %vm862_vm5, %v860_v3, -inf  ;;  %v1118_v6 = vsel %vm932_vm4, %v927_v1, 0  ;;  %v4710_v7 = vld [vmem:[%s5530_s3 + $0x10] sm:$0xff]  }
 0x323   :  { %873 = vmax.xlane.f32.xlu0 %v872_v9 }
 0x325   :  { %v851_v10 = vpop.f32.mrb[16].mxu1 }
 0x326   :  { %v861_v12 = vmul.f32 0.35355338, %v851_v10  ;;  %v4377_v13 = vpop.f32.mrb[17].mxu1 }
 0x327   :  { %v854_v14 = vpop.f32.mrb[18].mxu1  ;;  %v4712_v13 = vld [vmem:[%s5531_s5 + $0x10] sm:$0xff]  }
 0x328   :  { %v4378_v15 = vpop.f32.mrb[19].mxu1  ;;  %v875_v16 = vsel %vm862_vm5, %v861_v12, -inf }
 0x329   :  { %876 = vmax.xlane.f32.xlu1 %v875_v16  ;;  %v4713_v15 = vld [vmem:[%s5531_s5 + $0x18] sm:$0xff]   ;;  %v4714_v16 = vld [vmem:[%s5534_s7 + $0x10] sm:$0xff]  }
 0x3a6   :  { %v865_v17 = vpop.xlane.xlu0 %864 }
 0x3a7   :  { %v878_v19 = vsub.f32 %v857_v49, %v865_v17  ;;  %v4715_v17 = vld [vmem:[%s5534_s7 + $0x18] sm:$0xff]  }
 0x3a9   :  { %v883_v20 = vmul.f32 1.442695, %v878_v19 }
 0x3aa   :  { %v868_v21 = vpop.xlane.xlu0 %867 }
 0x3ab   :  { %4732 = vpow2.f32 %v883_v20  ;;  %v879_v22 = vsub.f32 %v858_v54, %v868_v21  ;;  %v925_v54 = vpack.c.bf16 %v601_v32, %v601_v32 }
 0x3ad   :  { %v885_v23 = vmul.f32 1.442695, %v879_v22  ;;  %v1026_v60 = vsel %vm932_vm4, %v925_v54, 0 }
 0x3ae   :  { %v871_v24 = vpop.xlane.xlu1 %870 }
 0x3af   :  { %4734 = vpow2.f32 %v885_v23  ;;  %v880_v25 = vsub.f32 %v859_v62, %v871_v24 }
 0x3b0   :  { %v874_v26 = vpop.xlane.xlu0 %873 }
 0x3b1   :  { %v887_v27 = vmul.f32 1.442695, %v880_v25  ;;  %v881_v28 = vsub.f32 %v860_v3, %v874_v26 }
 0x3b3   :  { %4736 = vpow2.f32 %v887_v27  ;;  %v889_v29 = vmul.f32 1.442695, %v881_v28 }
 0x3b5   :  { %v4733_v30 = vpop.eup %4732  ;;  %4738 = vpow2.f32 %v889_v29 }
 0x3b6   :  { %v877_v31 = vpop.xlane.xlu1 %876  ;;  %v893_v36 = vsel %vm862_vm5, %v4733_v30, 0.0 }
 0x3b7   :  { %v882_v37 = vsub.f32 %v861_v12, %v877_v31  ;;  %894 = vadd.xlane.f32.xlu1 %v893_v36  ;;  %v4711_v12 = vld [vmem:[%s5530_s3 + $0x18] sm:$0xff]  }
 0x3b9   :  { %v4735_v38 = vpop.eup %4734  ;;  %v891_v39 = vmul.f32 1.442695, %v882_v37 }
 0x3ba   :  { %v896_v40 = vsel %vm862_vm5, %v4735_v38, 0.0 }
 0x3bb   :  { %4740 = vpow2.f32 %v891_v39  ;;  %897 = vadd.xlane.f32.xlu1 %v896_v40 }
 0x3bd   :  { %v4737_v33 = vpop.eup %4736 }
 0x3be   :  { %v899_v41 = vsel %vm862_vm5, %v4737_v33, 0.0 }
 0x3bf   :  { %v4739_v42 = vpop.eup %4738  ;;  %900 = vadd.xlane.f32.xlu0 %v899_v41 }
 0x3c0   :  { %v902_v43 = vsel %vm862_vm5, %v4739_v42, 0.0 }
 0x3c1   :  { %903 = vadd.xlane.f32.xlu1 %v902_v43 }
 0x3c5   :  { %v4741_v48 = vpop.eup %4740 }
 0x3c6   :  { %v905_v44 = vsel %vm862_vm5, %v4741_v48, 0.0 }
 0x3c7   :  { %906 = vadd.xlane.f32.xlu0 %v905_v44 }
 0x444   :  { %v895_v45 = vpop.xlane.xlu1 %894 }
 0x445   :  { %4742 = vrcp.f32 %v895_v45 }
 0x448   :  { %v898_v47 = vpop.xlane.xlu1 %897 }
 0x449   :  { %4744 = vrcp.f32 %v898_v47 }
 0x44c   :  { %v901_v49 = vpop.xlane.xlu0 %900 }
 0x44d   :  { %4746 = vrcp.f32 %v901_v49 }
 0x44e   :  { %v904_v50 = vpop.xlane.xlu1 %903 }
 0x44f   :  { %v4743_v52 = vpop.eup %4742  ;;  %4748 = vrcp.f32 %v904_v50 }
 0x450   :  { %v913_v53 = vmul.f32 %v4743_v52, %v4733_v30 }
 0x452   :  { %v918_v56 = vpack.c.bf16 %v913_v53, %v913_v53  ;;  %v4096_v53 = vld [vmem:[%s5535_s6 + $0x1] ss:$0 sm:$0xff] }
 0x453   :  { %v4745_v57 = vpop.eup %4744 }
 0x454   :  { %v914_v59 = vmul.f32 %v4745_v57, %v4735_v38  ;;  %v907_v35 = vpop.xlane.xlu0 %906  ;;  %4382 = vmatmul.mubr.msk.bf16.vlgmr.msra.gmra.mrb[12].mxu0 %vm928_vm6, %v918_v56 }
 0x455   :  { %4750 = vrcp.f32 %v907_v35  ;;  %4392 = vmatpush3.bf16.msra.mxu0 %v1026_v60  ;;  %4393 = vmatprep.mubr.msk.bf16.mxu0 %vm4823_vm2, %v4822_v63 }
 0x456   :  { %v919_v62 = vpack.c.bf16 %v914_v59, %v914_v59  ;;  %4403 = vmatprep.subr.bf16.mxu0 %v4822_v63 }
 0x457   :  { %v4747_v0 = vpop.eup %4746 }
 0x458   :  { %v915_v2 = vmul.f32 %v4747_v0, %v4737_v33  ;;  %4388 = vmatmul.mubr.msk.bf16.vlgmr.msra.gmra.mrb[20].mxu1 %vm928_vm6, %v919_v62 }
 0x459   :  { %v4749_v3 = vpop.eup %4748  ;;  %4398 = vmatpush3.bf16.msra.mxu1 %v1072_v34  ;;  %4399 = vmatprep.mubr.msk.bf16.mxu1 %vm4823_vm2, %v4822_v63 }
 0x45a   :  { %v916_v4 = vmul.f32 %v4749_v3, %v4739_v42  ;;  %v920_v5 = vpack.c.bf16 %v915_v2, %v915_v2  ;;  %4409 = vmatprep.subr.bf16.mxu1 %v4822_v63 }
 0x45c   :  { %4394 = vmatmul.mubr.msk.bf16.vlgmr.msra.gmra.mrb[16].mxu0 %vm928_vm6, %v920_v5  ;;  %v921_v8 = vpack.c.bf16 %v916_v4, %v916_v4 }
 0x45d   :  { %4404 = vmatpush3.bf16.msra.mxu0 %v1118_v6  ;;  %4405 = vmatprep.mubr.msk.bf16.mxu0 %vm4823_vm2, %v4822_v63 }
 0x45e   :  { %4417 = vmatprep.subr.bf16.mxu0 %v4822_v63 }
 0x45f   :  { %v4751_v9 = vpop.eup %4750 }
 0x460   :  { %v917_v10 = vmul.f32 %v4751_v9, %v4741_v48  ;;  %4400 = vmatmul.mubr.msk.bf16.vlgmr.msra.gmra.mrb[24].mxu1 %vm928_vm6, %v921_v8 }
 0x461   :  { %4410 = vmatpush3.bf16.msra.mxu1 %v4710_v7  ;;  %4413 = vmatprep.mubr.msk.bf16.mxu1 %vm4823_vm2, %v4822_v63 }
 0x462   :  { %v922_v14 = vpack.c.bf16 %v917_v10, %v917_v10  ;;  %4411 = vmatprep.subr.bf16.mxu1 %v4822_v63 }
 0x464   :  { %4406 = vmatmul.mubr.msk.bf16.vlgmr.msra.gmra.mrb[20].mxu0 %vm928_vm6, %v922_v14 }
 0x465   :  { %4412 = vmatpush3.bf16.msra.mxu1 %v4711_v12  ;;  %4418 = vmatpush3.bf16.msra.mxu0 %v4712_v13 }
 0x466   :  { %4419 = vmatprep.subr.bf16.mxu0 %v4822_v63  ;;  %4421 = vmatprep.mubr.msk.bf16.mxu0 %vm4823_vm2, %v4822_v63 }
 0x467   :  { %4425 = vmatprep.subr.bf16.mxu1 %v4822_v63 }
 0x468   :  { %4414 = vmatmul.mubr.msk.bf16.vlgmr.msra.gmra.mrb[28].mxu1 %vm75_vm0, %v4966_v51 }
 0x469   :  { %4420 = vmatpush3.bf16.msra.mxu0 %v4713_v15  ;;  %4429 = vmatprep.mubr.msk.bf16.mxu1 %vm4823_vm2, %v4822_v63 }
 0x46a   :  { %4433 = vmatprep.subr.bf16.mxu0 %v4822_v63  ;;  %4426 = vmatpush3.bf16.msra.mxu1 %v4714_v16 }
 0x46b   :  { %4427 = vmatprep.subr.bf16.mxu1 %v4822_v63 }
 0x46c   :  { %4422 = vmatmul.mubr.msk.bf16.vlgmr.msra.gmra.mrb[24].mxu0 %vm75_vm0, %v4905_v18 }
 0x46d   :  { %4435 = vmatprep.mubr.msk.bf16.mxu0 %vm4823_vm2, %v4822_v63 }
 0x46e   :  { %4428 = vmatpush3.bf16.msra.mxu1 %v4715_v17 }
 0x46f   :  { %4439 = vmatprep.subr.bf16.mxu1 %v4822_v63 }
 0x471   :  { %4430 = vmatmul.mubr.msk.bf16.vlgmr.msra.gmra.mrb[32].mxu1 %vm75_vm0, %v4905_v18 }
 0x472   :  { %4441 = vmatprep.mubr.msk.bf16.mxu1 %vm4823_vm2, %v4822_v63 }
 0x527   :  { %v970_v19 = vpop.f32.mrb[12].mxu0 }
 0x528   :  { %v4383_v20 = vpop.f32.mrb[13].mxu0 }
 0x529   :  { %v973_v21 = vpop.f32.mrb[14].mxu0 }
 0x52a   :  { %v4384_v22 = vpop.f32.mrb[15].mxu0 }
 0x52b   :  { %v1016_v23 = vpop.f32.mrb[20].mxu1 }
 0x52c   :  { %v1165_v24 = vcombine.low %v970_v19, %v1016_v23  ;;  %v4389_v25 = vpop.f32.mrb[21].mxu1 }
 0x52d   :  { %v1019_v26 = vpop.f32.mrb[22].mxu1 }
 0x52e   :  { %v4390_v27 = vpop.f32.mrb[23].mxu1  ;;  %v1173_v40 = vrot.slane %v1165_v24, %v4896_v11 }
 0x52f   :  { %v1062_v28 = vpop.f32.mrb[16].mxu0  ;;  %v4105_v27 = vld [vmem:[%s5537_s8 + $0x1] ss:$0 sm:$0xff] }
 0x530   :  { %v4395_v29 = vpop.f32.mrb[17].mxu0 }
 0x531   :  { %v1065_v30 = vpop.f32.mrb[18].mxu0 }
 0x532   :  { %v4396_v31 = vpop.f32.mrb[19].mxu0 }
 0x533   :  { %v1108_v36 = vpop.f32.mrb[24].mxu1 }
 0x534   :  { %v1166_v37 = vcombine.low %v1062_v28, %v1108_v36  ;;  %v4401_v38 = vpop.f32.mrb[25].mxu1 }
 0x535   :  { %v1111_v39 = vpop.f32.mrb[26].mxu1 }
 0x536   :  { %v1180_v33 = vrot.slane %v1166_v37, %v4896_v11  ;;  %v4402_v41 = vpop.f32.mrb[27].mxu1 }
 0x537   :  { %v1154_v42 = vpop.f32.mrb[20].mxu0 }
 0x538   :  { %v1181_v43 = vcombine.low %v1173_v40, %v1180_v33  ;;  %v1188_v48 = vrot.slane %v1154_v42, %v4896_v11  ;;  %v4407_v44 = vpop.f32.mrb[21].mxu0 }
 0x539   :  { %v1157_v45 = vpop.f32.mrb[22].mxu0 }
 0x53a   :  { %v5118_v46 = vpack.c.bf16 %v1188_v48, %v1181_v43  ;;  %v4408_v47 = vpop.f32.mrb[23].mxu0 }
 0x53b   :  { %v1252_v32 = vpop.f32.mrb[28].mxu1 }
 0x53c   :  { %v4415_v49 = vpop.f32.mrb[29].mxu1  ;;  %v1253_v35 = vadd.f32 %v4087_v55, %v1252_v32 }
 0x53d   :  { %v1255_v50 = vpop.f32.mrb[30].mxu1 }
 0x53e   :  { %v4416_v52 = vpop.f32.mrb[31].mxu1  ;;  %v1268_v2 = vrot.slane %v1253_v35, %v4896_v11  ;;  %v1261_v6 = vcombine.high %v1253_v35, %v1253_v35  ;;  %v1256_v22 = vadd.f32 %v4087_v55, %v1255_v50 }
 0x53f   :  { %v1349_v54 = vpop.f32.mrb[24].mxu0 }
 0x540   :  { %v4423_v56 = vpop.f32.mrb[25].mxu0  ;;  %v1350_v57 = vadd.f32 %v4096_v53, %v1349_v54  ;;  %v1276_v7 = vcombine.high %v1268_v2, %v1268_v2  ;;  %v1484_v10 = vpack.c.bf16 %v1268_v2, %v1268_v2  ;;  %v1275_v13 = vrot.slane %v1261_v6, %v4896_v11 }
 0x541   :  { %v1352_v58 = vpop.f32.mrb[26].mxu0  ;;  %v1284_v25 = vrot.slane %v1256_v22, %v4896_v11 }
 0x542   :  { %v4424_v59 = vpop.f32.mrb[27].mxu0  ;;  %v1358_v60 = vcombine.high %v1350_v57, %v1350_v57  ;;  %v1365_v61 = vrot.slane %v1350_v57, %v4896_v11  ;;  %v1353_v8 = vadd.f32 %v4096_v53, %v1352_v58  ;;  %v1485_v14 = vpack.c.bf16 %v1276_v7, %v1276_v7 }
 0x543   :  { %v1277_v19 = vcombine.high %v1275_v13, %v1275_v13  ;;  %v1486_v21 = vpack.c.bf16 %v1275_v13, %v1275_v13  ;;  %v1488_v26 = vpack.c.bf16 %v1284_v25, %v1284_v25 }
 0x544   :  { %v1372_v62 = vrot.slane %v1358_v60, %v4896_v11  ;;  %v1373_v0 = vcombine.high %v1365_v61, %v1365_v61  ;;  %v1489_v1 = vpack.c.bf16 %v1365_v61, %v1365_v61  ;;  %v1381_v15 = vrot.slane %v1353_v8, %v4896_v11  ;;  %v1446_v28 = vpop.f32.mrb[32].mxu1 }
 0x545   :  { %v1487_v23 = vpack.c.bf16 %v1277_v19, %v1277_v19  ;;  %v5160_v29 = vadd.f32 %v4105_v27, %v1446_v28  ;;  %v4431_v30 = vpop.f32.mrb[33].mxu1 }
 0x546   :  { %v1490_v34 = vpack.c.bf16 %v1373_v0, %v1373_v0  ;;  %v1498_v3 = vsel %vm626_vm3, %v1489_v1, 0  ;;  %v1374_v5 = vcombine.high %v1372_v62, %v1372_v62  ;;  %v1491_v9 = vpack.c.bf16 %v1372_v62, %v1372_v62  ;;  %v1449_v31 = vpop.f32.mrb[34].mxu1 }
 0x547   :  { %4434 = vmatpush3.bf16.xpose.msra.mxu0 %v1498_v3  ;;  %v1493_v20 = vpack.c.bf16 %v1381_v15, %v1381_v15  ;;  %v5162_v36 = vadd.f32 %v4105_v27, %v1449_v31  ;;  %v4432_v37 = vpop.f32.mrb[35].mxu1  ;;  %v1462_v38 = vrot.slane %v5160_v29, %v4896_v11 }
 0x548   :  { %v1544_v4 = vsel %vm626_vm3, %v1490_v34, 0  ;;  %4445 = vmatprep.subr.bf16.mxu0 %v4822_v63  ;;  %v1492_v12 = vpack.c.bf16 %v1374_v5, %v1374_v5  ;;  %v1590_v16 = vsel %vm626_vm3, %v1491_v9, 0 }
 0x549   :  { %4440 = vmatpush3.bf16.xpose.msra.mxu1 %v1544_v4  ;;  %v1682_v24 = vsel %vm626_vm3, %v1493_v20, 0  ;;  %v1470_v39 = vcombine.high %v1462_v38, %v1462_v38  ;;  %v1789_v40 = vpack.c.bf16 %v1462_v38, %v1462_v38 }
 0x54a   :  { %4451 = vmatprep.subr.bf16.mxu1 %v4822_v63  ;;  %v1636_v17 = vsel %vm626_vm3, %v1492_v12, 0 }
 0x54b   :  { %v1790_v33 = vpack.c.bf16 %v1470_v39, %v1470_v39  ;;  %v1798_v41 = vsel %vm932_vm4, %v1789_v40, 0 }
 0x54d   :  { %v1844_v42 = vsel %vm932_vm4, %v1790_v33, 0 }
 0x54e   :  { %4436 = vmatmul.mubr.msk.bf16.vlgmr.msra.gmra.mrb[28].mxu0 %vm626_vm3, %v1484_v10 }
 0x54f   :  { %4446 = vmatpush3.bf16.xpose.msra.mxu0 %v1590_v16  ;;  %4447 = vmatprep.mubr.msk.bf16.mxu0 %vm4823_vm2, %v4822_v63 }
 0x550   :  { %4442 = vmatmul.mubr.msk.bf16.vlgmr.msra.gmra.mrb[36].mxu1 %vm626_vm3, %v1485_v14  ;;  %4457 = vmatprep.subr.bf16.mxu0 %v4822_v63 }
 0x551   :  { %4452 = vmatpush3.bf16.xpose.msra.mxu1 %v1636_v17  ;;  %4453 = vmatprep.mubr.msk.bf16.mxu1 %vm4823_vm2, %v4822_v63 }
 0x552   :  { %4463 = vmatprep.subr.bf16.mxu1 %v4822_v63 }
 0x556   :  { %4448 = vmatmul.mubr.msk.bf16.vlgmr.msra.gmra.mrb[32].mxu0 %vm626_vm3, %v1486_v21 }
 0x557   :  { %4458 = vmatpush3.bf16.xpose.msra.mxu0 %v1682_v24  ;;  %4459 = vmatprep.mubr.msk.bf16.mxu0 %vm4823_vm2, %v4822_v63 }
 0x558   :  { %4454 = vmatmul.mubr.msk.bf16.vlgmr.msra.gmra.mrb[40].mxu1 %vm626_vm3, %v1487_v23  ;;  %4469 = vmatprep.subr.bf16.mxu0 %v4822_v63 }
 0x559   :  { %4465 = vmatprep.mubr.msk.bf16.mxu1 %vm4823_vm2, %v4822_v63  ;;  %4464 = vmatpush3.bf16.msra.mxu1 %v1798_v41 }
 0x55a   :  { %4475 = vmatprep.subr.bf16.mxu1 %v4822_v63 }
 0x55e   :  { %4460 = vmatmul.mubr.msk.bf16.vlgmr.msra.gmra.mrb[36].mxu0 %vm626_vm3, %v1488_v26 }
 0x55f   :  { %4471 = vmatprep.mubr.msk.bf16.mxu0 %vm4823_vm2, %v4822_v63  ;;  %4470 = vmatpush3.bf16.msra.mxu0 %v1844_v42  ;;  %v1455_v42 = vcombine.high %v5160_v29, %v5160_v29 }
 0x560   :  { %4481 = vmatprep.subr.bf16.mxu0 %v4822_v63 }
 0x621   :  { %v1534_v43 = vpop.f32.mrb[28].mxu0 }
 0x622   :  { %v1724_v48 = vmul.f32 0.35355338, %v1534_v43  ;;  %v4437_v44 = vpop.f32.mrb[29].mxu0 }
 0x623   :  { %v1537_v45 = vpop.f32.mrb[30].mxu0  ;;  %v1580_v47 = vpop.f32.mrb[36].mxu1 }
 0x624   :  { %v1725_v32 = vmul.f32 0.35355338, %v1580_v47  ;;  %v4438_v49 = vpop.f32.mrb[31].mxu0  ;;  %v4443_v50 = vpop.f32.mrb[37].mxu1  ;;  %v1729_v52 = vsel %vm862_vm5, %v1724_v48, -inf }
 0x625   :  { %1730 = vmax.xlane.f32.xlu0 %v1729_v52  ;;  %v1583_v53 = vpop.f32.mrb[38].mxu1 }
 0x626   :  { %v4444_v54 = vpop.f32.mrb[39].mxu1  ;;  %v1732_v55 = vsel %vm862_vm5, %v1725_v32, -inf }
 0x627   :  { %1733 = vmax.xlane.f32.xlu1 %v1732_v55 }
 0x629   :  { %v1626_v56 = vpop.f32.mrb[32].mxu0 }
 0x62a   :  { %v1726_v57 = vmul.f32 0.35355338, %v1626_v56  ;;  %v4449_v58 = vpop.f32.mrb[33].mxu0  ;;  %v1478_v56 = vrot.slane %v5162_v36, %v4896_v11 }
 0x62b   :  { %v1629_v59 = vpop.f32.mrb[34].mxu0  ;;  %v1672_v35 = vpop.f32.mrb[40].mxu1 }
 0x62c   :  { %v1727_v60 = vmul.f32 0.35355338, %v1672_v35  ;;  %v4450_v61 = vpop.f32.mrb[35].mxu0  ;;  %v4455_v62 = vpop.f32.mrb[41].mxu1  ;;  %v1735_v0 = vsel %vm862_vm5, %v1726_v57, -inf  ;;  %v1793_v36 = vpack.c.bf16 %v1478_v56, %v1478_v56 }
 0x62d   :  { %1736 = vmax.xlane.f32.xlu0 %v1735_v0  ;;  %v1675_v1 = vpop.f32.mrb[42].mxu1 }
 0x62e   :  { %v4456_v2 = vpop.f32.mrb[43].mxu1  ;;  %v1738_v34 = vsel %vm862_vm5, %v1727_v60, -inf  ;;  %v1982_v1 = vsel %vm932_vm4, %v1793_v36, 0 }
 0x62f   :  { %1739 = vmax.xlane.f32.xlu1 %v1738_v34 }
 0x631   :  { %v1718_v3 = vpop.f32.mrb[36].mxu0 }
 0x632   :  { %v1728_v4 = vmul.f32 0.35355338, %v1718_v3  ;;  %v4461_v5 = vpop.f32.mrb[37].mxu0 }
 0x633   :  { %v1721_v6 = vpop.f32.mrb[38].mxu0 }
 0x634   :  { %v4462_v7 = vpop.f32.mrb[39].mxu0  ;;  %v1741_v8 = vsel %vm862_vm5, %v1728_v4, -inf  ;;  %v4717_v6 = vld [vmem:[%s5530_s3 + $0x28] sm:$0xff]  }
 0x635   :  { %1742 = vmax.xlane.f32.xlu0 %v1741_v8  ;;  %v4718_v7 = vld [vmem:[%s5531_s5 + $0x20] sm:$0xff]   ;;  %v4719_v8 = vld [vmem:[%s5531_s5 + $0x28] sm:$0xff]  }
 0x6b2   :  { %v1731_v9 = vpop.xlane.xlu0 %1730 }
 0x6b3   :  { %v1744_v10 = vsub.f32 %v1724_v48, %v1731_v9  ;;  %v1469_v48 = vrot.slane %v1455_v42, %v4896_v11  ;;  %v4119_v9 = vld [vmem:[%s5538_s9 + $0x4] sm:$0xf] }
 0x6b4   :  { %v1734_v12 = vpop.xlane.xlu1 %1733 }
 0x6b5   :  { %v1749_v13 = vmul.f32 1.442695, %v1744_v10  ;;  %v1745_v14 = vsub.f32 %v1725_v32, %v1734_v12  ;;  %v1471_v47 = vcombine.high %v1469_v48, %v1469_v48  ;;  %v1791_v50 = vpack.c.bf16 %v1469_v48, %v1469_v48 }
 0x6b6   :  { %v2063_v10 = vsel %vm2061_vm7, %v4119_v9, 0 }
 0x6b7   :  { %4752 = vpow2.f32 %v1749_v13  ;;  %v1751_v15 = vmul.f32 1.442695, %v1745_v14  ;;  %v1792_v55 = vpack.c.bf16 %v1471_v47, %v1471_v47  ;;  %v1890_v29 = vsel %vm932_vm4, %v1791_v50, 0 }
 0x6b9   :  { %4754 = vpow2.f32 %v1751_v15  ;;  %v1936_v59 = vsel %vm932_vm4, %v1792_v55, 0 }
 0x6ba   :  { %v1737_v16 = vpop.xlane.xlu0 %1736 }
 0x6bb   :  { %v1746_v17 = vsub.f32 %v1726_v57, %v1737_v16 }
 0x6bc   :  { %v1740_v19 = vpop.xlane.xlu1 %1739 }
 0x6bd   :  { %v1753_v20 = vmul.f32 1.442695, %v1746_v17  ;;  %v1747_v21 = vsub.f32 %v1727_v60, %v1740_v19 }
 0x6bf   :  { %4756 = vpow2.f32 %v1753_v20  ;;  %v1755_v22 = vmul.f32 1.442695, %v1747_v21 }
 0x6c1   :  { %v4753_v23 = vpop.eup %4752  ;;  %4758 = vpow2.f32 %v1755_v22 }
 0x6c2   :  { %v1743_v24 = vpop.xlane.xlu0 %1742  ;;  %v1759_v25 = vsel %vm862_vm5, %v4753_v23, 0.0 }
 0x6c3   :  { %v4755_v26 = vpop.eup %4754  ;;  %v1748_v27 = vsub.f32 %v1728_v4, %v1743_v24  ;;  %1760 = vadd.xlane.f32.xlu1 %v1759_v25  ;;  %v4716_v4 = vld [vmem:[%s5530_s3 + $0x20] sm:$0xff]  }
 0x6c4   :  { %v1762_v28 = vsel %vm862_vm5, %v4755_v26, 0.0 }
 0x6c5   :  { %v1757_v30 = vmul.f32 1.442695, %v1748_v27  ;;  %1763 = vadd.xlane.f32.xlu0 %v1762_v28 }
 0x6c7   :  { %4760 = vpow2.f32 %v1757_v30 }
 0x6c9   :  { %v4757_v31 = vpop.eup %4756 }
 0x6ca   :  { %v1765_v37 = vsel %vm862_vm5, %v4757_v31, 0.0 }
 0x6cb   :  { %v4759_v38 = vpop.eup %4758  ;;  %1766 = vadd.xlane.f32.xlu1 %v1765_v37 }
 0x6cc   :  { %v1768_v39 = vsel %vm862_vm5, %v4759_v38, 0.0 }
 0x6cd   :  { %1769 = vadd.xlane.f32.xlu0 %v1768_v39 }
 0x6d1   :  { %v4761_v40 = vpop.eup %4760 }
 0x6d2   :  { %v1771_v33 = vsel %vm862_vm5, %v4761_v40, 0.0 }
 0x6d3   :  { %1772 = vadd.xlane.f32.xlu1 %v1771_v33  ;;  %v1192_v33 = vld [vmem:[%s5538_s9] sm:$0xf] }
 0x750   :  { %v1761_v41 = vpop.xlane.xlu1 %1760 }
 0x751   :  { %4762 = vrcp.f32 %v1761_v41 }
 0x752   :  { %v1764_v43 = vpop.xlane.xlu0 %1763 }
 0x753   :  { %4764 = vrcp.f32 %v1764_v43 }
 0x758   :  { %v1767_v44 = vpop.xlane.xlu1 %1766 }
 0x759   :  { %4766 = vrcp.f32 %v1767_v44 }
 0x75a   :  { %v1770_v45 = vpop.xlane.xlu0 %1769 }
 0x75b   :  { %v4763_v32 = vpop.eup %4762  ;;  %4768 = vrcp.f32 %v1770_v45  ;;  %v2110_v45 = vsel %vm2061_vm7, %v1192_v33, 0 }
 0x75c   :  { %v1779_v49 = vmul.f32 %v4763_v32, %v4753_v23 }
 0x75d   :  { %v4765_v52 = vpop.eup %4764 }
 0x75e   :  { %v1780_v53 = vmul.f32 %v4765_v52, %v4755_v26  ;;  %v1784_v54 = vpack.c.bf16 %v1779_v49, %v1779_v49  ;;  %v4136_v52 = vld [vmem:[%s5535_s6 + $0x2] ss:$0 sm:$0xff] }
 0x760   :  { %4466 = vmatmul.mubr.msk.bf16.vlgmr.msra.gmra.mrb[44].mxu1 %vm928_vm6, %v1784_v54  ;;  %v1773_v57 = vpop.xlane.xlu1 %1772  ;;  %v1785_v58 = vpack.c.bf16 %v1780_v53, %v1780_v53  ;;  %v4720_v53 = vld [vmem:[%s5534_s7 + $0x20] sm:$0xff]  }
 0x761   :  { %4476 = vmatpush3.bf16.msra.mxu1 %v1890_v29  ;;  %4770 = vrcp.f32 %v1773_v57  ;;  %4477 = vmatprep.mubr.msk.bf16.mxu1 %vm4823_vm2, %v4822_v63  ;;  %v4127_v29 = vld [vmem:[%s5536_s4 + $0x2] ss:$0 sm:$0xff] }
 0x762   :  { %4472 = vmatmul.mubr.msk.bf16.vlgmr.msra.gmra.mrb[40].mxu0 %vm928_vm6, %v1785_v58  ;;  %4487 = vmatprep.subr.bf16.mxu1 %v4822_v63  ;;  %v4721_v58 = vld [vmem:[%s5534_s7 + $0x28] sm:$0xff]  }
 0x763   :  { %v4767_v35 = vpop.eup %4766  ;;  %4482 = vmatpush3.bf16.msra.mxu0 %v1936_v59  ;;  %4483 = vmatprep.mubr.msk.bf16.mxu0 %vm4823_vm2, %v4822_v63 }
 0x764   :  { %v1781_v60 = vmul.f32 %v4767_v35, %v4757_v31  ;;  %4493 = vmatprep.subr.bf16.mxu0 %v4822_v63 }
 0x765   :  { %v4769_v61 = vpop.eup %4768 }
 0x766   :  { %v1782_v62 = vmul.f32 %v4769_v61, %v4759_v38  ;;  %v1786_v0 = vpack.c.bf16 %v1781_v60, %v1781_v60 }
 0x768   :  { %4478 = vmatmul.mubr.msk.bf16.vlgmr.msra.gmra.mrb[48].mxu1 %vm928_vm6, %v1786_v0  ;;  %v1787_v2 = vpack.c.bf16 %v1782_v62, %v1782_v62 }
 0x769   :  { %4488 = vmatpush3.bf16.msra.mxu1 %v1982_v1  ;;  %4489 = vmatprep.mubr.msk.bf16.mxu1 %vm4823_vm2, %v4822_v63 }
 0x76a   :  { %4484 = vmatmul.mubr.msk.bf16.vlgmr.msra.gmra.mrb[44].mxu0 %vm928_vm6, %v1787_v2  ;;  %4505 = vmatprep.subr.bf16.mxu1 %v4822_v63 }
 0x76b   :  { %v4771_v34 = vpop.eup %4770  ;;  %4495 = vmatprep.mubr.msk.bf16.mxu0 %vm4823_vm2, %v4822_v63  ;;  %4494 = vmatpush3.bf16.msra.mxu0 %v2063_v10 }
 0x76c   :  { %v1783_v3 = vmul.f32 %v4771_v34, %v4761_v40  ;;  %4499 = vmatprep.subr.bf16.mxu0 %v4822_v63 }
 0x76e   :  { %v1788_v5 = vpack.c.bf16 %v1783_v3, %v1783_v3 }
 0x770   :  { %4490 = vmatmul.mubr.msk.bf16.vlgmr.msra.gmra.mrb[52].mxu1 %vm928_vm6, %v1788_v5 }
 0x771   :  { %4506 = vmatpush3.bf16.msra.mxu1 %v4716_v4  ;;  %4509 = vmatprep.mubr.msk.bf16.mxu1 %vm4823_vm2, %v4822_v63 }
 0x772   :  { %4507 = vmatprep.subr.bf16.mxu1 %v4822_v63 }
 0x775   :  { %4508 = vmatpush3.bf16.msra.mxu1 %v4717_v6 }
 0x776   :  { %4513 = vmatprep.subr.bf16.mxu1 %v4822_v63 }
 0x778   :  { %4510 = vmatmul.mubr.msk.bf16.vlgmr.msra.gmra.mrb[56].mxu1 %vm75_vm0, %v4966_v51 }
 0x779   :  { %4514 = vmatpush3.bf16.msra.mxu1 %v4718_v7  ;;  %4517 = vmatprep.mubr.msk.bf16.mxu1 %vm4823_vm2, %v4822_v63 }
 0x77a   :  { %4515 = vmatprep.subr.bf16.mxu1 %v4822_v63 }
 0x77d   :  { %4516 = vmatpush3.bf16.msra.mxu1 %v4719_v8 }
 0x77e   :  { %4529 = vmatprep.subr.bf16.mxu1 %v4822_v63 }
 0x780   :  { %4518 = vmatmul.mubr.msk.bf16.vlgmr.msra.gmra.mrb[60].mxu1 %vm75_vm0, %v4905_v18 }
 0x781   :  { %4531 = vmatprep.mubr.msk.bf16.mxu1 %vm4823_vm2, %v4822_v63 }
 0x833   :  { %v1834_v12 = vpop.f32.mrb[44].mxu1 }
 0x834   :  { %v4467_v13 = vpop.f32.mrb[45].mxu1 }
 0x835   :  { %v1837_v14 = vpop.f32.mrb[46].mxu1  ;;  %v1880_v15 = vpop.f32.mrb[40].mxu0 }
 0x836   :  { %v2029_v16 = vcombine.low %v1834_v12, %v1880_v15  ;;  %v4468_v17 = vpop.f32.mrb[47].mxu1  ;;  %v4473_v19 = vpop.f32.mrb[41].mxu0 }
 0x837   :  { %v1883_v20 = vpop.f32.mrb[42].mxu0 }
 0x838   :  { %v4474_v21 = vpop.f32.mrb[43].mxu0  ;;  %v2037_v31 = vrot.slane %v2029_v16, %v4896_v11 }
 0x83b   :  { %v1926_v22 = vpop.f32.mrb[48].mxu1 }
 0x83c   :  { %v4479_v23 = vpop.f32.mrb[49].mxu1 }
 0x83d   :  { %v1929_v24 = vpop.f32.mrb[50].mxu1  ;;  %v1972_v25 = vpop.f32.mrb[44].mxu0 }
 0x83e   :  { %v2030_v26 = vcombine.low %v1926_v22, %v1972_v25  ;;  %v4480_v27 = vpop.f32.mrb[51].mxu1  ;;  %v4485_v28 = vpop.f32.mrb[45].mxu0  ;;  %v4145_v25 = vld [vmem:[%s5537_s8 + $0x2] ss:$0 sm:$0xff] }
 0x83f   :  { %v1975_v30 = vpop.f32.mrb[46].mxu0 }
 0x840   :  { %v2044_v37 = vrot.slane %v2030_v26, %v4896_v11  ;;  %v4486_v38 = vpop.f32.mrb[47].mxu0 }
 0x842   :  { %v2045_v39 = vcombine.low %v2037_v31, %v2044_v37 }
 0x843   :  { %v2018_v40 = vpop.f32.mrb[52].mxu1 }
 0x844   :  { %v2052_v41 = vrot.slane %v2018_v40, %v4896_v11  ;;  %v4491_v42 = vpop.f32.mrb[53].mxu1 }
 0x845   :  { %v2021_v43 = vpop.f32.mrb[54].mxu1 }
 0x846   :  { %v2055_v48 = vpack.c.bf16 %v2052_v41, %v2045_v39  ;;  %v4492_v44 = vpop.f32.mrb[55].mxu1 }
 0x848   :  { %4496 = vmatmul.mubr.msk.bf16.vlgmr.msra.gmra.mrb[48].mxu0 %vm626_vm3, %v2055_v48 }
 0x849   :  { %4500 = vmatpush3.bf16.msra.mxu0 %v2110_v45  ;;  %4501 = vmatprep.mubr.msk.bf16.mxu0 %vm4823_vm2, %v4822_v63 }
 0x84a   :  { %4521 = vmatprep.subr.bf16.mxu0 %v4822_v63 }
 0x84b   :  { %v2212_v47 = vpop.f32.mrb[56].mxu1 }
 0x84c   :  { %v4511_v32 = vpop.f32.mrb[57].mxu1 }
 0x84d   :  { %v2215_v49 = vpop.f32.mrb[58].mxu1 }
 0x84e   :  { %v4512_v50 = vpop.f32.mrb[59].mxu1  ;;  %v2216_v17 = vadd.f32 %v4127_v29, %v2215_v49 }
 0x850   :  { %v2244_v22 = vrot.slane %v2216_v17, %v4896_v11 }
 0x852   :  { %v2448_v24 = vpack.c.bf16 %v2244_v22, %v2244_v22 }
 0x853   :  { %v2309_v54 = vpop.f32.mrb[60].mxu1 }
 0x854   :  { %v2310_v55 = vadd.f32 %v4136_v52, %v2309_v54  ;;  %4502 = vmatmul.mubr.msk.bf16.vlgmr.msra.gmra.mrb[48].mxu0 %vm626_vm3, %v5118_v46  ;;  %v4519_v56 = vpop.f32.mrb[61].mxu1  ;;  %v2213_v46 = vadd.f32 %v4127_v29, %v2212_v47 }
 0x855   :  { %4522 = vmatpush3.bf16.msra.mxu0 %v4720_v53  ;;  %v2312_v57 = vpop.f32.mrb[62].mxu1  ;;  %4525 = vmatprep.mubr.msk.bf16.mxu0 %vm4823_vm2, %v4822_v63 }
 0x856   :  { %v2318_v59 = vcombine.high %v2310_v55, %v2310_v55  ;;  %v2325_v35 = vrot.slane %v2310_v55, %v4896_v11  ;;  %v4520_v36 = vpop.f32.mrb[63].mxu1  ;;  %4523 = vmatprep.subr.bf16.mxu0 %v4822_v63  ;;  %v2228_v2 = vrot.slane %v2213_v46, %v4896_v11  ;;  %v2313_v34 = vadd.f32 %v4136_v52, %v2312_v57 }
 0x857   :  { %v2221_v5 = vcombine.high %v2213_v46, %v2213_v46 }
 0x858   :  { %v2333_v60 = vcombine.high %v2325_v35, %v2325_v35  ;;  %v2449_v61 = vpack.c.bf16 %v2325_v35, %v2325_v35  ;;  %v2332_v62 = vrot.slane %v2318_v59, %v4896_v11  ;;  %v2444_v6 = vpack.c.bf16 %v2228_v2, %v2228_v2 }
 0x859   :  { %4524 = vmatpush3.bf16.msra.mxu0 %v4721_v58  ;;  %v2341_v8 = vrot.slane %v2313_v34, %v4896_v11  ;;  %v2236_v10 = vcombine.high %v2228_v2, %v2228_v2  ;;  %v2235_v12 = vrot.slane %v2221_v5, %v4896_v11 }
 0x85a   :  { %v2458_v0 = vsel %vm626_vm3, %v2449_v61, 0  ;;  %4535 = vmatprep.subr.bf16.mxu0 %v4822_v63  ;;  %v2450_v1 = vpack.c.bf16 %v2333_v60, %v2333_v60  ;;  %v2451_v3 = vpack.c.bf16 %v2332_v62, %v2332_v62  ;;  %v2334_v7 = vcombine.high %v2332_v62, %v2332_v62 }
 0x85b   :  { %4530 = vmatpush3.bf16.xpose.msra.mxu1 %v2458_v0  ;;  %v2453_v14 = vpack.c.bf16 %v2341_v8, %v2341_v8  ;;  %v2445_v15 = vpack.c.bf16 %v2236_v10, %v2236_v10  ;;  %v2446_v16 = vpack.c.bf16 %v2235_v12, %v2235_v12  ;;  %v2237_v21 = vcombine.high %v2235_v12, %v2235_v12 }
 0x85c   :  { %4526 = vmatmul.mubr.msk.bf16.vlgmr.msra.gmra.mrb[52].mxu0 %vm75_vm0, %v4905_v18  ;;  %4541 = vmatprep.subr.bf16.mxu1 %v4822_v63  ;;  %v2504_v4 = vsel %vm626_vm3, %v2450_v1, 0  ;;  %v2550_v9 = vsel %vm626_vm3, %v2451_v3, 0  ;;  %v2452_v13 = vpack.c.bf16 %v2334_v7, %v2334_v7 }
 0x85d   :  { %4537 = vmatprep.mubr.msk.bf16.mxu0 %vm4823_vm2, %v4822_v63  ;;  %v2642_v20 = vsel %vm626_vm3, %v2453_v14, 0  ;;  %v2447_v23 = vpack.c.bf16 %v2237_v21, %v2237_v21 }
 0x85e   :  { %v2596_v19 = vsel %vm626_vm3, %v2452_v13, 0 }
 0x862   :  { %4536 = vmatpush3.bf16.xpose.msra.mxu0 %v2504_v4  ;;  %4532 = vmatmul.mubr.msk.bf16.vlgmr.msra.gmra.mrb[64].mxu1 %vm626_vm3, %v2444_v6 }
 0x863   :  { %4542 = vmatpush3.bf16.xpose.msra.mxu1 %v2550_v9  ;;  %4547 = vmatprep.subr.bf16.mxu0 %v4822_v63 }
 0x864   :  { %4543 = vmatprep.mubr.msk.bf16.mxu1 %vm4823_vm2, %v4822_v63  ;;  %4553 = vmatprep.subr.bf16.mxu1 %v4822_v63 }
 0x869   :  { %4538 = vmatmul.mubr.msk.bf16.vlgmr.msra.gmra.mrb[56].mxu0 %vm626_vm3, %v2445_v15 }
 0x86a   :  { %4548 = vmatpush3.bf16.xpose.msra.mxu0 %v2596_v19  ;;  %4544 = vmatmul.mubr.msk.bf16.vlgmr.msra.gmra.mrb[68].mxu1 %vm626_vm3, %v2446_v16 }
 0x86b   :  { %4554 = vmatpush3.bf16.xpose.msra.mxu1 %v2642_v20  ;;  %4549 = vmatprep.mubr.msk.bf16.mxu0 %vm4823_vm2, %v4822_v63 }
 0x86c   :  { %4555 = vmatprep.mubr.msk.bf16.mxu1 %vm4823_vm2, %v4822_v63  ;;  %4559 = vmatprep.subr.bf16.mxu0 %v4822_v63 }
 0x86d   :  { %4565 = vmatprep.subr.bf16.mxu1 %v4822_v63 }
 0x871   :  { %4550 = vmatmul.mubr.msk.bf16.vlgmr.msra.gmra.mrb[60].mxu0 %vm626_vm3, %v2447_v23 }
 0x872   :  { %4556 = vmatmul.mubr.msk.bf16.vlgmr.msra.gmra.mrb[72].mxu1 %vm626_vm3, %v2448_v24  ;;  %4561 = vmatprep.mubr.msk.bf16.mxu0 %vm4823_vm2, %v4822_v63 }
 0x873   :  { %4567 = vmatprep.mubr.msk.bf16.mxu1 %vm4823_vm2, %v4822_v63 }
 0x92f   :  { %v2406_v26 = vpop.f32.mrb[52].mxu0 }
 0x930   :  { %v5302_v27 = vadd.f32 %v4145_v25, %v2406_v26  ;;  %v4527_v28 = vpop.f32.mrb[53].mxu0 }
 0x931   :  { %v2409_v30 = vpop.f32.mrb[54].mxu0 }
 0x932   :  { %v2422_v31 = vrot.slane %v5302_v27, %v4896_v11  ;;  %v5306_v37 = vadd.f32 %v4145_v25, %v2409_v30  ;;  %v4528_v38 = vpop.f32.mrb[55].mxu0 }
 0x934   :  { %v2430_v39 = vcombine.high %v2422_v31, %v2422_v31  ;;  %v2749_v40 = vpack.c.bf16 %v2422_v31, %v2422_v31 }
 0x935   :  { %v2494_v33 = vpop.f32.mrb[64].mxu1 }
 0x936   :  { %v2750_v41 = vpack.c.bf16 %v2430_v39, %v2430_v39  ;;  %v2684_v42 = vmul.f32 0.35355338, %v2494_v33  ;;  %v4533_v43 = vpop.f32.mrb[65].mxu1  ;;  %v2758_v48 = vsel %vm932_vm4, %v2749_v40, 0 }
 0x937   :  { %v2497_v44 = vpop.f32.mrb[66].mxu1  ;;  %4560 = vmatpush3.bf16.msra.mxu0 %v2758_v48 }
 0x938   :  { %v4534_v45 = vpop.f32.mrb[67].mxu1  ;;  %v2689_v47 = vsel %vm862_vm5, %v2684_v42, -inf  ;;  %v2804_v32 = vsel %vm932_vm4, %v2750_v41, 0  ;;  %4571 = vmatprep.subr.bf16.mxu0 %v4822_v63  ;;  %v2415_v41 = vcombine.high %v5302_v27, %v5302_v27 }
 0x939   :  { %2690 = vmax.xlane.f32.xlu1 %v2689_v47  ;;  %4566 = vmatpush3.bf16.msra.mxu1 %v2804_v32 }
 0x93a   :  { %4577 = vmatprep.subr.bf16.mxu1 %v4822_v63  ;;  %v2429_v43 = vrot.slane %v2415_v41, %v4896_v11 }
 0x93c   :  { %v2540_v49 = vpop.f32.mrb[56].mxu0  ;;  %v2751_v47 = vpack.c.bf16 %v2429_v43, %v2429_v43 }
 0x93d   :  { %v2685_v50 = vmul.f32 0.35355338, %v2540_v49  ;;  %v4539_v52 = vpop.f32.mrb[57].mxu0  ;;  %v2586_v53 = vpop.f32.mrb[68].mxu1 }
 0x93e   :  { %v2543_v54 = vpop.f32.mrb[58].mxu0  ;;  %v2686_v55 = vmul.f32 0.35355338, %v2586_v53  ;;  %v4545_v56 = vpop.f32.mrb[69].mxu1  ;;  %v2438_v52 = vrot.slane %v5306_v37, %v4896_v11  ;;  %v2850_v27 = vsel %vm932_vm4, %v2751_v47, 0 }
 0x93f   :  { %v4540_v29 = vpop.f32.mrb[59].mxu0  ;;  %v2692_v57 = vsel %vm862_vm5, %v2685_v50, -inf  ;;  %v2589_v58 = vpop.f32.mrb[70].mxu1 }
 0x940   :  { %2693 = vmax.xlane.f32.xlu0 %v2692_v57  ;;  %v4546_v59 = vpop.f32.mrb[71].mxu1  ;;  %v2695_v35 = vsel %vm862_vm5, %v2686_v55, -inf  ;;  %v2753_v57 = vpack.c.bf16 %v2438_v52, %v2438_v52 }
 0x941   :  { %2696 = vmax.xlane.f32.xlu1 %v2695_v35 }
 0x944   :  { %v2632_v36 = vpop.f32.mrb[60].mxu0 }
 0x945   :  { %v2687_v46 = vmul.f32 0.35355338, %v2632_v36  ;;  %v4551_v60 = vpop.f32.mrb[61].mxu0  ;;  %v2678_v61 = vpop.f32.mrb[72].mxu1  ;;  %v2942_v36 = vsel %vm932_vm4, %v2753_v57, 0 }
 0x946   :  { %v2635_v62 = vpop.f32.mrb[62].mxu0  ;;  %v4557_v0 = vpop.f32.mrb[73].mxu1  ;;  %v2688_v1 = vmul.f32 0.35355338, %v2678_v61  ;;  %v4722_v61 = vld [vmem:[%s5530_s3 + $0x30] sm:$0xff]  }
 0x947   :  { %v4552_v2 = vpop.f32.mrb[63].mxu0  ;;  %v2698_v34 = vsel %vm862_vm5, %v2687_v46, -inf  ;;  %v2681_v3 = vpop.f32.mrb[74].mxu1 }
 0x948   :  { %2699 = vmax.xlane.f32.xlu0 %v2698_v34  ;;  %v4558_v4 = vpop.f32.mrb[75].mxu1  ;;  %v2701_v5 = vsel %vm862_vm5, %v2688_v1, -inf  ;;  %v4723_v2 = vld [vmem:[%s5530_s3 + $0x38] sm:$0xff]   ;;  %v4724_v3 = vld [vmem:[%s5531_s5 + $0x30] sm:$0xff]  }
 0x949   :  { %v4725_v4 = vld [vmem:[%s5531_s5 + $0x38] sm:$0xff]  }
 0x94c   :  { %2702 = vmax.xlane.f32.xlu0 %v2701_v5 }
 0x9c6   :  { %v2691_v6 = vpop.xlane.xlu1 %2690 }
 0x9c7   :  { %v2704_v7 = vsub.f32 %v2684_v42, %v2691_v6 }
 0x9c9   :  { %v2709_v8 = vmul.f32 1.442695, %v2704_v7 }
 0x9cb   :  { %4772 = vpow2.f32 %v2709_v8 }
 0x9cd   :  { %v2694_v9 = vpop.xlane.xlu0 %2693 }
 0x9ce   :  { %v2705_v10 = vsub.f32 %v2685_v50, %v2694_v9  ;;  %v2697_v12 = vpop.xlane.xlu1 %2696  ;;  %v2431_v50 = vcombine.high %v2429_v43, %v2429_v43 }
 0x9cf   :  { %v2706_v13 = vsub.f32 %v2686_v55, %v2697_v12 }
 0x9d0   :  { %v2711_v14 = vmul.f32 1.442695, %v2705_v10  ;;  %v2752_v29 = vpack.c.bf16 %v2431_v50, %v2431_v50 }
 0x9d1   :  { %v2713_v15 = vmul.f32 1.442695, %v2706_v13 }
 0x9d2   :  { %4774 = vpow2.f32 %v2711_v14  ;;  %v2896_v35 = vsel %vm932_vm4, %v2752_v29, 0 }
 0x9d3   :  { %4776 = vpow2.f32 %v2713_v15 }
 0x9d5   :  { %v4773_v16 = vpop.eup %4772  ;;  %v2700_v17 = vpop.xlane.xlu0 %2699 }
 0x9d6   :  { %v2707_v19 = vsub.f32 %v2687_v46, %v2700_v17  ;;  %v2719_v20 = vsel %vm862_vm5, %v4773_v16, 0.0 }
 0x9d7   :  { %2720 = vadd.xlane.f32.xlu0 %v2719_v20 }
 0x9d8   :  { %v2715_v21 = vmul.f32 1.442695, %v2707_v19 }
 0x9d9   :  { %v2703_v22 = vpop.xlane.xlu0 %2702 }
 0x9da   :  { %4778 = vpow2.f32 %v2715_v21  ;;  %v2708_v23 = vsub.f32 %v2688_v1, %v2703_v22 }
 0x9dc   :  { %v4775_v24 = vpop.eup %4774  ;;  %v2717_v25 = vmul.f32 1.442695, %v2708_v23 }
 0x9dd   :  { %v4777_v26 = vpop.eup %4776  ;;  %v2722_v28 = vsel %vm862_vm5, %v4775_v24, 0.0 }
 0x9de   :  { %4780 = vpow2.f32 %v2717_v25  ;;  %2723 = vadd.xlane.f32.xlu1 %v2722_v28  ;;  %v2725_v30 = vsel %vm862_vm5, %v4777_v26, 0.0 }
 0x9df   :  { %2726 = vadd.xlane.f32.xlu0 %v2725_v30 }
 0x9e4   :  { %v4779_v31 = vpop.eup %4778 }
 0x9e5   :  { %v2728_v38 = vsel %vm862_vm5, %v4779_v31, 0.0 }
 0x9e6   :  { %2729 = vadd.xlane.f32.xlu1 %v2728_v38 }
 0x9e8   :  { %v4781_v39 = vpop.eup %4780 }
 0x9e9   :  { %v2731_v40 = vsel %vm862_vm5, %v4781_v39, 0.0 }
 0x9ea   :  { %2732 = vadd.xlane.f32.xlu1 %v2731_v40 }
 0xa64   :  { %v2721_v33 = vpop.xlane.xlu0 %2720 }
 0xa65   :  { %4782 = vrcp.f32 %v2721_v33  ;;  %v4726_v33 = vld [vmem:[%s5534_s7 + $0x30] sm:$0xff]  }
 0xa6b   :  { %v2724_v42 = vpop.xlane.xlu1 %2723 }
 0xa6c   :  { %4784 = vrcp.f32 %v2724_v42  ;;  %v2727_v48 = vpop.xlane.xlu0 %2726 }
 0xa6d   :  { %4786 = vrcp.f32 %v2727_v48 }
 0xa6f   :  { %v4783_v44 = vpop.eup %4782 }
 0xa70   :  { %v2739_v45 = vmul.f32 %v4783_v44, %v4773_v16 }
 0xa72   :  { %v2744_v32 = vpack.c.bf16 %v2739_v45, %v2739_v45  ;;  %v4727_v45 = vld [vmem:[%s5534_s7 + $0x38] sm:$0xff]  }
 0xa73   :  { %v2730_v49 = vpop.xlane.xlu1 %2729 }
 0xa74   :  { %4788 = vrcp.f32 %v2730_v49  ;;  %4562 = vmatmul.mubr.msk.bf16.vlgmr.msra.gmra.mrb[64].mxu0 %vm928_vm6, %v2744_v32  ;;  %v4175_v32 = vld [vmem:[%s5535_s6 + $0x3] ss:$0 sm:$0xff] }
 0xa75   :  { %4572 = vmatpush3.bf16.msra.mxu0 %v2850_v27  ;;  %4573 = vmatprep.mubr.msk.bf16.mxu0 %vm4823_vm2, %v4822_v63  ;;  %v4166_v49 = vld [vmem:[%s5536_s4 + $0x3] ss:$0 sm:$0xff] }
 0xa76   :  { %v4785_v53 = vpop.eup %4784  ;;  %4583 = vmatprep.subr.bf16.mxu0 %v4822_v63 }
 0xa77   :  { %v4787_v54 = vpop.eup %4786  ;;  %v2740_v55 = vmul.f32 %v4785_v53, %v4775_v24  ;;  %v2733_v56 = vpop.xlane.xlu1 %2732 }
 0xa78   :  { %v2741_v58 = vmul.f32 %v4787_v54, %v4777_v26  ;;  %4790 = vrcp.f32 %v2733_v56 }
 0xa79   :  { %v2745_v37 = vpack.c.bf16 %v2740_v55, %v2740_v55 }
 0xa7a   :  { %v2746_v59 = vpack.c.bf16 %v2741_v58, %v2741_v58 }
 0xa7b   :  { %4568 = vmatmul.mubr.msk.bf16.vlgmr.msra.gmra.mrb[76].mxu1 %vm928_vm6, %v2745_v37 }
 0xa7c   :  { %4578 = vmatpush3.bf16.msra.mxu1 %v2896_v35  ;;  %4574 = vmatmul.mubr.msk.bf16.vlgmr.msra.gmra.mrb[68].mxu0 %vm928_vm6, %v2746_v59 }
 0xa7d   :  { %4584 = vmatpush3.bf16.msra.mxu0 %v2942_v36  ;;  %4579 = vmatprep.mubr.msk.bf16.mxu1 %vm4823_vm2, %v4822_v63 }
 0xa7e   :  { %v4789_v46 = vpop.eup %4788  ;;  %4595 = vmatprep.subr.bf16.mxu1 %v4822_v63  ;;  %4585 = vmatprep.mubr.msk.bf16.mxu0 %vm4823_vm2, %v4822_v63 }
 0xa7f   :  { %v2742_v60 = vmul.f32 %v4789_v46, %v4779_v31  ;;  %4589 = vmatprep.subr.bf16.mxu0 %v4822_v63 }
 0xa81   :  { %v2747_v62 = vpack.c.bf16 %v2742_v60, %v2742_v60 }
 0xa82   :  { %v4791_v0 = vpop.eup %4790 }
 0xa83   :  { %v2743_v1 = vmul.f32 %v4791_v0, %v4781_v39  ;;  %4580 = vmatmul.mubr.msk.bf16.vlgmr.msra.gmra.mrb[80].mxu1 %vm928_vm6, %v2747_v62 }
 0xa84   :  { %4596 = vmatpush3.bf16.msra.mxu1 %v4722_v61  ;;  %4599 = vmatprep.mubr.msk.bf16.mxu1 %vm4823_vm2, %v4822_v63 }
 0xa85   :  { %v2748_v34 = vpack.c.bf16 %v2743_v1, %v2743_v1  ;;  %4597 = vmatprep.subr.bf16.mxu1 %v4822_v63 }
 0xa87   :  { %4586 = vmatmul.mubr.msk.bf16.vlgmr.msra.gmra.mrb[72].mxu0 %vm928_vm6, %v2748_v34 }
 0xa88   :  { %4598 = vmatpush3.bf16.msra.mxu1 %v4723_v2  ;;  %4591 = vmatprep.mubr.msk.bf16.mxu0 %vm4823_vm2, %v4822_v63 }
 0xa89   :  { %4603 = vmatprep.subr.bf16.mxu1 %v4822_v63 }
 0xa8b   :  { %4600 = vmatmul.mubr.msk.bf16.vlgmr.msra.gmra.mrb[84].mxu1 %vm75_vm0, %v4966_v51  ;;  %v4159_v51 = vld [vmem:[%s5538_s9 + $0x8] sm:$0xf] }
 0xa8c   :  { %4604 = vmatpush3.bf16.msra.mxu1 %v4724_v3  ;;  %4607 = vmatprep.mubr.msk.bf16.mxu1 %vm4823_vm2, %v4822_v63  ;;  %v3022_v5 = vsel %vm2061_vm7, %v4159_v51, 0 }
 0xa8d   :  { %4605 = vmatprep.subr.bf16.mxu1 %v4822_v63  ;;  %4590 = vmatpush3.bf16.msra.mxu0 %v3022_v5 }
 0xa8e   :  { %4611 = vmatprep.subr.bf16.mxu0 %v4822_v63 }
 0xa90   :  { %4606 = vmatpush3.bf16.msra.mxu1 %v4725_v4 }
 0xa91   :  { %4619 = vmatprep.subr.bf16.mxu1 %v4822_v63 }
 0xa93   :  { %4608 = vmatmul.mubr.msk.bf16.vlgmr.msra.gmra.mrb[88].mxu1 %vm75_vm0, %v4905_v18 }
 0xa94   :  { %4621 = vmatprep.mubr.msk.bf16.mxu1 %vm4823_vm2, %v4822_v63 }
 0xb47   :  { %v2794_v6 = vpop.f32.mrb[64].mxu0 }
 0xb48   :  { %v4563_v7 = vpop.f32.mrb[65].mxu0 }
 0xb49   :  { %v2797_v8 = vpop.f32.mrb[66].mxu0 }
 0xb4a   :  { %v4564_v9 = vpop.f32.mrb[67].mxu0 }
 0xb4e   :  { %v2840_v10 = vpop.f32.mrb[76].mxu1 }
 0xb4f   :  { %v2989_v12 = vcombine.low %v2794_v6, %v2840_v10  ;;  %v4569_v13 = vpop.f32.mrb[77].mxu1  ;;  %v2886_v14 = vpop.f32.mrb[68].mxu0 }
 0xb50   :  { %v2843_v15 = vpop.f32.mrb[78].mxu1  ;;  %v4575_v16 = vpop.f32.mrb[69].mxu0 }
 0xb51   :  { %v4570_v17 = vpop.f32.mrb[79].mxu1  ;;  %v2889_v19 = vpop.f32.mrb[70].mxu0  ;;  %v2997_v25 = vrot.slane %v2989_v12, %v4896_v11  ;;  %v4184_v15 = vld [vmem:[%s5537_s8 + $0x3] ss:$0 sm:$0xff] }
 0xb52   :  { %v4576_v20 = vpop.f32.mrb[71].mxu0 }
 0xb56   :  { %v2932_v21 = vpop.f32.mrb[80].mxu1 }
 0xb57   :  { %v2990_v22 = vcombine.low %v2886_v14, %v2932_v21  ;;  %v4581_v23 = vpop.f32.mrb[81].mxu1 }
 0xb58   :  { %v2935_v24 = vpop.f32.mrb[82].mxu1 }
 0xb59   :  { %v3004_v26 = vrot.slane %v2990_v22, %v4896_v11  ;;  %v4582_v28 = vpop.f32.mrb[83].mxu1 }
 0xb5a   :  { %v2978_v30 = vpop.f32.mrb[72].mxu0 }
 0xb5b   :  { %v3005_v31 = vcombine.low %v2997_v25, %v3004_v26  ;;  %v3012_v38 = vrot.slane %v2978_v30, %v4896_v11  ;;  %v4587_v39 = vpop.f32.mrb[73].mxu0 }
 0xb5c   :  { %v2981_v40 = vpop.f32.mrb[74].mxu0 }
 0xb5d   :  { %v3015_v41 = vpack.c.bf16 %v3012_v38, %v3005_v31  ;;  %v4588_v42 = vpop.f32.mrb[75].mxu0 }
 0xb5e   :  { %v3126_v43 = vpop.f32.mrb[84].mxu1 }
 0xb5f   :  { %4592 = vmatmul.mubr.msk.bf16.vlgmr.msra.gmra.mrb[48].mxu0 %vm626_vm3, %v3015_v41  ;;  %v4601_v48 = vpop.f32.mrb[85].mxu1  ;;  %v3127_v54 = vadd.f32 %v4166_v49, %v3126_v43 }
 0xb60   :  { %v3129_v44 = vpop.f32.mrb[86].mxu1  ;;  %4612 = vmatpush3.bf16.msra.mxu0 %v4726_v33  ;;  %4615 = vmatprep.mubr.msk.bf16.mxu0 %vm4823_vm2, %v4822_v63 }
 0xb61   :  { %v4602_v47 = vpop.f32.mrb[87].mxu1  ;;  %4613 = vmatprep.subr.bf16.mxu0 %v4822_v63  ;;  %v3142_v59 = vrot.slane %v3127_v54, %v4896_v11  ;;  %v3135_v60 = vcombine.high %v3127_v54, %v3127_v54  ;;  %v3130_v9 = vadd.f32 %v4166_v49, %v3129_v44 }
 0xb63   :  { %v3150_v61 = vcombine.high %v3142_v59, %v3142_v59  ;;  %v3358_v1 = vpack.c.bf16 %v3142_v59, %v3142_v59  ;;  %v3149_v34 = vrot.slane %v3135_v60, %v4896_v11  ;;  %v3158_v13 = vrot.slane %v3130_v9, %v4896_v11 }
 0xb64   :  { %4614 = vmatpush3.bf16.msra.mxu0 %v4727_v45 }
 0xb65   :  { %4625 = vmatprep.subr.bf16.mxu0 %v4822_v63  ;;  %v3359_v3 = vpack.c.bf16 %v3150_v61, %v3150_v61  ;;  %v3151_v6 = vcombine.high %v3149_v34, %v3149_v34  ;;  %v3360_v8 = vpack.c.bf16 %v3149_v34, %v3149_v34  ;;  %v3362_v14 = vpack.c.bf16 %v3158_v13, %v3158_v13 }
 0xb66   :  { %v3223_v50 = vpop.f32.mrb[88].mxu1 }
 0xb67   :  { %v3224_v52 = vadd.f32 %v4175_v32, %v3223_v50  ;;  %v4609_v27 = vpop.f32.mrb[89].mxu1  ;;  %4616 = vmatmul.mubr.msk.bf16.vlgmr.msra.gmra.mrb[76].mxu0 %vm75_vm0, %v4905_v18  ;;  %v3361_v10 = vpack.c.bf16 %v3151_v6, %v3151_v6 }
 0xb68   :  { %v3226_v53 = vpop.f32.mrb[90].mxu1  ;;  %4627 = vmatprep.mubr.msk.bf16.mxu0 %vm4823_vm2, %v4822_v63 }
 0xb69   :  { %v3232_v55 = vcombine.high %v3224_v52, %v3224_v52  ;;  %v3239_v56 = vrot.slane %v3224_v52, %v4896_v11  ;;  %v4610_v29 = vpop.f32.mrb[91].mxu1  ;;  %v3227_v62 = vadd.f32 %v4175_v32, %v3226_v53 }
 0xb6b   :  { %v3246_v57 = vrot.slane %v3232_v55, %v4896_v11  ;;  %v3247_v58 = vcombine.high %v3239_v56, %v3239_v56  ;;  %v3363_v37 = vpack.c.bf16 %v3239_v56, %v3239_v56  ;;  %v3255_v4 = vrot.slane %v3227_v62, %v4896_v11 }
 0xb6d   :  { %v3364_v35 = vpack.c.bf16 %v3247_v58, %v3247_v58  ;;  %v3372_v36 = vsel %vm626_vm3, %v3363_v37, 0  ;;  %v3248_v46 = vcombine.high %v3246_v57, %v3246_v57  ;;  %v3365_v0 = vpack.c.bf16 %v3246_v57, %v3246_v57 }
 0xb6e   :  { %4620 = vmatpush3.bf16.xpose.msra.mxu1 %v3372_v36  ;;  %v3367_v7 = vpack.c.bf16 %v3255_v4, %v3255_v4 }
 0xb6f   :  { %v3418_v18 = vsel %vm626_vm3, %v3364_v35, 0  ;;  %4631 = vmatprep.subr.bf16.mxu1 %v4822_v63  ;;  %v3366_v2 = vpack.c.bf16 %v3248_v46, %v3248_v46  ;;  %v3464_v51 = vsel %vm626_vm3, %v3365_v0, 0 }
 0xb70   :  { %4626 = vmatpush3.bf16.xpose.msra.mxu0 %v3418_v18  ;;  %v3556_v12 = vsel %vm626_vm3, %v3367_v7, 0 }
 0xb71   :  { %4637 = vmatprep.subr.bf16.mxu0 %v4822_v63  ;;  %v3510_v5 = vsel %vm626_vm3, %v3366_v2, 0 }
 0xb75   :  { %4622 = vmatmul.mubr.msk.bf16.vlgmr.msra.gmra.mrb[92].mxu1 %vm626_vm3, %v3358_v1 }
 0xb76   :  { %4632 = vmatpush3.bf16.xpose.msra.mxu1 %v3464_v51  ;;  %4633 = vmatprep.mubr.msk.bf16.mxu1 %vm4823_vm2, %v4822_v63 }
 0xb77   :  { %4628 = vmatmul.mubr.msk.bf16.vlgmr.msra.gmra.mrb[80].mxu0 %vm626_vm3, %v3359_v3  ;;  %4643 = vmatprep.subr.bf16.mxu1 %v4822_v63 }
 0xb78   :  { %4638 = vmatpush3.bf16.xpose.msra.mxu0 %v3510_v5  ;;  %4639 = vmatprep.mubr.msk.bf16.mxu0 %vm4823_vm2, %v4822_v63 }
 0xb79   :  { %4649 = vmatprep.subr.bf16.mxu0 %v4822_v63 }
 0xb7d   :  { %4634 = vmatmul.mubr.msk.bf16.vlgmr.msra.gmra.mrb[96].mxu1 %vm626_vm3, %v3360_v8 }
 0xb7e   :  { %4644 = vmatpush3.bf16.xpose.msra.mxu1 %v3556_v12  ;;  %4645 = vmatprep.mubr.msk.bf16.mxu1 %vm4823_vm2, %v4822_v63 }
 0xb7f   :  { %4640 = vmatmul.mubr.msk.bf16.vlgmr.msra.gmra.mrb[84].mxu0 %vm626_vm3, %v3361_v10  ;;  %4655 = vmatprep.subr.bf16.mxu1 %v4822_v63 }
 0xb80   :  { %4651 = vmatprep.mubr.msk.bf16.mxu0 %vm4823_vm2, %v4822_v63 }
 0xb85   :  { %4646 = vmatmul.mubr.msk.bf16.vlgmr.msra.gmra.mrb[100].mxu1 %vm626_vm3, %v3362_v14 }
 0xb86   :  { %4657 = vmatprep.mubr.msk.bf16.mxu1 %vm4823_vm2, %v4822_v63 }
 0xc3a   :  { %v3320_v16 = vpop.f32.mrb[76].mxu0 }
 0xc3b   :  { %v5435_v17 = vadd.f32 %v4184_v15, %v3320_v16  ;;  %v4617_v19 = vpop.f32.mrb[77].mxu0 }
 0xc3c   :  { %v3323_v20 = vpop.f32.mrb[78].mxu0 }
 0xc3d   :  { %v3336_v21 = vrot.slane %v5435_v17, %v4896_v11  ;;  %v5439_v22 = vadd.f32 %v4184_v15, %v3323_v20  ;;  %v4618_v23 = vpop.f32.mrb[79].mxu0 }
 0xc3f   :  { %v3344_v24 = vcombine.high %v3336_v21, %v3336_v21  ;;  %v3663_v25 = vpack.c.bf16 %v3336_v21, %v3336_v21 }
 0xc41   :  { %v3664_v26 = vpack.c.bf16 %v3344_v24, %v3344_v24  ;;  %v3672_v28 = vsel %vm932_vm4, %v3663_v25, 0  ;;  %v3329_v25 = vcombine.high %v5435_v17, %v5435_v17 }
 0xc42   :  { %4650 = vmatpush3.bf16.msra.mxu0 %v3672_v28 }
 0xc43   :  { %v3718_v30 = vsel %vm932_vm4, %v3664_v26, 0  ;;  %4661 = vmatprep.subr.bf16.mxu0 %v4822_v63  ;;  %v3343_v28 = vrot.slane %v3329_v25, %v4896_v11 }
 0xc44   :  { %4656 = vmatpush3.bf16.msra.mxu1 %v3718_v30 }
 0xc45   :  { %4667 = vmatprep.subr.bf16.mxu1 %v4822_v63 }
 0xc48   :  { %v3408_v31 = vpop.f32.mrb[92].mxu1 }
 0xc49   :  { %v3598_v38 = vmul.f32 0.35355338, %v3408_v31  ;;  %v4623_v39 = vpop.f32.mrb[93].mxu1 }
 0xc4a   :  { %v3411_v40 = vpop.f32.mrb[94].mxu1  ;;  %v3454_v33 = vpop.f32.mrb[80].mxu0 }
 0xc4b   :  { %v3599_v41 = vmul.f32 0.35355338, %v3454_v33  ;;  %v4624_v42 = vpop.f32.mrb[95].mxu1  ;;  %v4629_v43 = vpop.f32.mrb[81].mxu0  ;;  %v3603_v48 = vsel %vm862_vm5, %v3598_v38, -inf  ;;  %v3665_v33 = vpack.c.bf16 %v3343_v28, %v3343_v28 }
 0xc4c   :  { %v3457_v44 = vpop.f32.mrb[82].mxu0  ;;  %3604 = vmax.xlane.f32.xlu0 %v3603_v48 }
 0xc4d   :  { %v4630_v45 = vpop.f32.mrb[83].mxu0  ;;  %v3606_v47 = vsel %vm862_vm5, %v3599_v41, -inf  ;;  %v3352_v44 = vrot.slane %v5439_v22, %v4896_v11  ;;  %v3764_v17 = vsel %vm932_vm4, %v3665_v33, 0 }
 0xc4e   :  { %3607 = vmax.xlane.f32.xlu1 %v3606_v47 }
 0xc4f   :  { %v3667_v22 = vpack.c.bf16 %v3352_v44, %v3352_v44  ;;  %v4813_v44 = vld [vmem:[%s5529_s0 + $0x2] sm:$0x3] }
 0xc50   :  { %v3500_v32 = vpop.f32.mrb[96].mxu1 }
 0xc51   :  { %v3600_v49 = vmul.f32 0.35355338, %v3500_v32  ;;  %v4635_v50 = vpop.f32.mrb[97].mxu1 }
 0xc52   :  { %v3503_v52 = vpop.f32.mrb[98].mxu1  ;;  %v3546_v27 = vpop.f32.mrb[84].mxu0 }
 0xc53   :  { %v3601_v53 = vmul.f32 0.35355338, %v3546_v27  ;;  %v4636_v54 = vpop.f32.mrb[99].mxu1  ;;  %v4641_v55 = vpop.f32.mrb[85].mxu0  ;;  %v3609_v56 = vsel %vm862_vm5, %v3600_v49, -inf }
 0xc54   :  { %v3549_v29 = vpop.f32.mrb[86].mxu0  ;;  %3610 = vmax.xlane.f32.xlu0 %v3609_v56  ;;  %v3856_v55 = vsel %vm932_vm4, %v3667_v22, 0 }
 0xc55   :  { %v4642_v57 = vpop.f32.mrb[87].mxu0  ;;  %v3612_v58 = vsel %vm862_vm5, %v3601_v53, -inf }
 0xc56   :  { %3613 = vmax.xlane.f32.xlu1 %v3612_v58  ;;  %v4198_v58 = vld [vmem:[%s5538_s9 + $0xc] sm:$0xf] }
 0xc58   :  { %v3592_v37 = vpop.f32.mrb[100].mxu1 }
 0xc59   :  { %v3602_v59 = vmul.f32 0.35355338, %v3592_v37  ;;  %v4647_v35 = vpop.f32.mrb[101].mxu1  ;;  %v3936_v37 = vsel %vm2061_vm7, %v4198_v58, 0 }
 0xc5a   :  { %v3595_v36 = vpop.f32.mrb[102].mxu1 }
 0xc5b   :  { %v4648_v18 = vpop.f32.mrb[103].mxu1  ;;  %v3615_v46 = vsel %vm862_vm5, %v3602_v59, -inf }
 0xc5c   :  { %3616 = vmax.xlane.f32.xlu0 %v3615_v46 }
 0xcd9   :  { %v3605_v60 = vpop.xlane.xlu0 %3604 }
 0xcda   :  { %v3618_v61 = vsub.f32 %v3598_v38, %v3605_v60  ;;  %v3345_v38 = vcombine.high %v3343_v28, %v3343_v28 }
 0xcdb   :  { %v3608_v62 = vpop.xlane.xlu1 %3607 }
 0xcdc   :  { %v3623_v0 = vmul.f32 1.442695, %v3618_v61  ;;  %v3619_v1 = vsub.f32 %v3599_v41, %v3608_v62  ;;  %v3666_v48 = vpack.c.bf16 %v3345_v38, %v3345_v38 }
 0xcde   :  { %4792 = vpow2.f32 %v3623_v0  ;;  %v3625_v2 = vmul.f32 1.442695, %v3619_v1  ;;  %v3810_v32 = vsel %vm932_vm4, %v3666_v48, 0 }
 0xce0   :  { %4794 = vpow2.f32 %v3625_v2 }
 0xce1   :  { %v3611_v34 = vpop.xlane.xlu0 %3610 }
 0xce2   :  { %v3620_v3 = vsub.f32 %v3600_v49, %v3611_v34 }
 0xce3   :  { %v3614_v4 = vpop.xlane.xlu1 %3613 }
 0xce4   :  { %v3627_v51 = vmul.f32 1.442695, %v3620_v3  ;;  %v3621_v5 = vsub.f32 %v3601_v53, %v3614_v4 }
 0xce6   :  { %4796 = vpow2.f32 %v3627_v51  ;;  %v3629_v6 = vmul.f32 1.442695, %v3621_v5 }
 0xce8   :  { %v4793_v7 = vpop.eup %4792  ;;  %4798 = vpow2.f32 %v3629_v6 }
 0xce9   :  { %v3617_v8 = vpop.xlane.xlu0 %3616  ;;  %v3633_v9 = vsel %vm862_vm5, %v4793_v7, 0.0 }
 0xcea   :  { %v4795_v10 = vpop.eup %4794  ;;  %v3622_v12 = vsub.f32 %v3602_v59, %v3617_v8  ;;  %3634 = vadd.xlane.f32.xlu1 %v3633_v9 }
 0xceb   :  { %v3636_v13 = vsel %vm862_vm5, %v4795_v10, 0.0 }
 0xcec   :  { %v3631_v14 = vmul.f32 1.442695, %v3622_v12  ;;  %3637 = vadd.xlane.f32.xlu0 %v3636_v13 }
 0xcee   :  { %4800 = vpow2.f32 %v3631_v14 }
 0xcf0   :  { %v4797_v15 = vpop.eup %4796 }
 0xcf1   :  { %v3639_v16 = vsel %vm862_vm5, %v4797_v15, 0.0 }
 0xcf2   :  { %v4799_v19 = vpop.eup %4798  ;;  %3640 = vadd.xlane.f32.xlu1 %v3639_v16 }
 0xcf3   :  { %v3642_v20 = vsel %vm862_vm5, %v4799_v19, 0.0 }
 0xcf4   :  { %3643 = vadd.xlane.f32.xlu0 %v3642_v20 }
 0xcf8   :  { %v4801_v21 = vpop.eup %4800 }
 0xcf9   :  { %v3645_v23 = vsel %vm862_vm5, %v4801_v21, 0.0 }
 0xcfa   :  { %3646 = vadd.xlane.f32.xlu1 %v3645_v23 }
 0xd77   :  { %v3635_v24 = vpop.xlane.xlu1 %3634 }
 0xd78   :  { %4802 = vrcp.f32 %v3635_v24 }
 0xd79   :  { %v3638_v26 = vpop.xlane.xlu0 %3637 }
 0xd7a   :  { %4804 = vrcp.f32 %v3638_v26 }
 0xd7f   :  { %v3641_v30 = vpop.xlane.xlu1 %3640 }
 0xd80   :  { %4806 = vrcp.f32 %v3641_v30 }
 0xd81   :  { %v3644_v31 = vpop.xlane.xlu0 %3643 }
 0xd82   :  { %v4803_v39 = vpop.eup %4802  ;;  %4808 = vrcp.f32 %v3644_v31 }
 0xd83   :  { %v3653_v40 = vmul.f32 %v4803_v39, %v4793_v7 }
 0xd84   :  { %v4805_v41 = vpop.eup %4804 }
 0xd85   :  { %v3654_v42 = vmul.f32 %v4805_v41, %v4795_v10  ;;  %v3658_v43 = vpack.c.bf16 %v3653_v40, %v3653_v40  ;;  %v4812_v40 = vld [vmem:[%s5529_s0] sm:$0x3] }
 0xd87   :  { %4652 = vmatmul.mubr.msk.bf16.vlgmr.msra.gmra.mrb[88].mxu0 %vm928_vm6, %v3658_v43  ;;  %v3647_v45 = vpop.xlane.xlu1 %3646  ;;  %v3659_v47 = vpack.c.bf16 %v3654_v42, %v3654_v42 }
 0xd88   :  { %4662 = vmatpush3.bf16.msra.mxu0 %v3764_v17  ;;  %4810 = vrcp.f32 %v3647_v45  ;;  %4663 = vmatprep.mubr.msk.bf16.mxu0 %vm4823_vm2, %v4822_v63  ;;  %v4814_v45 = vld [vmem:[%s5529_s0 + $0x4] sm:$0x3] }
 0xd89   :  { %4658 = vmatmul.mubr.msk.bf16.vlgmr.msra.gmra.mrb[104].mxu1 %vm928_vm6, %v3659_v47  ;;  %4673 = vmatprep.subr.bf16.mxu0 %v4822_v63 }
 0xd8a   :  { %v4807_v49 = vpop.eup %4806  ;;  %4668 = vmatpush3.bf16.msra.mxu1 %v3810_v32  ;;  %4669 = vmatprep.mubr.msk.bf16.mxu1 %vm4823_vm2, %v4822_v63 }
 0xd8b   :  { %v3655_v50 = vmul.f32 %v4807_v49, %v4797_v15  ;;  %v4815_v49 = vld [vmem:[%s5529_s0 + $0x8] sm:$0x3] }
 0xd8c   :  { %v4809_v52 = vpop.eup %4808 }
 0xd8d   :  { %v3656_v27 = vmul.f32 %v4809_v52, %v4799_v19  ;;  %v3660_v53 = vpack.c.bf16 %v3655_v50, %v3655_v50  ;;  %v4200_v19 = vld [vmem:[%s5539_s10] ss:$0 sm:$0xff] }
 0xd8e   :  { %v4023_v20 = vcombine.high %v4200_v19, %v4200_v19 }
 0xd8f   :  { %v3661_v54 = vpack.c.bf16 %v3656_v27, %v3656_v27  ;;  %4664 = vmatmul.mubr.msk.bf16.vlgmr.msra.gmra.mrb[92].mxu0 %vm928_vm6, %v3660_v53 }
 0xd90   :  { %4674 = vmatpush3.bf16.msra.mxu0 %v3856_v55  ;;  %4675 = vmatprep.mubr.msk.bf16.mxu0 %vm4823_vm2, %v4822_v63  ;;  %v4037_v24 = vrot.slane %v4023_v20, %v4896_v11 }
 0xd91   :  { %4670 = vmatmul.mubr.msk.bf16.vlgmr.msra.gmra.mrb[108].mxu1 %vm928_vm6, %v3661_v54  ;;  %4679 = vmatprep.subr.bf16.mxu0 %v4822_v63 }
 0xd92   :  { %v4811_v56 = vpop.eup %4810  ;;  %v4039_v43 = vcombine.high %v4037_v24, %v4037_v24 }
 0xd93   :  { %v3657_v29 = vmul.f32 %v4811_v56, %v4801_v21  ;;  %v4030_v21 = vrot.slane %v4200_v19, %v4896_v11 }
 0xd95   :  { %v3662_v57 = vpack.c.bf16 %v3657_v29, %v3657_v29  ;;  %v4038_v30 = vcombine.high %v4030_v21, %v4030_v21 }
 0xd97   :  { %4676 = vmatmul.mubr.msk.bf16.vlgmr.msra.gmra.mrb[96].mxu0 %vm928_vm6, %v3662_v57 }
 0xd98   :  { %4681 = vmatprep.mubr.msk.bf16.mxu0 %vm4823_vm2, %v4822_v63  ;;  %4680 = vmatpush3.bf16.msra.mxu0 %v3936_v37 }
 0xe5a   :  { %v3708_v59 = vpop.f32.mrb[88].mxu0 }
 0xe5b   :  { %v4653_v35 = vpop.f32.mrb[89].mxu0 }
 0xe5c   :  { %v3711_v36 = vpop.f32.mrb[90].mxu0  ;;  %v3754_v18 = vpop.f32.mrb[104].mxu1 }
 0xe5d   :  { %v3903_v46 = vcombine.low %v3708_v59, %v3754_v18  ;;  %v4654_v60 = vpop.f32.mrb[91].mxu0  ;;  %v4659_v61 = vpop.f32.mrb[105].mxu1 }
 0xe5e   :  { %v3757_v62 = vpop.f32.mrb[106].mxu1 }
 0xe5f   :  { %v4660_v0 = vpop.f32.mrb[107].mxu1  ;;  %v3911_v6 = vrot.slane %v3903_v46, %v4896_v11 }
 0xe62   :  { %v3800_v1 = vpop.f32.mrb[92].mxu0 }
 0xe63   :  { %v4665_v2 = vpop.f32.mrb[93].mxu0 }
 0xe64   :  { %v3803_v34 = vpop.f32.mrb[94].mxu0  ;;  %v3846_v63 = vpop.f32.mrb[108].mxu1 }
 0xe65   :  { %v3904_v3 = vcombine.low %v3800_v1, %v3846_v63  ;;  %v4666_v4 = vpop.f32.mrb[95].mxu0  ;;  %v4671_v51 = vpop.f32.mrb[109].mxu1 }
 0xe66   :  { %v3849_v5 = vpop.f32.mrb[110].mxu1 }
 0xe67   :  { %v3918_v7 = vrot.slane %v3904_v3, %v4896_v11  ;;  %v4672_v8 = vpop.f32.mrb[111].mxu1 }
 0xe69   :  { %v3919_v9 = vcombine.low %v3911_v6, %v3918_v7 }
 0xe6a   :  { %v3892_v10 = vpop.f32.mrb[96].mxu0 }
 0xe6b   :  { %v3926_v12 = vrot.slane %v3892_v10, %v4896_v11  ;;  %v4677_v13 = vpop.f32.mrb[97].mxu0 }
 0xe6c   :  { %v3895_v14 = vpop.f32.mrb[98].mxu0 }
 0xe6d   :  { %v3929_v15 = vpack.c.bf16 %v3926_v12, %v3919_v9  ;;  %v4678_v16 = vpop.f32.mrb[99].mxu0 }
 0xe6f   :  { %4682 = vmatmul.mubr.msk.bf16.vlgmr.msra.gmra.mrb[48].mxu0 %vm626_vm3, %v3929_v15 }
 0xf42   :  { %v3972_v23 = vpop.f32.mrb[48].mxu0 }
 0xf43   :  { %v3983_v25 = vcombine.high %v3972_v23, %v3972_v23  ;;  %v3990_v26 = vrot.slane %v3972_v23, %v4896_v11  ;;  %v4683_v28 = vpop.f32.mrb[49].mxu0 }
 0xf44   :  { %v3975_v31 = vpop.f32.mrb[50].mxu0 }
 0xf45   :  { %v3997_v38 = vrot.slane %v3983_v25, %v4896_v11  ;;  %v3998_v39 = vcombine.high %v3990_v26, %v3990_v26  ;;  %v4012_v33 = vadd.f32 %v4812_v40, %v3990_v26  ;;  %v4006_v41 = vrot.slane %v3975_v31, %v4896_v11  ;;  %v4684_v42 = vpop.f32.mrb[51].mxu0  ;;  %v4816_v11 = vld [vmem:[%s5529_s0 + $0x6] sm:$0x3] }
 0xf47   :  { %v3999_v48 = vcombine.high %v3997_v38, %v3997_v38  ;;  %v4013_v17 = vadd.f32 %v4813_v44, %v3998_v39  ;;  %v4014_v47 = vadd.f32 %v4814_v45, %v3997_v38  ;;  %v4044_v32 = vadd.f32 %v4030_v21, %v4012_v33 }
 0xf48   :  { %v4016_v22 = vadd.f32 %v4815_v49, %v4006_v41 }
 0xf49   :  { %v4015_v50 = vadd.f32 %v4816_v11, %v3999_v48  ;;  %v4045_v52 = vadd.f32 %v4038_v30, %v4013_v17  ;;  %v4046_v27 = vadd.f32 %v4037_v24, %v4014_v47  ;;  %4049 = vst.msk [vmem:[%s5540_s11] sm:$0x3] %vm79_vm1, %v4044_v32 }
 0xf4a   :  { %v4048_v53 = vadd.f32 %v4030_v21, %v4016_v22 }
 0xf4b   :  { %v4047_v54 = vadd.f32 %v4039_v43, %v4015_v50  ;;  %4050 = vst.msk [vmem:[%s5540_s11 + $0x2] sm:$0x3] %vm79_vm1, %v4045_v52  ;;  %4051 = vst.msk [vmem:[%s5540_s11 + $0x4] sm:$0x3] %vm79_vm1, %v4046_v27 }
 0xf4c   :  { %4053 = vst.msk [vmem:[%s5540_s11 + $0x8] sm:$0x3] %vm79_vm1, %v4048_v53 }
 0xf4d   :  { %4052 = vst.msk [vmem:[%s5540_s11 + $0x6] sm:$0x3] %vm79_vm1, %v4047_v54 }

</bundles_post_ra>
